<compile_context>
chip_gen: v6e
topology: v6e:2x2x1
jax: 0.10.0
libtpu: 0.0.40
codegen_flags: <defaults>
</compile_context>

<pallas_src>
import functools

import jax
import jax.numpy as jnp
from jax import lax
from jax.experimental import pallas as pl
from jax.experimental.pallas import tpu as pltpu


def _round_up(x, m):
    return (x + m - 1) // m * m


_VMEM_LIMIT = 48 * 1024 * 1024          # safe on v5e/v6e (128 MiB) and v7x (64 MiB)
_VMEM_BUDGET = 40 * 1024 * 1024         # tile-selection budget (leaves headroom)


# ----------------------------------------------------------------------------
# 7x7 conv (im2col + weight-resident MXU matmul) with fused BN-statistics
# epilogue.  y is stored bf16; the statistics come from the fp32 accumulator.
# ----------------------------------------------------------------------------
def _conv_stats_kernel(a_ref, b_ref, y_ref, st_ref, acc_ref):
    @pl.when(pl.program_id(1) == 0)
    def _():
        acc_ref[...] = jnp.zeros_like(acc_ref)

    acc_ref[...] += jnp.dot(a_ref[...], b_ref[...],
                            preferred_element_type=jnp.float32)

    @pl.when(pl.program_id(1) == pl.num_programs(1) - 1)
    def _():
        acc = acc_ref[...]
        y_ref[...] = acc.astype(y_ref.dtype)
        s1 = jnp.sum(acc, axis=0, keepdims=True)          # (1, Np)
        s2 = jnp.sum(acc * acc, axis=0, keepdims=True)    # (1, Np)
        st_ref[...] = jnp.concatenate([s1, s2], axis=0)[None]   # (1, 2, Np)


def _im2col(x, kh, kw, stride, pad, dtype):
    """x: NHWC -> (N*OH*OW, kh*kw*C) in `dtype` (bf16 halves HBM traffic)."""
    N, H, W, C = x.shape
    OH = (H + 2 * pad - kh) // stride + 1
    OW = (W + 2 * pad - kw) // stride + 1
    xp = jnp.pad(x.astype(dtype), ((0, 0), (pad, pad), (pad, pad), (0, 0)))
    cols = []
    for dh in range(kh):
        for dw in range(kw):
            cols.append(xp[:, dh:dh + stride * (OH - 1) + 1:stride,
                           dw:dw + stride * (OW - 1) + 1:stride, :])
    a = jnp.concatenate(cols, axis=-1).reshape(N * OH * OW, kh * kw * C)
    return a, OH, OW


def conv7x7_with_stats(x_nhwc, w, *, compute_dtype=jnp.bfloat16):
    """Returns (y (Mp,Np) bf16, stats (mt,2,Np) fp32, M, OH, OW)."""
    N, H, W, Cin = x_nhwc.shape
    KH, KW, _, Cout = w.shape
    # TODO(synk): for large feature maps replace the materialized im2col with
    # an in-kernel row-tap pipeline (shifted pl.ds windows / halo DMA) to
    # avoid the KH*KW x HBM blow-up.
    a, OH, OW = _im2col(x_nhwc, KH, KW, 1, KH // 2, compute_dtype)
    b = w.reshape(KH * KW * Cin, Cout).astype(compute_dtype)

    M, K = a.shape
    Np = _round_up(Cout, 128)
    Kp = _round_up(K, 128)

    def vmem_need(tm, tk):
        return (2 * tm * tk * 2          # double-buffered bf16 A tile
                + 2 * tk * Np * 2        # weight slab (bf16)
                + 2 * tm * Np * 2        # bf16 y tile
                + tm * Np * 4            # fp32 accumulator scratch
                + 2 * 2 * Np * 4)        # stats tile

    # Prefer collapsing K (weight slab resident, DMA'd exactly once).
    if vmem_need(128, Kp) <= _VMEM_BUDGET:
        tk = Kp
    else:
        tk = min(Kp, 2048)
        Kp = _round_up(K, tk)

    tm = 128
    for cand in (512, 256):
        if vmem_need(cand, tk) <= _VMEM_BUDGET and pl.cdiv(M, cand) >= 2:
            tm = cand
            break
    if M <= tm:
        tm = max(8, _round_up(M, 8))
    Mp = _round_up(M, tm)

    if (Mp, Kp) != (M, K):
        a = jnp.pad(a, ((0, Mp - M), (0, Kp - K)))
    if (Kp, Np) != (K, Cout):
        b = jnp.pad(b, ((0, Kp - K), (0, Np - Cout)))
    mt, kt = Mp // tm, Kp // tk

    y, stats = pl.pallas_call(
        _conv_stats_kernel,
        out_shape=(jax.ShapeDtypeStruct((Mp, Np), jnp.bfloat16),
                   jax.ShapeDtypeStruct((mt, 2, Np), jnp.float32)),
        grid_spec=pltpu.PrefetchScalarGridSpec(
            num_scalar_prefetch=0,
            grid=(mt, kt),
            in_specs=[pl.BlockSpec((tm, tk), lambda i, k: (i, k)),
                      pl.BlockSpec((tk, Np), lambda i, k: (k, 0))],
            out_specs=[pl.BlockSpec((tm, Np), lambda i, k: (i, 0)),
                       pl.BlockSpec((1, 2, Np), lambda i, k: (i, 0, 0))],
            scratch_shapes=[pltpu.VMEM((tm, Np), jnp.float32)]),
        compiler_params=pltpu.CompilerParams(
            dimension_semantics=("parallel", "arbitrary"),
            vmem_limit_bytes=_VMEM_LIMIT),
    )(a, b)
    return y, stats, M, OH, OW


# ----------------------------------------------------------------------------
# Fused BatchNorm(scale,shift) + ReLU + 1x1 conv (conv_seg, with bias) kernel.
# ----------------------------------------------------------------------------
def _bn_relu_conv1x1_kernel(y_ref, s_ref, t_ref, w_ref, b_ref, o_ref):
    z = jnp.maximum(y_ref[...].astype(jnp.float32) * s_ref[...] + t_ref[...],
                    0.0)
    o_ref[...] = jnp.dot(z.astype(w_ref.dtype), w_ref[...],
                         preferred_element_type=jnp.float32) + b_ref[...]


def bn_relu_conv1x1(y, stats, m_true, gamma, beta, eps, w2, b2, *,
                    compute_dtype=jnp.bfloat16):
    """y:(Mp,Cp) bf16 conv output (padded rows zero), stats:(mt,2,Cp) fp32."""
    Mp, Cp = y.shape
    C = gamma.shape[0]
    Cout = w2.shape[1]

    # Finish the BN statistics reduction (tiny: mt x 2 x Cp, fp32).
    s = jnp.sum(stats, axis=0)                        # (2, Cp)
    mean = s[0, :C] / m_true
    var = s[1, :C] / m_true - mean * mean             # biased, torch training BN
    scale = gamma * lax.rsqrt(var + eps)
    shift = beta - mean * scale
    scale_f = jnp.zeros((1, Cp), jnp.float32).at[0, :C].set(scale)
    shift_f = jnp.zeros((1, Cp), jnp.float32).at[0, :C].set(shift)

    Np2 = _round_up(Cout, 128)
    w2p = jnp.zeros((Cp, Np2), compute_dtype).at[:C, :Cout].set(
        w2.astype(compute_dtype))
    b2p = jnp.zeros((1, Np2), jnp.float32).at[0, :Cout].set(b2)

    # Large row tiles (HBM-stream-bound kernel) but keep >= 2 grid steps when
    # possible so both v7x TensorCores get work.
    tm = Mp
    for cand in (1024, 512, 256, 128):
        if Mp % cand == 0 and Mp // cand >= 2:
            tm = cand
            break

    out = pl.pallas_call(
        _bn_relu_conv1x1_kernel,
        out_shape=jax.ShapeDtypeStruct((Mp, Np2), jnp.float32),
        grid_spec=pltpu.PrefetchScalarGridSpec(
            num_scalar_prefetch=0,
            grid=(Mp // tm,),
            in_specs=[pl.BlockSpec((tm, Cp), lambda i: (i, 0)),
                      pl.BlockSpec((1, Cp), lambda i: (0, 0)),
                      pl.BlockSpec((1, Cp), lambda i: (0, 0)),
                      pl.BlockSpec((Cp, Np2), lambda i: (0, 0)),
                      pl.BlockSpec((1, Np2), lambda i: (0, 0))],
            out_specs=pl.BlockSpec((tm, Np2), lambda i: (i, 0)),
        ),
        compiler_params=pltpu.CompilerParams(
            dimension_semantics=("parallel",),
            vmem_limit_bytes=_VMEM_LIMIT),
    )(y, scale_f, shift_f, w2p, b2p)
    return out


# ----------------------------------------------------------------------------
# Separable bilinear upsample (align_corners=True), fp32 operands.
#   pass 1 (height): (Ho,H) @ (H, W*Cp)   -- lanes = W*Cp  (multiple of 128)
#   pass 2 (width) : (Wo,W) @ (W, Cp)     -- lanes = Cp    (128)
# Only order-preserving reshapes are used between passes (no relayout).
# ----------------------------------------------------------------------------
def _interp_matrix(n_in, n_out):
    """(n_out, n_in) align_corners=True linear interpolation weights (fp32)."""
    if n_in == 1:
        return jnp.ones((n_out, 1), jnp.float32)
    src = jnp.arange(n_out, dtype=jnp.float32) * ((n_in - 1) / max(n_out - 1, 1))
    i0 = jnp.clip(jnp.floor(src).astype(jnp.int32), 0, n_in - 2)
    frac = src - i0.astype(jnp.float32)
    rows = jnp.arange(n_out)
    A = jnp.zeros((n_out, n_in), jnp.float32)
    A = A.at[rows, i0].add(1.0 - frac)
    A = A.at[rows, i0 + 1].add(frac)
    return A


def _upsample_rows_kernel(a_ref, x_ref, o_ref):
    o_ref[...] = jnp.dot(a_ref[...], x_ref[...],
                         preferred_element_type=jnp.float32)


def _upsample_cols_kernel(a_ref, x_ref, o_ref):
    def body(r, carry):
        o_ref[r] = jnp.dot(a_ref[...], x_ref[r],
                           preferred_element_type=jnp.float32)
        return carry
    lax.fori_loop(0, x_ref.shape[0], body, 0, unroll=True)


def bilinear_upsample_seg(seg_flat, N, H, W, Cp, scale):
    """seg_flat: (N*H*W, Cp) fp32 -> (N, Ho, Wo, Cp) fp32."""
    Ho, Wo = H * scale, W * scale
    Ah = _interp_matrix(H, Ho)          # fp32: align_corners fractions exact
    Aw = _interp_matrix(W, Wo)

    # Pass 1: height.  Pure reshape (element order preserved).
    x_h = seg_flat.reshape(N, H, W * Cp)
    t = pl.pallas_call(
        _upsample_rows_kernel,
        out_shape=jax.ShapeDtypeStruct((N, Ho, W * Cp), jnp.float32),
        grid_spec=pltpu.PrefetchScalarGridSpec(
            num_scalar_prefetch=0,
            grid=(N,),
            in_specs=[pl.BlockSpec((Ho, H), lambda n: (0, 0)),
                      pl.BlockSpec((None, H, W * Cp), lambda n: (n, 0, 0))],
            out_specs=pl.BlockSpec((None, Ho, W * Cp), lambda n: (n, 0, 0)),
        ),
        compiler_params=pltpu.CompilerParams(
            dimension_semantics=("parallel",)),
    )(Ah, x_h)

    # Pass 2: width.  Pure reshape (element order preserved).
    rows = N * Ho
    x_w = t.reshape(rows, W, Cp)
    tR = 1
    for cand in (16, 8, 4, 2):
        if rows % cand == 0:
            tR = cand
            break
    out = pl.pallas_call(
        _upsample_cols_kernel,
        out_shape=jax.ShapeDtypeStruct((rows, Wo, Cp), jnp.float32),
        grid_spec=pltpu.PrefetchScalarGridSpec(
            num_scalar_prefetch=0,
            grid=(rows // tR,),
            in_specs=[pl.BlockSpec((Wo, W), lambda i: (0, 0)),
                      pl.BlockSpec((tR, W, Cp), lambda i: (i, 0, 0))],
            out_specs=pl.BlockSpec((tR, Wo, Cp), lambda i: (i, 0, 0)),
        ),
        compiler_params=pltpu.CompilerParams(
            dimension_semantics=("parallel",)),
    )(Aw, x_w)
    return out.reshape(N, Ho, Wo, Cp)


# ----------------------------------------------------------------------------
# deeperlab_seg_head forward
# ----------------------------------------------------------------------------
def deeperlab_seg_head_forward(x_nchw, params, *, scale=4, bn_eps=1e-5):
    x = jnp.transpose(x_nchw, (0, 2, 3, 1))          # NCHW -> NHWC
    N = x.shape[0]
    Cout = params["seg_w"].shape[1]

    # ConvBnRelu: 7x7/s1/p3 conv (no bias), fused BN-stats epilogue, bf16 y.
    y, stats, M, OH, OW = conv7x7_with_stats(x, params["conv_w"])

    # BN (batch stats) + ReLU + 1x1 conv_seg (+bias), fused in one kernel.
    seg = bn_relu_conv1x1(y, stats, float(M), params["bn_g"], params["bn_b"],
                          bn_eps, params["seg_w"], params["seg_b"])
    Cp = seg.shape[1]
    seg = seg[:M]            # drop padded rows (no-op when Mp == M)

    # Separable bilinear x`scale` (align_corners=True), fp32 operands.
    # Padded channel columns of seg are exactly zero, so they stay zero.
    up = bilinear_upsample_seg(seg, N, OH, OW, Cp, scale)     # (N,Ho,Wo,Cp)

    # TODO(synk): fold this final channel-slice + NCHW transpose into the
    # width-pass out_spec to remove the last XLA relayout.
    return jnp.transpose(up[..., :Cout], (0, 3, 1, 2))


# ----------------------------------------------------------------------------
# Pure-JAX fp32 reference (same math, no Pallas) for a sanity check.
# ----------------------------------------------------------------------------
def reference_forward(x_nchw, params, *, scale=4, bn_eps=1e-5):
    x = jnp.transpose(x_nchw, (0, 2, 3, 1)).astype(jnp.float32)
    y = lax.conv_general_dilated(
        x, params["conv_w"], window_strides=(1, 1), padding=((3, 3), (3, 3)),
        dimension_numbers=("NHWC", "HWIO", "NHWC"),
        precision=lax.Precision.HIGHEST)
    mean = jnp.mean(y, axis=(0, 1, 2))
    var = jnp.var(y, axis=(0, 1, 2))
    yhat = (y - mean) * params["bn_g"] / jnp.sqrt(var + bn_eps) + params["bn_b"]
    z = jnp.maximum(yhat, 0.0)
    seg = jnp.einsum("nhwc,cd->nhwd", z, params["seg_w"],
                     precision=lax.Precision.HIGHEST) + params["seg_b"]
    _, H, W, _ = seg.shape
    Ah = _interp_matrix(H, H * scale)
    Aw = _interp_matrix(W, W * scale)
    out = jnp.einsum("Oh,Pw,nhwc->nOPc", Ah, Aw, seg,
                     precision=lax.Precision.HIGHEST)
    return jnp.transpose(out, (0, 3, 1, 2))


if __name__ == "__main__":
    key = jax.random.PRNGKey(0)
    k1, k2, k3, k4 = jax.random.split(key, 4)
    N, Cin, H, W = 2, 4, 16, 16
    Cmid, Cout, scale = 256, 21, 4

    x = jax.random.normal(k1, (N, Cin, H, W), jnp.float32)     # NCHW like torch
    params = {
        "conv_w": jax.random.normal(k2, (7, 7, Cin, Cmid), jnp.float32)
        * (2.0 / (7 * 7 * Cin)) ** 0.5,
        "bn_g": jnp.ones((Cmid,), jnp.float32),
        "bn_b": jnp.zeros((Cmid,), jnp.float32),
        "seg_w": jax.random.normal(k3, (Cmid, Cout), jnp.float32)
        * (1.0 / Cmid) ** 0.5,
        "seg_b": jax.random.normal(k4, (Cout,), jnp.float32) * 0.05,
    }

    fwd = jax.jit(functools.partial(deeperlab_seg_head_forward, scale=scale))
    out = jax.block_until_ready(fwd(x, params))

    assert out.shape == (N, Cout, H * scale, W * scale), out.shape
    assert bool(jnp.all(jnp.isfinite(out)))

    ref = reference_forward(x, params, scale=scale)
    err = float(jnp.max(jnp.abs(out - ref)) / (jnp.max(jnp.abs(ref)) + 1e-6))
    assert err < 5e-2, f"mismatch vs fp32 reference: {err}"

    print("KERNEL_OK")
</pallas_src>

<mosaic_0001>
module attributes {stable_mosaic.version = 11 : i64} {
  func.func private @main(%arg0: i32) attributes {dimension_semantics = [#tpu.dimension_semantics<core_parallel>], iteration_bounds = array<i64: 2>, tpu.core_type = #tpu.core_type<sc_scalar_subcore>, window_params = []} {
    return
  }
}

module attributes {stable_mosaic.version = 11 : i64} {
  func.func private @main(%arg0: i32) attributes {dimension_semantics = [#tpu.dimension_semantics<core_parallel>], iteration_bounds = array<i64: 2>, tpu.core_type = #tpu.core_type<sc_scalar_subcore>, window_params = []} {
    return
  }
}

module attributes {stable_mosaic.version = 11 : i64} {
  func.func @_conv_stats_kernel(%arg0: i32, %arg1: i32, %arg2: memref<256x256xbf16, #tpu.memory_space<vmem>>, %arg3: memref<256x256xbf16, #tpu.memory_space<vmem>>, %arg4: memref<256x256xbf16, #tpu.memory_space<vmem>>, %arg5: memref<1x2x256xf32, #tpu.memory_space<vmem>>, %arg6: memref<256x256xf32, #tpu.memory_space<vmem>>) attributes {dimension_semantics = [#tpu.dimension_semantics<parallel>, #tpu.dimension_semantics<arbitrary>], iteration_bounds = array<i64: 2, 1>, scalar_prefetch = 0 : i64, scratch_operands = 1 : i64, tpu.core_type = #tpu.core_type<tc>, window_params = [{transform_indices = @transform_0, window_bounds = array<i64: 256, 256>}, {transform_indices = @transform_1, window_bounds = array<i64: 256, 256>}, {transform_indices = @transform_2, window_bounds = array<i64: 256, 256>}, {transform_indices = @transform_3, window_bounds = array<i64: 1, 2, 256>}]} {
    %c0_i32 = arith.constant 0 : i32
    %0 = arith.cmpi eq, %arg1, %c0_i32 : i32
    %1 = arith.extui %0 : i1 to i32
    %c0_i32_0 = arith.constant 0 : i32
    %2 = arith.cmpi ne, %1, %c0_i32_0 : i32
    scf.if %2 {
      %cst_10 = arith.constant 0.000000e+00 : f32
      %12 = vector.broadcast %cst_10 : f32 to vector<256x256xf32>
      %c0_11 = arith.constant 0 : index
      %c0_12 = arith.constant 0 : index
      %13 = vector.load %arg6[%c0_11, %c0_12] : memref<256x256xf32, #tpu.memory_space<vmem>>, vector<256x256xf32>
      tpu.vector_store %arg6[%c0_11, %c0_12], %12 {strides = array<i32>} : memref<256x256xf32, #tpu.memory_space<vmem>>, vector<256x256xf32>,
    } else {
    }
    %c0 = arith.constant 0 : index
    %c0_1 = arith.constant 0 : index
    %3 = vector.load %arg6[%c0, %c0_1] : memref<256x256xf32, #tpu.memory_space<vmem>>, vector<256x256xf32>
    %c0_2 = arith.constant 0 : index
    %c0_3 = arith.constant 0 : index
    %4 = vector.load %arg2[%c0_2, %c0_3] : memref<256x256xbf16, #tpu.memory_space<vmem>>, vector<256x256xbf16>
    %c0_4 = arith.constant 0 : index
    %c0_5 = arith.constant 0 : index
    %5 = vector.load %arg3[%c0_4, %c0_5] : memref<256x256xbf16, #tpu.memory_space<vmem>>, vector<256x256xbf16>
    %cst = arith.constant dense<0.000000e+00> : vector<256x256xf32>
    %6 = tpu.matmul %4, %5, %cst {dimension_numbers = #tpu.dot_dimension_numbers<[1], [0], [0], [1], [0, 0, 1, 1], [], []>} : vector<256x256xbf16>, vector<256x256xbf16>, vector<256x256xf32> -> vector<256x256xf32>
    %7 = arith.addf %3, %6 : vector<256x256xf32>
    %c0_6 = arith.constant 0 : index
    %c0_7 = arith.constant 0 : index
    %8 = vector.load %arg6[%c0_6, %c0_7] : memref<256x256xf32, #tpu.memory_space<vmem>>, vector<256x256xf32>
    tpu.vector_store %arg6[%c0_6, %c0_7], %7 {strides = array<i32>} : memref<256x256xf32, #tpu.memory_space<vmem>>, vector<256x256xf32>,
    %c0_i32_8 = arith.constant 0 : i32
    %9 = arith.cmpi eq, %arg1, %c0_i32_8 : i32
    %10 = arith.extui %9 : i1 to i32
    %c0_i32_9 = arith.constant 0 : i32
    %11 = arith.cmpi ne, %10, %c0_i32_9 : i32
    scf.if %11 {
      %c0_10 = arith.constant 0 : index
      %c0_11 = arith.constant 0 : index
      %12 = vector.load %arg6[%c0_10, %c0_11] : memref<256x256xf32, #tpu.memory_space<vmem>>, vector<256x256xf32>
      %13 = arith.truncf %12 : vector<256x256xf32> to vector<256x256xbf16>
      %c0_12 = arith.constant 0 : index
      %c0_13 = arith.constant 0 : index
      %14 = vector.load %arg4[%c0_12, %c0_13] : memref<256x256xbf16, #tpu.memory_space<vmem>>, vector<256x256xbf16>
      tpu.vector_store %arg4[%c0_12, %c0_13], %13 {strides = array<i32>} : memref<256x256xbf16, #tpu.memory_space<vmem>>, vector<256x256xbf16>,
      %cst_14 = arith.constant dense<0.000000e+00> : vector<256xf32>
      %15 = vector.multi_reduction <add>, %12, %cst_14 [0] : vector<256x256xf32> to vector<256xf32>
      %16 = vector.shape_cast %15 : vector<256xf32> to vector<1x256xf32>
      %17 = arith.mulf %12, %12 : vector<256x256xf32>
      %cst_15 = arith.constant dense<0.000000e+00> : vector<256xf32>
      %18 = vector.multi_reduction <add>, %17, %cst_15 [0] : vector<256x256xf32> to vector<256xf32>
      %19 = vector.shape_cast %18 : vector<256xf32> to vector<1x256xf32>
      %20 = tpu.concatenate %16, %19 in 0 : vector<1x256xf32>, vector<1x256xf32> -> vector<2x256xf32>
      %21 = vector.shape_cast %20 : vector<2x256xf32> to vector<1x2x256xf32>
      %c0_16 = arith.constant 0 : index
      %c0_17 = arith.constant 0 : index
      %c0_18 = arith.constant 0 : index
      %22 = vector.load %arg5[%c0_16, %c0_17, %c0_18] : memref<1x2x256xf32, #tpu.memory_space<vmem>>, vector<1x2x256xf32>
      tpu.vector_store %arg5[%c0_16, %c0_17, %c0_18], %21 {strides = array<i32>} : memref<1x2x256xf32, #tpu.memory_space<vmem>>, vector<1x2x256xf32>,
    } else {
    }
    return
  }
  func.func @transform_0(%arg0: i32, %arg1: i32) -> (i32, i32) {
    %c0_i32 = arith.constant 0 : i32
    return %arg0, %arg1 : i32, i32
  }
  func.func @transform_1(%arg0: i32, %arg1: i32) -> (i32, i32) {
    %c0_i32 = arith.constant 0 : i32
    %c0_i32_0 = arith.constant 0 : i32
    return %arg1, %c0_i32 : i32, i32
  }
  func.func @transform_2(%arg0: i32, %arg1: i32) -> (i32, i32) {
    %c0_i32 = arith.constant 0 : i32
    %c0_i32_0 = arith.constant 0 : i32
    return %arg0, %c0_i32 : i32, i32
  }
  func.func @transform_3(%arg0: i32, %arg1: i32) -> (i32, i32, i32) {
    %c0_i32 = arith.constant 0 : i32
    %c0_i32_0 = arith.constant 0 : i32
    %c0_i32_1 = arith.constant 0 : i32
    return %arg0, %c0_i32, %c0_i32_0 : i32, i32, i32
  }
}

module attributes {stable_mosaic.version = 11 : i64} {
  func.func @_bn_relu_conv1x1_kernel(%arg0: i32, %arg1: memref<256x256xbf16, #tpu.memory_space<vmem>>, %arg2: memref<1x256xf32, #tpu.memory_space<vmem>>, %arg3: memref<1x256xf32, #tpu.memory_space<vmem>>, %arg4: memref<256x128xbf16, #tpu.memory_space<vmem>>, %arg5: memref<1x128xf32, #tpu.memory_space<vmem>>, %arg6: memref<256x128xf32, #tpu.memory_space<vmem>>) attributes {dimension_semantics = [#tpu.dimension_semantics<parallel>], iteration_bounds = array<i64: 2>, scalar_prefetch = 0 : i64, scratch_operands = 0 : i64, tpu.core_type = #tpu.core_type<tc>, window_params = [{transform_indices = @transform_0, window_bounds = array<i64: 256, 256>}, {pipeline_mode = #tpu.pipeline_mode<synchronous>, transform_indices = @transform_1, window_bounds = array<i64: 1, 256>}, {pipeline_mode = #tpu.pipeline_mode<synchronous>, transform_indices = @transform_2, window_bounds = array<i64: 1, 256>}, {pipeline_mode = #tpu.pipeline_mode<synchronous>, transform_indices = @transform_3, window_bounds = array<i64: 256, 128>}, {pipeline_mode = #tpu.pipeline_mode<synchronous>, transform_indices = @transform_4, window_bounds = array<i64: 1, 128>}, {transform_indices = @transform_5, window_bounds = array<i64: 256, 128>}]} {
    %c0 = arith.constant 0 : index
    %c0_0 = arith.constant 0 : index
    %0 = vector.load %arg1[%c0, %c0_0] : memref<256x256xbf16, #tpu.memory_space<vmem>>, vector<256x256xbf16>
    %1 = arith.extf %0 : vector<256x256xbf16> to vector<256x256xf32>
    %c0_1 = arith.constant 0 : index
    %c0_2 = arith.constant 0 : index
    %2 = vector.load %arg2[%c0_1, %c0_2] : memref<1x256xf32, #tpu.memory_space<vmem>>, vector<1x256xf32>
    %3 = vector.broadcast %2 : vector<1x256xf32> to vector<256x256xf32>
    %4 = arith.mulf %1, %3 : vector<256x256xf32>
    %c0_3 = arith.constant 0 : index
    %c0_4 = arith.constant 0 : index
    %5 = vector.load %arg3[%c0_3, %c0_4] : memref<1x256xf32, #tpu.memory_space<vmem>>, vector<1x256xf32>
    %6 = vector.broadcast %5 : vector<1x256xf32> to vector<256x256xf32>
    %7 = arith.addf %4, %6 : vector<256x256xf32>
    %cst = arith.constant 0.000000e+00 : f32
    %8 = vector.broadcast %cst : f32 to vector<256x256xf32>
    %9 = arith.maximumf %7, %8 : vector<256x256xf32>
    %10 = arith.truncf %9 : vector<256x256xf32> to vector<256x256xbf16>
    %c0_5 = arith.constant 0 : index
    %c0_6 = arith.constant 0 : index
    %11 = vector.load %arg4[%c0_5, %c0_6] : memref<256x128xbf16, #tpu.memory_space<vmem>>, vector<256x128xbf16>
    %cst_7 = arith.constant dense<0.000000e+00> : vector<256x128xf32>
    %12 = tpu.matmul %10, %11, %cst_7 {dimension_numbers = #tpu.dot_dimension_numbers<[1], [0], [0], [1], [0, 0, 1, 1], [], []>} : vector<256x256xbf16>, vector<256x128xbf16>, vector<256x128xf32> -> vector<256x128xf32>
    %c0_8 = arith.constant 0 : index
    %c0_9 = arith.constant 0 : index
    %13 = vector.load %arg5[%c0_8, %c0_9] : memref<1x128xf32, #tpu.memory_space<vmem>>, vector<1x128xf32>
    %14 = vector.broadcast %13 : vector<1x128xf32> to vector<256x128xf32>
    %15 = arith.addf %12, %14 : vector<256x128xf32>
    %c0_10 = arith.constant 0 : index
    %c0_11 = arith.constant 0 : index
    %16 = vector.load %arg6[%c0_10, %c0_11] : memref<256x128xf32, #tpu.memory_space<vmem>>, vector<256x128xf32>
    tpu.vector_store %arg6[%c0_10, %c0_11], %15 {strides = array<i32>} : memref<256x128xf32, #tpu.memory_space<vmem>>, vector<256x128xf32>,
    return
  }
  func.func @transform_0(%arg0: i32) -> (i32, i32) {
    %c0_i32 = arith.constant 0 : i32
    %c0_i32_0 = arith.constant 0 : i32
    return %arg0, %c0_i32 : i32, i32
  }
  func.func @transform_1(%arg0: i32) -> (i32, i32) {
    %c0_i32 = arith.constant 0 : i32
    %c0_i32_0 = arith.constant 0 : i32
    %c0_i32_1 = arith.constant 0 : i32
    return %c0_i32, %c0_i32_0 : i32, i32
  }
  func.func @transform_2(%arg0: i32) -> (i32, i32) {
    %c0_i32 = arith.constant 0 : i32
    %c0_i32_0 = arith.constant 0 : i32
    %c0_i32_1 = arith.constant 0 : i32
    return %c0_i32, %c0_i32_0 : i32, i32
  }
  func.func @transform_3(%arg0: i32) -> (i32, i32) {
    %c0_i32 = arith.constant 0 : i32
    %c0_i32_0 = arith.constant 0 : i32
    %c0_i32_1 = arith.constant 0 : i32
    return %c0_i32, %c0_i32_0 : i32, i32
  }
  func.func @transform_4(%arg0: i32) -> (i32, i32) {
    %c0_i32 = arith.constant 0 : i32
    %c0_i32_0 = arith.constant 0 : i32
    %c0_i32_1 = arith.constant 0 : i32
    return %c0_i32, %c0_i32_0 : i32, i32
  }
  func.func @transform_5(%arg0: i32) -> (i32, i32) {
    %c0_i32 = arith.constant 0 : i32
    %c0_i32_0 = arith.constant 0 : i32
    return %arg0, %c0_i32 : i32, i32
  }
}

module attributes {stable_mosaic.version = 11 : i64} {
  func.func @_upsample_rows_kernel(%arg0: i32, %arg1: memref<64x16xf32, #tpu.memory_space<vmem>>, %arg2: memref<1x16x2048xf32, #tpu.memory_space<vmem>>, %arg3: memref<1x64x2048xf32, #tpu.memory_space<vmem>>) attributes {dimension_semantics = [#tpu.dimension_semantics<parallel>], iteration_bounds = array<i64: 2>, scalar_prefetch = 0 : i64, scratch_operands = 0 : i64, tpu.core_type = #tpu.core_type<tc>, window_params = [{pipeline_mode = #tpu.pipeline_mode<synchronous>, transform_indices = @transform_0, window_bounds = array<i64: 64, 16>}, {transform_indices = @transform_1, window_bounds = array<i64: 1, 16, 2048>}, {transform_indices = @transform_2, window_bounds = array<i64: 1, 64, 2048>}]} {
    %c0 = arith.constant 0 : index
    %c0_0 = arith.constant 0 : index
    %0 = vector.load %arg1[%c0, %c0_0] : memref<64x16xf32, #tpu.memory_space<vmem>>, vector<64x16xf32>
    %c0_1 = arith.constant 0 : index
    %c0_2 = arith.constant 0 : index
    %c0_3 = arith.constant 0 : index
    %1 = vector.load %arg2[%c0_1, %c0_2, %c0_3] : memref<1x16x2048xf32, #tpu.memory_space<vmem>>, vector<1x16x2048xf32>
    %2 = vector.shape_cast %1 : vector<1x16x2048xf32> to vector<16x2048xf32>
    %cst = arith.constant dense<0.000000e+00> : vector<64x2048xf32>
    %3 = tpu.matmul %0, %2, %cst {dimension_numbers = #tpu.dot_dimension_numbers<[1], [0], [0], [1], [0, 0, 1, 1], [], []>} : vector<64x16xf32>, vector<16x2048xf32>, vector<64x2048xf32> -> vector<64x2048xf32>
    %c0_4 = arith.constant 0 : index
    %c0_5 = arith.constant 0 : index
    %c0_6 = arith.constant 0 : index
    %4 = vector.load %arg3[%c0_4, %c0_5, %c0_6] : memref<1x64x2048xf32, #tpu.memory_space<vmem>>, vector<1x64x2048xf32>
    %5 = vector.shape_cast %4 : vector<1x64x2048xf32> to vector<64x2048xf32>
    %6 = vector.shape_cast %3 : vector<64x2048xf32> to vector<1x64x2048xf32>
    tpu.vector_store %arg3[%c0_4, %c0_5, %c0_6], %6 {strides = array<i32>} : memref<1x64x2048xf32, #tpu.memory_space<vmem>>, vector<1x64x2048xf32>,
    return
  }
  func.func @transform_0(%arg0: i32) -> (i32, i32) {
    %c0_i32 = arith.constant 0 : i32
    %c0_i32_0 = arith.constant 0 : i32
    %c0_i32_1 = arith.constant 0 : i32
    return %c0_i32, %c0_i32_0 : i32, i32
  }
  func.func @transform_1(%arg0: i32) -> (i32, i32, i32) {
    %c0_i32 = arith.constant 0 : i32
    %c0_i32_0 = arith.constant 0 : i32
    %c0_i32_1 = arith.constant 0 : i32
    return %arg0, %c0_i32, %c0_i32_0 : i32, i32, i32
  }
  func.func @transform_2(%arg0: i32) -> (i32, i32, i32) {
    %c0_i32 = arith.constant 0 : i32
    %c0_i32_0 = arith.constant 0 : i32
    %c0_i32_1 = arith.constant 0 : i32
    return %arg0, %c0_i32, %c0_i32_0 : i32, i32, i32
  }
}

module attributes {stable_mosaic.version = 11 : i64} {
  func.func @_upsample_cols_kernel(%arg0: i32, %arg1: memref<64x16xf32, #tpu.memory_space<vmem>>, %arg2: memref<16x16x128xf32, #tpu.memory_space<vmem>>, %arg3: memref<16x64x128xf32, #tpu.memory_space<vmem>>) attributes {dimension_semantics = [#tpu.dimension_semantics<parallel>], iteration_bounds = array<i64: 8>, scalar_prefetch = 0 : i64, scratch_operands = 0 : i64, tpu.core_type = #tpu.core_type<tc>, window_params = [{pipeline_mode = #tpu.pipeline_mode<synchronous>, transform_indices = @transform_0, window_bounds = array<i64: 64, 16>}, {transform_indices = @transform_1, window_bounds = array<i64: 16, 16, 128>}, {transform_indices = @transform_2, window_bounds = array<i64: 16, 64, 128>}]} {
    %c0_i32 = arith.constant 0 : i32
    %c0 = arith.constant 0 : index
    %c0_0 = arith.constant 0 : index
    %0 = vector.load %arg1[%c0, %c0_0] : memref<64x16xf32, #tpu.memory_space<vmem>>, vector<64x16xf32>
    %1 = arith.index_cast %c0_i32 : i32 to index
    %c0_1 = arith.constant 0 : index
    %c0_2 = arith.constant 0 : index
    %2 = vector.load %arg2[%1, %c0_1, %c0_2] : memref<16x16x128xf32, #tpu.memory_space<vmem>>, vector<1x16x128xf32>
    %3 = vector.shape_cast %2 : vector<1x16x128xf32> to vector<16x128xf32>
    %cst = arith.constant dense<0.000000e+00> : vector<64x128xf32>
    %4 = tpu.matmul %0, %3, %cst {dimension_numbers = #tpu.dot_dimension_numbers<[1], [0], [0], [1], [0, 0, 1, 1], [], []>} : vector<64x16xf32>, vector<16x128xf32>, vector<64x128xf32> -> vector<64x128xf32>
    %5 = arith.index_cast %c0_i32 : i32 to index
    %c0_3 = arith.constant 0 : index
    %c0_4 = arith.constant 0 : index
    %6 = vector.load %arg3[%5, %c0_3, %c0_4] : memref<16x64x128xf32, #tpu.memory_space<vmem>>, vector<1x64x128xf32>
    %7 = vector.shape_cast %6 : vector<1x64x128xf32> to vector<64x128xf32>
    %8 = vector.shape_cast %4 : vector<64x128xf32> to vector<1x64x128xf32>
    tpu.vector_store %arg3[%5, %c0_3, %c0_4], %8 {strides = array<i32>} : memref<16x64x128xf32, #tpu.memory_space<vmem>>, vector<1x64x128xf32>,
    %c1_i32 = arith.constant 1 : i32
    %c0_5 = arith.constant 0 : index
    %c0_6 = arith.constant 0 : index
    %9 = vector.load %arg1[%c0_5, %c0_6] : memref<64x16xf32, #tpu.memory_space<vmem>>, vector<64x16xf32>
    %10 = arith.index_cast %c1_i32 : i32 to index
    %c0_7 = arith.constant 0 : index
    %c0_8 = arith.constant 0 : index
    %11 = vector.load %arg2[%10, %c0_7, %c0_8] : memref<16x16x128xf32, #tpu.memory_space<vmem>>, vector<1x16x128xf32>
    %12 = vector.shape_cast %11 : vector<1x16x128xf32> to vector<16x128xf32>
    %cst_9 = arith.constant dense<0.000000e+00> : vector<64x128xf32>
    %13 = tpu.matmul %9, %12, %cst_9 {dimension_numbers = #tpu.dot_dimension_numbers<[1], [0], [0], [1], [0, 0, 1, 1], [], []>} : vector<64x16xf32>, vector<16x128xf32>, vector<64x128xf32> -> vector<64x128xf32>
    %14 = arith.index_cast %c1_i32 : i32 to index
    %c0_10 = arith.constant 0 : index
    %c0_11 = arith.constant 0 : index
    %15 = vector.load %arg3[%14, %c0_10, %c0_11] : memref<16x64x128xf32, #tpu.memory_space<vmem>>, vector<1x64x128xf32>
    %16 = vector.shape_cast %15 : vector<1x64x128xf32> to vector<64x128xf32>
    %17 = vector.shape_cast %13 : vector<64x128xf32> to vector<1x64x128xf32>
    tpu.vector_store %arg3[%14, %c0_10, %c0_11], %17 {strides = array<i32>} : memref<16x64x128xf32, #tpu.memory_space<vmem>>, vector<1x64x128xf32>,
    %c2_i32 = arith.constant 2 : i32
    %c0_12 = arith.constant 0 : index
    %c0_13 = arith.constant 0 : index
    %18 = vector.load %arg1[%c0_12, %c0_13] : memref<64x16xf32, #tpu.memory_space<vmem>>, vector<64x16xf32>
    %19 = arith.index_cast %c2_i32 : i32 to index
    %c0_14 = arith.constant 0 : index
    %c0_15 = arith.constant 0 : index
    %20 = vector.load %arg2[%19, %c0_14, %c0_15] : memref<16x16x128xf32, #tpu.memory_space<vmem>>, vector<1x16x128xf32>
    %21 = vector.shape_cast %20 : vector<1x16x128xf32> to vector<16x128xf32>
    %cst_16 = arith.constant dense<0.000000e+00> : vector<64x128xf32>
    %22 = tpu.matmul %18, %21, %cst_16 {dimension_numbers = #tpu.dot_dimension_numbers<[1], [0], [0], [1], [0, 0, 1, 1], [], []>} : vector<64x16xf32>, vector<16x128xf32>, vector<64x128xf32> -> vector<64x128xf32>
    %23 = arith.index_cast %c2_i32 : i32 to index
    %c0_17 = arith.constant 0 : index
    %c0_18 = arith.constant 0 : index
    %24 = vector.load %arg3[%23, %c0_17, %c0_18] : memref<16x64x128xf32, #tpu.memory_space<vmem>>, vector<1x64x128xf32>
    %25 = vector.shape_cast %24 : vector<1x64x128xf32> to vector<64x128xf32>
    %26 = vector.shape_cast %22 : vector<64x128xf32> to vector<1x64x128xf32>
    tpu.vector_store %arg3[%23, %c0_17, %c0_18], %26 {strides = array<i32>} : memref<16x64x128xf32, #tpu.memory_space<vmem>>, vector<1x64x128xf32>,
    %c3_i32 = arith.constant 3 : i32
    %c0_19 = arith.constant 0 : index
    %c0_20 = arith.constant 0 : index
    %27 = vector.load %arg1[%c0_19, %c0_20] : memref<64x16xf32, #tpu.memory_space<vmem>>, vector<64x16xf32>
    %28 = arith.index_cast %c3_i32 : i32 to index
    %c0_21 = arith.constant 0 : index
    %c0_22 = arith.constant 0 : index
    %29 = vector.load %arg2[%28, %c0_21, %c0_22] : memref<16x16x128xf32, #tpu.memory_space<vmem>>, vector<1x16x128xf32>
    %30 = vector.shape_cast %29 : vector<1x16x128xf32> to vector<16x128xf32>
    %cst_23 = arith.constant dense<0.000000e+00> : vector<64x128xf32>
    %31 = tpu.matmul %27, %30, %cst_23 {dimension_numbers = #tpu.dot_dimension_numbers<[1], [0], [0], [1], [0, 0, 1, 1], [], []>} : vector<64x16xf32>, vector<16x128xf32>, vector<64x128xf32> -> vector<64x128xf32>
    %32 = arith.index_cast %c3_i32 : i32 to index
    %c0_24 = arith.constant 0 : index
    %c0_25 = arith.constant 0 : index
    %33 = vector.load %arg3[%32, %c0_24, %c0_25] : memref<16x64x128xf32, #tpu.memory_space<vmem>>, vector<1x64x128xf32>
    %34 = vector.shape_cast %33 : vector<1x64x128xf32> to vector<64x128xf32>
    %35 = vector.shape_cast %31 : vector<64x128xf32> to vector<1x64x128xf32>
    tpu.vector_store %arg3[%32, %c0_24, %c0_25], %35 {strides = array<i32>} : memref<16x64x128xf32, #tpu.memory_space<vmem>>, vector<1x64x128xf32>,
    %c4_i32 = arith.constant 4 : i32
    %c0_26 = arith.constant 0 : index
    %c0_27 = arith.constant 0 : index
    %36 = vector.load %arg1[%c0_26, %c0_27] : memref<64x16xf32, #tpu.memory_space<vmem>>, vector<64x16xf32>
    %37 = arith.index_cast %c4_i32 : i32 to index
    %c0_28 = arith.constant 0 : index
    %c0_29 = arith.constant 0 : index
    %38 = vector.load %arg2[%37, %c0_28, %c0_29] : memref<16x16x128xf32, #tpu.memory_space<vmem>>, vector<1x16x128xf32>
    %39 = vector.shape_cast %38 : vector<1x16x128xf32> to vector<16x128xf32>
    %cst_30 = arith.constant dense<0.000000e+00> : vector<64x128xf32>
    %40 = tpu.matmul %36, %39, %cst_30 {dimension_numbers = #tpu.dot_dimension_numbers<[1], [0], [0], [1], [0, 0, 1, 1], [], []>} : vector<64x16xf32>, vector<16x128xf32>, vector<64x128xf32> -> vector<64x128xf32>
    %41 = arith.index_cast %c4_i32 : i32 to index
    %c0_31 = arith.constant 0 : index
    %c0_32 = arith.constant 0 : index
    %42 = vector.load %arg3[%41, %c0_31, %c0_32] : memref<16x64x128xf32, #tpu.memory_space<vmem>>, vector<1x64x128xf32>
    %43 = vector.shape_cast %42 : vector<1x64x128xf32> to vector<64x128xf32>
    %44 = vector.shape_cast %40 : vector<64x128xf32> to vector<1x64x128xf32>
    tpu.vector_store %arg3[%41, %c0_31, %c0_32], %44 {strides = array<i32>} : memref<16x64x128xf32, #tpu.memory_space<vmem>>, vector<1x64x128xf32>,
    %c5_i32 = arith.constant 5 : i32
    %c0_33 = arith.constant 0 : index
    %c0_34 = arith.constant 0 : index
    %45 = vector.load %arg1[%c0_33, %c0_34] : memref<64x16xf32, #tpu.memory_space<vmem>>, vector<64x16xf32>
    %46 = arith.index_cast %c5_i32 : i32 to index
    %c0_35 = arith.constant 0 : index
    %c0_36 = arith.constant 0 : index
    %47 = vector.load %arg2[%46, %c0_35, %c0_36] : memref<16x16x128xf32, #tpu.memory_space<vmem>>, vector<1x16x128xf32>
    %48 = vector.shape_cast %47 : vector<1x16x128xf32> to vector<16x128xf32>
    %cst_37 = arith.constant dense<0.000000e+00> : vector<64x128xf32>
    %49 = tpu.matmul %45, %48, %cst_37 {dimension_numbers = #tpu.dot_dimension_numbers<[1], [0], [0], [1], [0, 0, 1, 1], [], []>} : vector<64x16xf32>, vector<16x128xf32>, vector<64x128xf32> -> vector<64x128xf32>
    %50 = arith.index_cast %c5_i32 : i32 to index
    %c0_38 = arith.constant 0 : index
    %c0_39 = arith.constant 0 : index
    %51 = vector.load %arg3[%50, %c0_38, %c0_39] : memref<16x64x128xf32, #tpu.memory_space<vmem>>, vector<1x64x128xf32>
    %52 = vector.shape_cast %51 : vector<1x64x128xf32> to vector<64x128xf32>
    %53 = vector.shape_cast %49 : vector<64x128xf32> to vector<1x64x128xf32>
    tpu.vector_store %arg3[%50, %c0_38, %c0_39], %53 {strides = array<i32>} : memref<16x64x128xf32, #tpu.memory_space<vmem>>, vector<1x64x128xf32>,
    %c6_i32 = arith.constant 6 : i32
    %c0_40 = arith.constant 0 : index
    %c0_41 = arith.constant 0 : index
    %54 = vector.load %arg1[%c0_40, %c0_41] : memref<64x16xf32, #tpu.memory_space<vmem>>, vector<64x16xf32>
    %55 = arith.index_cast %c6_i32 : i32 to index
    %c0_42 = arith.constant 0 : index
    %c0_43 = arith.constant 0 : index
    %56 = vector.load %arg2[%55, %c0_42, %c0_43] : memref<16x16x128xf32, #tpu.memory_space<vmem>>, vector<1x16x128xf32>
    %57 = vector.shape_cast %56 : vector<1x16x128xf32> to vector<16x128xf32>
    %cst_44 = arith.constant dense<0.000000e+00> : vector<64x128xf32>
    %58 = tpu.matmul %54, %57, %cst_44 {dimension_numbers = #tpu.dot_dimension_numbers<[1], [0], [0], [1], [0, 0, 1, 1], [], []>} : vector<64x16xf32>, vector<16x128xf32>, vector<64x128xf32> -> vector<64x128xf32>
    %59 = arith.index_cast %c6_i32 : i32 to index
    %c0_45 = arith.constant 0 : index
    %c0_46 = arith.constant 0 : index
    %60 = vector.load %arg3[%59, %c0_45, %c0_46] : memref<16x64x128xf32, #tpu.memory_space<vmem>>, vector<1x64x128xf32>
    %61 = vector.shape_cast %60 : vector<1x64x128xf32> to vector<64x128xf32>
    %62 = vector.shape_cast %58 : vector<64x128xf32> to vector<1x64x128xf32>
    tpu.vector_store %arg3[%59, %c0_45, %c0_46], %62 {strides = array<i32>} : memref<16x64x128xf32, #tpu.memory_space<vmem>>, vector<1x64x128xf32>,
    %c7_i32 = arith.constant 7 : i32
    %c0_47 = arith.constant 0 : index
    %c0_48 = arith.constant 0 : index
    %63 = vector.load %arg1[%c0_47, %c0_48] : memref<64x16xf32, #tpu.memory_space<vmem>>, vector<64x16xf32>
    %64 = arith.index_cast %c7_i32 : i32 to index
    %c0_49 = arith.constant 0 : index
    %c0_50 = arith.constant 0 : index
    %65 = vector.load %arg2[%64, %c0_49, %c0_50] : memref<16x16x128xf32, #tpu.memory_space<vmem>>, vector<1x16x128xf32>
    %66 = vector.shape_cast %65 : vector<1x16x128xf32> to vector<16x128xf32>
    %cst_51 = arith.constant dense<0.000000e+00> : vector<64x128xf32>
    %67 = tpu.matmul %63, %66, %cst_51 {dimension_numbers = #tpu.dot_dimension_numbers<[1], [0], [0], [1], [0, 0, 1, 1], [], []>} : vector<64x16xf32>, vector<16x128xf32>, vector<64x128xf32> -> vector<64x128xf32>
    %68 = arith.index_cast %c7_i32 : i32 to index
    %c0_52 = arith.constant 0 : index
    %c0_53 = arith.constant 0 : index
    %69 = vector.load %arg3[%68, %c0_52, %c0_53] : memref<16x64x128xf32, #tpu.memory_space<vmem>>, vector<1x64x128xf32>
    %70 = vector.shape_cast %69 : vector<1x64x128xf32> to vector<64x128xf32>
    %71 = vector.shape_cast %67 : vector<64x128xf32> to vector<1x64x128xf32>
    tpu.vector_store %arg3[%68, %c0_52, %c0_53], %71 {strides = array<i32>} : memref<16x64x128xf32, #tpu.memory_space<vmem>>, vector<1x64x128xf32>,
    %c8_i32 = arith.constant 8 : i32
    %c0_54 = arith.constant 0 : index
    %c0_55 = arith.constant 0 : index
    %72 = vector.load %arg1[%c0_54, %c0_55] : memref<64x16xf32, #tpu.memory_space<vmem>>, vector<64x16xf32>
    %73 = arith.index_cast %c8_i32 : i32 to index
    %c0_56 = arith.constant 0 : index
    %c0_57 = arith.constant 0 : index
    %74 = vector.load %arg2[%73, %c0_56, %c0_57] : memref<16x16x128xf32, #tpu.memory_space<vmem>>, vector<1x16x128xf32>
    %75 = vector.shape_cast %74 : vector<1x16x128xf32> to vector<16x128xf32>
    %cst_58 = arith.constant dense<0.000000e+00> : vector<64x128xf32>
    %76 = tpu.matmul %72, %75, %cst_58 {dimension_numbers = #tpu.dot_dimension_numbers<[1], [0], [0], [1], [0, 0, 1, 1], [], []>} : vector<64x16xf32>, vector<16x128xf32>, vector<64x128xf32> -> vector<64x128xf32>
    %77 = arith.index_cast %c8_i32 : i32 to index
    %c0_59 = arith.constant 0 : index
    %c0_60 = arith.constant 0 : index
    %78 = vector.load %arg3[%77, %c0_59, %c0_60] : memref<16x64x128xf32, #tpu.memory_space<vmem>>, vector<1x64x128xf32>
    %79 = vector.shape_cast %78 : vector<1x64x128xf32> to vector<64x128xf32>
    %80 = vector.shape_cast %76 : vector<64x128xf32> to vector<1x64x128xf32>
    tpu.vector_store %arg3[%77, %c0_59, %c0_60], %80 {strides = array<i32>} : memref<16x64x128xf32, #tpu.memory_space<vmem>>, vector<1x64x128xf32>,
    %c9_i32 = arith.constant 9 : i32
    %c0_61 = arith.constant 0 : index
    %c0_62 = arith.constant 0 : index
    %81 = vector.load %arg1[%c0_61, %c0_62] : memref<64x16xf32, #tpu.memory_space<vmem>>, vector<64x16xf32>
    %82 = arith.index_cast %c9_i32 : i32 to index
    %c0_63 = arith.constant 0 : index
    %c0_64 = arith.constant 0 : index
    %83 = vector.load %arg2[%82, %c0_63, %c0_64] : memref<16x16x128xf32, #tpu.memory_space<vmem>>, vector<1x16x128xf32>
    %84 = vector.shape_cast %83 : vector<1x16x128xf32> to vector<16x128xf32>
    %cst_65 = arith.constant dense<0.000000e+00> : vector<64x128xf32>
    %85 = tpu.matmul %81, %84, %cst_65 {dimension_numbers = #tpu.dot_dimension_numbers<[1], [0], [0], [1], [0, 0, 1, 1], [], []>} : vector<64x16xf32>, vector<16x128xf32>, vector<64x128xf32> -> vector<64x128xf32>
    %86 = arith.index_cast %c9_i32 : i32 to index
    %c0_66 = arith.constant 0 : index
    %c0_67 = arith.constant 0 : index
    %87 = vector.load %arg3[%86, %c0_66, %c0_67] : memref<16x64x128xf32, #tpu.memory_space<vmem>>, vector<1x64x128xf32>
    %88 = vector.shape_cast %87 : vector<1x64x128xf32> to vector<64x128xf32>
    %89 = vector.shape_cast %85 : vector<64x128xf32> to vector<1x64x128xf32>
    tpu.vector_store %arg3[%86, %c0_66, %c0_67], %89 {strides = array<i32>} : memref<16x64x128xf32, #tpu.memory_space<vmem>>, vector<1x64x128xf32>,
    %c10_i32 = arith.constant 10 : i32
    %c0_68 = arith.constant 0 : index
    %c0_69 = arith.constant 0 : index
    %90 = vector.load %arg1[%c0_68, %c0_69] : memref<64x16xf32, #tpu.memory_space<vmem>>, vector<64x16xf32>
    %91 = arith.index_cast %c10_i32 : i32 to index
    %c0_70 = arith.constant 0 : index
    %c0_71 = arith.constant 0 : index
    %92 = vector.load %arg2[%91, %c0_70, %c0_71] : memref<16x16x128xf32, #tpu.memory_space<vmem>>, vector<1x16x128xf32>
    %93 = vector.shape_cast %92 : vector<1x16x128xf32> to vector<16x128xf32>
    %cst_72 = arith.constant dense<0.000000e+00> : vector<64x128xf32>
    %94 = tpu.matmul %90, %93, %cst_72 {dimension_numbers = #tpu.dot_dimension_numbers<[1], [0], [0], [1], [0, 0, 1, 1], [], []>} : vector<64x16xf32>, vector<16x128xf32>, vector<64x128xf32> -> vector<64x128xf32>
    %95 = arith.index_cast %c10_i32 : i32 to index
    %c0_73 = arith.constant 0 : index
    %c0_74 = arith.constant 0 : index
    %96 = vector.load %arg3[%95, %c0_73, %c0_74] : memref<16x64x128xf32, #tpu.memory_space<vmem>>, vector<1x64x128xf32>
    %97 = vector.shape_cast %96 : vector<1x64x128xf32> to vector<64x128xf32>
    %98 = vector.shape_cast %94 : vector<64x128xf32> to vector<1x64x128xf32>
    tpu.vector_store %arg3[%95, %c0_73, %c0_74], %98 {strides = array<i32>} : memref<16x64x128xf32, #tpu.memory_space<vmem>>, vector<1x64x128xf32>,
    %c11_i32 = arith.constant 11 : i32
    %c0_75 = arith.constant 0 : index
    %c0_76 = arith.constant 0 : index
    %99 = vector.load %arg1[%c0_75, %c0_76] : memref<64x16xf32, #tpu.memory_space<vmem>>, vector<64x16xf32>
    %100 = arith.index_cast %c11_i32 : i32 to index
    %c0_77 = arith.constant 0 : index
    %c0_78 = arith.constant 0 : index
    %101 = vector.load %arg2[%100, %c0_77, %c0_78] : memref<16x16x128xf32, #tpu.memory_space<vmem>>, vector<1x16x128xf32>
    %102 = vector.shape_cast %101 : vector<1x16x128xf32> to vector<16x128xf32>
    %cst_79 = arith.constant dense<0.000000e+00> : vector<64x128xf32>
    %103 = tpu.matmul %99, %102, %cst_79 {dimension_numbers = #tpu.dot_dimension_numbers<[1], [0], [0], [1], [0, 0, 1, 1], [], []>} : vector<64x16xf32>, vector<16x128xf32>, vector<64x128xf32> -> vector<64x128xf32>
    %104 = arith.index_cast %c11_i32 : i32 to index
    %c0_80 = arith.constant 0 : index
    %c0_81 = arith.constant 0 : index
    %105 = vector.load %arg3[%104, %c0_80, %c0_81] : memref<16x64x128xf32, #tpu.memory_space<vmem>>, vector<1x64x128xf32>
    %106 = vector.shape_cast %105 : vector<1x64x128xf32> to vector<64x128xf32>
    %107 = vector.shape_cast %103 : vector<64x128xf32> to vector<1x64x128xf32>
    tpu.vector_store %arg3[%104, %c0_80, %c0_81], %107 {strides = array<i32>} : memref<16x64x128xf32, #tpu.memory_space<vmem>>, vector<1x64x128xf32>,
    %c12_i32 = arith.constant 12 : i32
    %c0_82 = arith.constant 0 : index
    %c0_83 = arith.constant 0 : index
    %108 = vector.load %arg1[%c0_82, %c0_83] : memref<64x16xf32, #tpu.memory_space<vmem>>, vector<64x16xf32>
    %109 = arith.index_cast %c12_i32 : i32 to index
    %c0_84 = arith.constant 0 : index
    %c0_85 = arith.constant 0 : index
    %110 = vector.load %arg2[%109, %c0_84, %c0_85] : memref<16x16x128xf32, #tpu.memory_space<vmem>>, vector<1x16x128xf32>
    %111 = vector.shape_cast %110 : vector<1x16x128xf32> to vector<16x128xf32>
    %cst_86 = arith.constant dense<0.000000e+00> : vector<64x128xf32>
    %112 = tpu.matmul %108, %111, %cst_86 {dimension_numbers = #tpu.dot_dimension_numbers<[1], [0], [0], [1], [0, 0, 1, 1], [], []>} : vector<64x16xf32>, vector<16x128xf32>, vector<64x128xf32> -> vector<64x128xf32>
    %113 = arith.index_cast %c12_i32 : i32 to index
    %c0_87 = arith.constant 0 : index
    %c0_88 = arith.constant 0 : index
    %114 = vector.load %arg3[%113, %c0_87, %c0_88] : memref<16x64x128xf32, #tpu.memory_space<vmem>>, vector<1x64x128xf32>
    %115 = vector.shape_cast %114 : vector<1x64x128xf32> to vector<64x128xf32>
    %116 = vector.shape_cast %112 : vector<64x128xf32> to vector<1x64x128xf32>
    tpu.vector_store %arg3[%113, %c0_87, %c0_88], %116 {strides = array<i32>} : memref<16x64x128xf32, #tpu.memory_space<vmem>>, vector<1x64x128xf32>,
    %c13_i32 = arith.constant 13 : i32
    %c0_89 = arith.constant 0 : index
    %c0_90 = arith.constant 0 : index
    %117 = vector.load %arg1[%c0_89, %c0_90] : memref<64x16xf32, #tpu.memory_space<vmem>>, vector<64x16xf32>
    %118 = arith.index_cast %c13_i32 : i32 to index
    %c0_91 = arith.constant 0 : index
    %c0_92 = arith.constant 0 : index
    %119 = vector.load %arg2[%118, %c0_91, %c0_92] : memref<16x16x128xf32, #tpu.memory_space<vmem>>, vector<1x16x128xf32>
    %120 = vector.shape_cast %119 : vector<1x16x128xf32> to vector<16x128xf32>
    %cst_93 = arith.constant dense<0.000000e+00> : vector<64x128xf32>
    %121 = tpu.matmul %117, %120, %cst_93 {dimension_numbers = #tpu.dot_dimension_numbers<[1], [0], [0], [1], [0, 0, 1, 1], [], []>} : vector<64x16xf32>, vector<16x128xf32>, vector<64x128xf32> -> vector<64x128xf32>
    %122 = arith.index_cast %c13_i32 : i32 to index
    %c0_94 = arith.constant 0 : index
    %c0_95 = arith.constant 0 : index
    %123 = vector.load %arg3[%122, %c0_94, %c0_95] : memref<16x64x128xf32, #tpu.memory_space<vmem>>, vector<1x64x128xf32>
    %124 = vector.shape_cast %123 : vector<1x64x128xf32> to vector<64x128xf32>
    %125 = vector.shape_cast %121 : vector<64x128xf32> to vector<1x64x128xf32>
    tpu.vector_store %arg3[%122, %c0_94, %c0_95], %125 {strides = array<i32>} : memref<16x64x128xf32, #tpu.memory_space<vmem>>, vector<1x64x128xf32>,
    %c14_i32 = arith.constant 14 : i32
    %c0_96 = arith.constant 0 : index
    %c0_97 = arith.constant 0 : index
    %126 = vector.load %arg1[%c0_96, %c0_97] : memref<64x16xf32, #tpu.memory_space<vmem>>, vector<64x16xf32>
    %127 = arith.index_cast %c14_i32 : i32 to index
    %c0_98 = arith.constant 0 : index
    %c0_99 = arith.constant 0 : index
    %128 = vector.load %arg2[%127, %c0_98, %c0_99] : memref<16x16x128xf32, #tpu.memory_space<vmem>>, vector<1x16x128xf32>
    %129 = vector.shape_cast %128 : vector<1x16x128xf32> to vector<16x128xf32>
    %cst_100 = arith.constant dense<0.000000e+00> : vector<64x128xf32>
    %130 = tpu.matmul %126, %129, %cst_100 {dimension_numbers = #tpu.dot_dimension_numbers<[1], [0], [0], [1], [0, 0, 1, 1], [], []>} : vector<64x16xf32>, vector<16x128xf32>, vector<64x128xf32> -> vector<64x128xf32>
    %131 = arith.index_cast %c14_i32 : i32 to index
    %c0_101 = arith.constant 0 : index
    %c0_102 = arith.constant 0 : index
    %132 = vector.load %arg3[%131, %c0_101, %c0_102] : memref<16x64x128xf32, #tpu.memory_space<vmem>>, vector<1x64x128xf32>
    %133 = vector.shape_cast %132 : vector<1x64x128xf32> to vector<64x128xf32>
    %134 = vector.shape_cast %130 : vector<64x128xf32> to vector<1x64x128xf32>
    tpu.vector_store %arg3[%131, %c0_101, %c0_102], %134 {strides = array<i32>} : memref<16x64x128xf32, #tpu.memory_space<vmem>>, vector<1x64x128xf32>,
    %c15_i32 = arith.constant 15 : i32
    %c0_103 = arith.constant 0 : index
    %c0_104 = arith.constant 0 : index
    %135 = vector.load %arg1[%c0_103, %c0_104] : memref<64x16xf32, #tpu.memory_space<vmem>>, vector<64x16xf32>
    %136 = arith.index_cast %c15_i32 : i32 to index
    %c0_105 = arith.constant 0 : index
    %c0_106 = arith.constant 0 : index
    %137 = vector.load %arg2[%136, %c0_105, %c0_106] : memref<16x16x128xf32, #tpu.memory_space<vmem>>, vector<1x16x128xf32>
    %138 = vector.shape_cast %137 : vector<1x16x128xf32> to vector<16x128xf32>
    %cst_107 = arith.constant dense<0.000000e+00> : vector<64x128xf32>
    %139 = tpu.matmul %135, %138, %cst_107 {dimension_numbers = #tpu.dot_dimension_numbers<[1], [0], [0], [1], [0, 0, 1, 1], [], []>} : vector<64x16xf32>, vector<16x128xf32>, vector<64x128xf32> -> vector<64x128xf32>
    %140 = arith.index_cast %c15_i32 : i32 to index
    %c0_108 = arith.constant 0 : index
    %c0_109 = arith.constant 0 : index
    %141 = vector.load %arg3[%140, %c0_108, %c0_109] : memref<16x64x128xf32, #tpu.memory_space<vmem>>, vector<1x64x128xf32>
    %142 = vector.shape_cast %141 : vector<1x64x128xf32> to vector<64x128xf32>
    %143 = vector.shape_cast %139 : vector<64x128xf32> to vector<1x64x128xf32>
    tpu.vector_store %arg3[%140, %c0_108, %c0_109], %143 {strides = array<i32>} : memref<16x64x128xf32, #tpu.memory_space<vmem>>, vector<1x64x128xf32>,
    %c16_i32 = arith.constant 16 : i32
    return
  }
  func.func @transform_0(%arg0: i32) -> (i32, i32) {
    %c0_i32 = arith.constant 0 : i32
    %c0_i32_0 = arith.constant 0 : i32
    %c0_i32_1 = arith.constant 0 : i32
    return %c0_i32, %c0_i32_0 : i32, i32
  }
  func.func @transform_1(%arg0: i32) -> (i32, i32, i32) {
    %c0_i32 = arith.constant 0 : i32
    %c0_i32_0 = arith.constant 0 : i32
    %c0_i32_1 = arith.constant 0 : i32
    return %arg0, %c0_i32, %c0_i32_0 : i32, i32, i32
  }
  func.func @transform_2(%arg0: i32) -> (i32, i32, i32) {
    %c0_i32 = arith.constant 0 : i32
    %c0_i32_0 = arith.constant 0 : i32
    %c0_i32_1 = arith.constant 0 : i32
    return %arg0, %c0_i32, %c0_i32_0 : i32, i32, i32
  }
}

</mosaic_0001>

<bundles_post_ra>
// kernel: deeperlab_seg_head_forward.5
= control target key start
LH: loop header
LB: loop body
LE: loop exit
PB: predicated region body
PF: predicated region fallthrough
CT: control target
= control target key end

     0   :  { %s1180_s18 = smov 0   ;;  %s1503_s0 = inlined_call_operand.vmem [shape: bf16[512,256], index: 0, kind: input, shape index: {}]   ;;  %s1504_s1 = inlined_call_operand.vmem [shape: f32[1,256], index: 1, kind: input, shape index: {}]   ;;  %s1505_s2 = inlined_call_operand.vmem [shape: f32[1,256], index: 2, kind: input, shape index: {}]   ;;  %s1506_s3 = inlined_call_operand.vmem [shape: bf16[256,128], index: 3, kind: input, shape index: {}]   ;;  %s1507_s4 = inlined_call_operand.vmem [shape: f32[1,128], index: 4, kind: input, shape index: {}]   ;;  %s1508_s5 = inlined_call_operand.vmem [shape: f32[512,128], index: 5, kind: output, shape index: {}]  }
   0x1 LB: > { %s960_s19 = sadd.s32 4294967295, %s1148_s18   ;;  %p964_p0 = scmp.ge.s32.totalorder %s1148_s18, 1  ;;  %s1148_s18 = sphi %s1180_s18, %s15_s18  }
   0x2   : > { %p189_p1 = scmp.lt.s32.totalorder %s1148_s18, 3 }
   0x4   : > { %p190_p2 = pnand %p964_p0, %p189_p1 }
   0x5   : > { %s965_s22 = sshll.u32 (!%p190_p2), %s960_s19, 5 }
   0x6   : > { %193 = sbr.rel (%p190_p2) target bundleno = 304 (0x130), region = 40  ;;  %p219_p3 = scmp.lt.s32.totalorder (!%p190_p2), %s965_s22, 63 }
   0xb   : > { %v1126_v0 = vld [vmem:[%s1506_s3 + $0x78] sm:$0xff]   ;;  %v1128_v2 = vld [vmem:[%s1506_s3 + $0x70] sm:$0xff]   ;;  %v1130_v4 = vld [vmem:[%s1506_s3 + $0x68] sm:$0xff]   ;;  %v330_v5 = vlaneseq  ;;  %s1510_s22 = smov (!%p219_p3, %s965_s22), 63 }
   0xc   : > { %v1127_v1 = vld [vmem:[%s1506_s3 + $0x38] sm:$0xff]   ;;  %990 = vmatprep.subr.bf16.mxu0 %v1126_v0  ;;  %1102 = vmatprep.subr.bf16.mxu1 %v1126_v0  ;;  %v1129_v3 = vld [vmem:[%s1506_s3 + $0x30] sm:$0xff]   ;;  %v1131_v6 = vld [vmem:[%s1506_s3 + $0x28] sm:$0xff]   ;;  %s989_s10 = sshll.u32 %s1510_s22, 3 }
   0xd   : > { %991 = vmatpush3.bf16.msra.mxu0 %v1127_v1  ;;  %1110 = vmatpush3.bf16.msra.mxu1 %v1127_v1  ;;  %v1132_v7 = vld [vmem:[%s1506_s3 + $0x60] sm:$0xff]   ;;  %v331_v8 = vshrl.u32 %v330_v5, 7  ;;  %v1134_v10 = vld [vmem:[%s1506_s3 + $0x58] sm:$0xff]   ;;  %s1223_s17 = scalar_lea.vmem %s1503_s0, %s989_s10  ;;  %v1136_v14 = vld [vmem:[%s1506_s3 + $0x50] sm:$0xff]   ;;  %s1434_s19 = scalar_lea.vmem %s1508_s5, %s989_s10 }
   0xe   : > { %992 = vmatprep.subr.bf16.mxu0 %v1128_v2  ;;  %1103 = vmatprep.subr.bf16.mxu1 %v1128_v2  ;;  %v1133_v9 = vld [vmem:[%s1506_s3 + $0x20] sm:$0xff]   ;;  %v1135_v12 = vld [vmem:[%s1506_s3 + $0x18] sm:$0xff]   ;;  %v233_v16 = vld [vmem:[%s1223_s17 + $0x8] sm:$0xff] }
   0xf   : > { %v332_v11 = vsub.s32 0, %v331_v8  ;;  %v336_v13 = vsub.s32 1, %v331_v8  ;;  %v232_v15 = vld [vmem:[%s1223_s17] sm:$0xff]  ;;  %v266_v20 = vunpack.c.l.bf16 %v233_v16  ;;  %v267_v21 = vunpack.c.h.bf16 %v233_v16  ;;  %v249_v24 = vld [vmem:[%s1223_s17 + $0x88] sm:$0xff]  ;;  %v1250_v29 = vld [vmem:[%s1223_s17 + $0x10] sm:$0xff] }
  0x10   : > { %v328_v17 = vld [vmem:[%s1504_s1] sm:$0x3]  ;;  %v264_v18 = vunpack.c.l.bf16 %v232_v15  ;;  %v265_v19 = vunpack.c.h.bf16 %v232_v15  ;;  %v1137_v30 = vld [vmem:[%s1506_s3 + $0x10] sm:$0xff]   ;;  %v298_v33 = vunpack.c.l.bf16 %v249_v24  ;;  %v299_v34 = vunpack.c.h.bf16 %v249_v24  ;;  %v1138_v35 = vld [vmem:[%s1506_s3 + $0x48] sm:$0xff]  }
  0x11   : > { %993 = vmatpush3.bf16.msra.mxu0 %v1129_v3  ;;  %1111 = vmatpush3.bf16.msra.mxu1 %v1129_v3  ;;  %v404_v22 = vld [vmem:[%s1505_s2] sm:$0x3]  ;;  %v1241_v25 = vrot.slane %v328_v17, %v332_v11  ;;  %v1243_v26 = vrot.slane %v328_v17, %v336_v13  ;;  %v235_v39 = vld [vmem:[%s1223_s17 + $0x18] sm:$0xff]  ;;  %v269_v40 = vunpack.c.h.bf16 %v1250_v29  ;;  %v1139_v49 = vld [vmem:[%s1506_s3 + $0x8] sm:$0xff]  }
  0x12   : > { %994 = vmatprep.subr.bf16.mxu0 %v1130_v4  ;;  %1104 = vmatprep.subr.bf16.mxu1 %v1130_v4  ;;  %v248_v23 = vld [vmem:[%s1223_s17 + $0x80] sm:$0xff]  ;;  %v1245_v27 = vrot.slane %v404_v22, %v332_v11  ;;  %v1247_v28 = vrot.slane %v404_v22, %v336_v13  ;;  %v271_v53 = vunpack.c.h.bf16 %v235_v39  ;;  %v250_v59 = vld [vmem:[%s1223_s17 + $0x90] sm:$0xff]  ;;  %v251_v0 = vld [vmem:[%s1223_s17 + $0x98] sm:$0xff]  ;;  %v268_v13 = vunpack.c.l.bf16 %v1250_v29 }
  0x13   : > { %v296_v31 = vunpack.c.l.bf16 %v248_v23  ;;  %v297_v32 = vunpack.c.h.bf16 %v248_v23  ;;  %v341_v36 = vmul.f32 %v1243_v26, %v265_v19  ;;  %v343_v37 = vmul.f32 %v1243_v26, %v267_v21  ;;  %v1140_v54 = vld [vmem:[%s1506_s3 + $0x40] sm:$0xff]  }
  0x14   : > { %v340_v38 = vmul.f32 %v1241_v25, %v264_v18  ;;  %v375_v42 = vmul.f32 %v1243_v26, %v299_v34  ;;  %v342_v43 = vmul.f32 %v1241_v25, %v266_v20  ;;  %v374_v48 = vmul.f32 %v1241_v25, %v298_v33  ;;  %v1141_v5 = vld [vmem:[%s1506_s3] sm:$0xff]  }
  0x15   : > { %995 = vmatpush3.bf16.msra.mxu0 %v1131_v6  ;;  %1112 = vmatpush3.bf16.msra.mxu1 %v1131_v6  ;;  %v373_v41 = vmul.f32 %v1243_v26, %v297_v32  ;;  %v372_v44 = vmul.f32 %v1241_v25, %v296_v31  ;;  %v417_v45 = vadd.f32 %v1247_v28, %v341_v36  ;;  %v270_v16 = vunpack.c.l.bf16 %v235_v39  ;;  %v236_v18 = vld [vmem:[%s1223_s17 + $0x20] sm:$0xff]  ;;  %v237_v31 = vld [vmem:[%s1223_s17 + $0x28] sm:$0xff] }
  0x16   : > { %996 = vmatprep.subr.bf16.mxu0 %v1132_v7  ;;  %1105 = vmatprep.subr.bf16.mxu1 %v1132_v7  ;;  %v419_v46 = vadd.f32 %v1247_v28, %v343_v37  ;;  %v416_v47 = vadd.f32 %v1245_v27, %v340_v38  ;;  %v451_v51 = vadd.f32 %v1247_v28, %v375_v42  ;;  %v300_v17 = vunpack.c.l.bf16 %v250_v59  ;;  %v252_v36 = vld [vmem:[%s1223_s17 + $0xa0] sm:$0xff] }
  0x17   : > { %v449_v50 = vadd.f32 %v1247_v28, %v373_v41  ;;  %v418_v52 = vadd.f32 %v1245_v27, %v342_v43  ;;  %v481_v55 = vmax.f32 %v417_v45, 0.0  ;;  %v448_v58 = vadd.f32 %v1245_v27, %v372_v44  ;;  %v253_v41 = vld [vmem:[%s1223_s17 + $0xa8] sm:$0xff] }
  0x18   : > { %v483_v56 = vmax.f32 %v419_v46, 0.0  ;;  %v480_v57 = vmax.f32 %v416_v47, 0.0  ;;  %v515_v61 = vmax.f32 %v451_v51, 0.0  ;;  %v450_v63 = vadd.f32 %v1245_v27, %v374_v48 }
  0x19   : > { %997 = vmatpush3.bf16.msra.mxu0 %v1133_v9  ;;  %1113 = vmatpush3.bf16.msra.mxu1 %v1133_v9  ;;  %v513_v60 = vmax.f32 %v449_v50, 0.0  ;;  %v482_v62 = vmax.f32 %v418_v52, 0.0  ;;  %v512_v2 = vmax.f32 %v448_v58, 0.0  ;;  %v345_v3 = vmul.f32 %v1243_v26, %v269_v40 }
  0x1a   : > { %998 = vmatprep.subr.bf16.mxu0 %v1134_v10  ;;  %1106 = vmatprep.subr.bf16.mxu1 %v1134_v10  ;;  %v545_v1 = vpack.c.bf16 %v483_v56, %v481_v55  ;;  %v347_v4 = vmul.f32 %v1243_v26, %v271_v53  ;;  %v514_v8 = vmax.f32 %v450_v63, 0.0  ;;  %v301_v9 = vunpack.c.h.bf16 %v250_v59 }
  0x1b   : > { %v561_v6 = vpack.c.bf16 %v515_v61, %v513_v60  ;;  %v544_v7 = vpack.c.bf16 %v482_v62, %v480_v57  ;;  %v421_v10 = vadd.f32 %v1247_v28, %v345_v3  ;;  %v344_v22 = vmul.f32 %v1241_v25, %v268_v13  ;;  %v238_v62 = vld [vmem:[%s1223_s17 + $0x30] sm:$0xff] }
  0x1c   : > { %v423_v11 = vadd.f32 %v1247_v28, %v347_v4  ;;  %743 = vmatprep.mubr.bf16.mxu0 %v545_v1  ;;  %v377_v15 = vmul.f32 %v1243_v26, %v301_v9  ;;  %v346_v24 = vmul.f32 %v1241_v25, %v270_v16  ;;  %v302_v29 = vunpack.c.l.bf16 %v251_v0 }
  0x1d   : > { %999 = vmatpush3.bf16.msra.mxu0 %v1135_v12  ;;  %1114 = vmatpush3.bf16.msra.mxu1 %v1135_v12  ;;  %v303_v12 = vunpack.c.h.bf16 %v251_v0  ;;  %v485_v19 = vmax.f32 %v421_v10, 0.0  ;;  %v420_v34 = vadd.f32 %v1245_v27, %v344_v22  ;;  %v275_v44 = vunpack.c.h.bf16 %v237_v31 }
  0x1e   : > { %1000 = vmatprep.subr.bf16.mxu0 %v1136_v14  ;;  %1107 = vmatprep.subr.bf16.mxu1 %v1136_v14  ;;  %v560_v14 = vpack.c.bf16 %v514_v8, %v512_v2  ;;  %v487_v20 = vmax.f32 %v423_v11, 0.0  ;;  %v453_v23 = vadd.f32 %v1247_v28, %v377_v15  ;;  %v422_v38 = vadd.f32 %v1245_v27, %v346_v24 }
  0x1f   : > { %807 = vmatprep.mubr.bf16.mxu1 %v561_v6  ;;  %v379_v21 = vmul.f32 %v1243_v26, %v303_v12  ;;  %v378_v39 = vmul.f32 %v1241_v25, %v302_v29  ;;  %v484_v43 = vmax.f32 %v420_v34, 0.0  ;;  %v351_v51 = vmul.f32 %v1243_v26, %v275_v44  ;;  %v254_v12 = vld [vmem:[%s1223_s17 + $0xb0] sm:$0xff] }
  0x20   : > { %v547_v32 = vpack.c.bf16 %v487_v20, %v485_v19  ;;  %v517_v37 = vmax.f32 %v453_v23, 0.0  ;;  %v486_v46 = vmax.f32 %v422_v38, 0.0  ;;  %v307_v53 = vunpack.c.h.bf16 %v253_v41 }
  0x21   : > { %1001 = vmatpush3.bf16.msra.mxu0 %v1137_v30  ;;  %1115 = vmatpush3.bf16.msra.mxu1 %v1137_v30  ;;  %v376_v30 = vmul.f32 %v1241_v25, %v300_v17  ;;  %v455_v33 = vadd.f32 %v1247_v28, %v379_v21  ;;  %v454_v47 = vadd.f32 %v1245_v27, %v378_v39  ;;  %v272_v57 = vunpack.c.l.bf16 %v236_v18  ;;  %v255_v17 = vld [vmem:[%s1223_s17 + $0xb8] sm:$0xff] }
  0x22   : > { %1002 = vmatprep.subr.bf16.mxu0 %v1138_v35  ;;  %1108 = vmatprep.subr.bf16.mxu1 %v1138_v35  ;;  %v273_v35 = vunpack.c.h.bf16 %v236_v18  ;;  %v427_v58 = vadd.f32 %v1247_v28, %v351_v51  ;;  %v383_v60 = vmul.f32 %v1243_v26, %v307_v53  ;;  %v274_v61 = vunpack.c.l.bf16 %v237_v31  ;;  %v241_v51 = vld [vmem:[%s1223_s17 + $0x48] sm:$0xff] }
  0x23   : > { %v452_v40 = vadd.f32 %v1245_v27, %v376_v30  ;;  %v519_v42 = vmax.f32 %v455_v33, 0.0  ;;  %v518_v55 = vmax.f32 %v454_v47, 0.0  ;;  %v348_v1 = vmul.f32 %v1241_v25, %v272_v57 }
  0x24   : > { %v349_v45 = vmul.f32 %v1243_v26, %v273_v35  ;;  %v304_v2 = vunpack.c.l.bf16 %v252_v36  ;;  %v491_v3 = vmax.f32 %v427_v58, 0.0  ;;  %v459_v4 = vadd.f32 %v1247_v28, %v383_v60 }
  0x25   : > { %1003 = vmatpush3.bf16.msra.mxu0 %v1139_v49  ;;  %1116 = vmatpush3.bf16.msra.mxu1 %v1139_v49  ;;  %v516_v48 = vmax.f32 %v452_v40, 0.0  ;;  %v305_v49 = vunpack.c.h.bf16 %v252_v36  ;;  %v563_v50 = vpack.c.bf16 %v519_v42, %v517_v37  ;;  %v306_v6 = vunpack.c.l.bf16 %v253_v41  ;;  %v240_v42 = vld [vmem:[%s1223_s17 + $0x40] sm:$0xff] }
  0x26   : > { %1004 = vmatprep.subr.bf16.mxu0 %v1140_v54  ;;  %1109 = vmatprep.subr.bf16.mxu1 %v1140_v54  ;;  %v425_v52 = vadd.f32 %v1247_v28, %v349_v45  ;;  %v546_v54 = vpack.c.bf16 %v486_v46, %v484_v43  ;;  %v424_v9 = vadd.f32 %v1245_v27, %v348_v1  ;;  %v277_v11 = vunpack.c.h.bf16 %v238_v62 }
  0x27   : > { %v381_v56 = vmul.f32 %v1243_v26, %v305_v49  ;;  %v562_v63 = vpack.c.bf16 %v518_v55, %v516_v48  ;;  %v380_v10 = vmul.f32 %v1241_v25, %v304_v2  ;;  %v382_v16 = vmul.f32 %v1241_v25, %v306_v6 }
  0x28   : > { %v489_v59 = vmax.f32 %v425_v52, 0.0  ;;  %v488_v18 = vmax.f32 %v424_v9, 0.0  ;;  %v353_v21 = vmul.f32 %v1243_v26, %v277_v11  ;;  %v309_v29 = vunpack.c.h.bf16 %v254_v12 }
  0x29   : > { %1005 = vmatpush3.bf16.msra.mxu0 %v1141_v5  ;;  %1117 = vmatpush3.bf16.msra.mxu1 %v1141_v5  ;;  %v457_v0 = vadd.f32 %v1247_v28, %v381_v56  ;;  %v350_v5 = vmul.f32 %v1241_v25, %v274_v61  ;;  %v456_v19 = vadd.f32 %v1245_v27, %v380_v10  ;;  %v311_v33 = vunpack.c.h.bf16 %v255_v17  ;;  %v256_v56 = vld [vmem:[%s1223_s17 + $0xc0] sm:$0xff]  ;;  %v257_v61 = vld [vmem:[%s1223_s17 + $0xc8] sm:$0xff] }
  0x2a   : > { %v549_v13 = vpack.c.bf16 %v491_v3, %v489_v59  ;;  %v458_v24 = vadd.f32 %v1245_v27, %v382_v16  ;;  %v385_v36 = vmul.f32 %v1243_v26, %v309_v29  ;;  %v276_v37 = vunpack.c.l.bf16 %v238_v62 }
  0x2b   : > { %v521_v8 = vmax.f32 %v457_v0, 0.0  ;;  %v426_v15 = vadd.f32 %v1245_v27, %v350_v5  ;;  %v520_v30 = vmax.f32 %v456_v19, 0.0  ;;  %v387_v40 = vmul.f32 %v1243_v26, %v311_v33 }
  0x2c   : > { %744 = vmatmul.mubr.bf16.vlgmr.msra.gmra.mxu0 %v544_v7  ;;  %808 = vmatmul.mubr.bf16.vlgmr.msra.gmra.mxu1 %v560_v14  ;;  %v239_v7 = vld [vmem:[%s1223_s17 + $0x38] sm:$0xff]  ;;  %v523_v14 = vmax.f32 %v459_v4, 0.0  ;;  %v522_v35 = vmax.f32 %v458_v24, 0.0  ;;  %v461_v44 = vadd.f32 %v1247_v28, %v385_v36  ;;  %v352_v45 = vmul.f32 %v1241_v25, %v276_v37  ;;  %v258_v36 = vld [vmem:[%s1223_s17 + $0xd0] sm:$0xff] }
  0x2d   : > { %751 = vmatprep.mubr.bf16.mxu0 %v547_v32  ;;  %815 = vmatprep.mubr.bf16.mxu1 %v563_v50  ;;  %v279_v20 = vunpack.c.h.bf16 %v239_v7  ;;  %v490_v23 = vmax.f32 %v426_v15, 0.0  ;;  %v429_v32 = vadd.f32 %v1247_v28, %v353_v21  ;;  %v278_v41 = vunpack.c.l.bf16 %v239_v7 }
  0x2e   : > { %v565_v22 = vpack.c.bf16 %v523_v14, %v521_v8  ;;  %v564_v43 = vpack.c.bf16 %v522_v35, %v520_v30  ;;  %v308_v46 = vunpack.c.l.bf16 %v254_v12  ;;  %v463_v48 = vadd.f32 %v1247_v28, %v387_v40 }
  0x2f   : > { %v355_v31 = vmul.f32 %v1243_v26, %v279_v20  ;;  %v548_v34 = vpack.c.bf16 %v490_v23, %v488_v18  ;;  %v493_v39 = vmax.f32 %v429_v32, 0.0  ;;  %v354_v49 = vmul.f32 %v1241_v25, %v278_v41  ;;  %v242_v18 = vld [vmem:[%s1223_s17 + $0x50] sm:$0xff]  ;;  %v259_v41 = vld [vmem:[%s1223_s17 + $0xd8] sm:$0xff] }
  0x30   : > { %v310_v50 = vunpack.c.l.bf16 %v255_v17  ;;  %v525_v52 = vmax.f32 %v461_v44, 0.0  ;;  %v428_v53 = vadd.f32 %v1245_v27, %v352_v45  ;;  %v281_v55 = vunpack.c.h.bf16 %v240_v42 }
  0x31   : > { %v431_v38 = vadd.f32 %v1247_v28, %v355_v31  ;;  %v527_v58 = vmax.f32 %v463_v48, 0.0  ;;  %v430_v59 = vadd.f32 %v1245_v27, %v354_v49  ;;  %v283_v0 = vunpack.c.h.bf16 %v241_v51  ;;  %v243_v31 = vld [vmem:[%s1223_s17 + $0x58] sm:$0xff] }
  0x32   : > { %v386_v60 = vmul.f32 %v1241_v25, %v310_v50  ;;  %v492_v62 = vmax.f32 %v428_v53, 0.0  ;;  %v357_v1 = vmul.f32 %v1243_v26, %v281_v55  ;;  %v313_v5 = vunpack.c.h.bf16 %v256_v56 }
  0x33   : > { %v495_v47 = vmax.f32 %v431_v38, 0.0  ;;  %v567_v2 = vpack.c.bf16 %v527_v58, %v525_v52  ;;  %v494_v3 = vmax.f32 %v430_v59, 0.0  ;;  %v359_v7 = vmul.f32 %v1243_v26, %v283_v0 }
  0x34   : > { %752 = vmatmul.mubr.bf16.gmra.mxu0 %v546_v54  ;;  %816 = vmatmul.mubr.bf16.gmra.mxu1 %v562_v63  ;;  %v384_v54 = vmul.f32 %v1241_v25, %v308_v46  ;;  %v462_v4 = vadd.f32 %v1245_v27, %v386_v60  ;;  %v433_v8 = vadd.f32 %v1247_v28, %v357_v1  ;;  %v315_v9 = vunpack.c.h.bf16 %v257_v61 }
  0x35   : > { %759 = vmatprep.mubr.bf16.mxu0 %v549_v13  ;;  %823 = vmatprep.mubr.bf16.mxu1 %v565_v22  ;;  %v551_v57 = vpack.c.bf16 %v495_v47, %v493_v39  ;;  %v550_v10 = vpack.c.bf16 %v494_v3, %v492_v62  ;;  %v389_v12 = vmul.f32 %v1243_v26, %v313_v5  ;;  %v280_v13 = vunpack.c.l.bf16 %v240_v42  ;;  %v244_v62 = vld [vmem:[%s1223_s17 + $0x60] sm:$0xff] }
  0x36   : > { %v460_v63 = vadd.f32 %v1245_v27, %v384_v54  ;;  %v526_v11 = vmax.f32 %v462_v4, 0.0  ;;  %v435_v14 = vadd.f32 %v1247_v28, %v359_v7  ;;  %v497_v15 = vmax.f32 %v433_v8, 0.0  ;;  %v245_v7 = vld [vmem:[%s1223_s17 + $0x68] sm:$0xff] }
  0x37   : > { %v391_v16 = vmul.f32 %v1243_v26, %v315_v9  ;;  %v282_v17 = vunpack.c.l.bf16 %v241_v51  ;;  %v465_v20 = vadd.f32 %v1247_v28, %v389_v12  ;;  %v356_v21 = vmul.f32 %v1241_v25, %v280_v13  ;;  %v260_v12 = vld [vmem:[%s1223_s17 + $0xe0] sm:$0xff] }
  0x38   : > { %v524_v6 = vmax.f32 %v460_v63, 0.0  ;;  %v312_v22 = vunpack.c.l.bf16 %v256_v56  ;;  %v499_v23 = vmax.f32 %v435_v14, 0.0  ;;  %v314_v30 = vunpack.c.l.bf16 %v257_v61 }
  0x39   : > { %v467_v24 = vadd.f32 %v1247_v28, %v391_v16  ;;  %v358_v29 = vmul.f32 %v1241_v25, %v282_v17  ;;  %v529_v32 = vmax.f32 %v465_v20, 0.0  ;;  %v432_v33 = vadd.f32 %v1245_v27, %v356_v21  ;;  %v261_v17 = vld [vmem:[%s1223_s17 + $0xe8] sm:$0xff] }
  0x3a   : > { %v566_v19 = vpack.c.bf16 %v526_v11, %v524_v6  ;;  %v285_v35 = vunpack.c.h.bf16 %v242_v18  ;;  %v553_v37 = vpack.c.bf16 %v499_v23, %v497_v15  ;;  %v390_v40 = vmul.f32 %v1241_v25, %v314_v30 }
  0x3b   : > { %v531_v38 = vmax.f32 %v467_v24, 0.0  ;;  %v434_v39 = vadd.f32 %v1245_v27, %v358_v29  ;;  %v496_v42 = vmax.f32 %v432_v33, 0.0  ;;  %v287_v44 = vunpack.c.h.bf16 %v243_v31 }
  0x3c   : > { %760 = vmatmul.mubr.bf16.gmra.mxu0 %v548_v34  ;;  %824 = vmatmul.mubr.bf16.gmra.mxu1 %v564_v43  ;;  %v388_v34 = vmul.f32 %v1241_v25, %v312_v22  ;;  %v361_v45 = vmul.f32 %v1243_v26, %v285_v35  ;;  %v466_v48 = vadd.f32 %v1245_v27, %v390_v40  ;;  %v317_v49 = vunpack.c.h.bf16 %v258_v36 }
  0x3d   : > { %767 = vmatprep.mubr.bf16.mxu0 %v551_v57  ;;  %831 = vmatprep.mubr.bf16.mxu1 %v567_v2  ;;  %v569_v46 = vpack.c.bf16 %v531_v38, %v529_v32  ;;  %v498_v47 = vmax.f32 %v434_v39, 0.0  ;;  %v363_v51 = vmul.f32 %v1243_v26, %v287_v44  ;;  %v319_v53 = vunpack.c.h.bf16 %v259_v41 }
  0x3e   : > { %v464_v43 = vadd.f32 %v1245_v27, %v388_v34  ;;  %v437_v52 = vadd.f32 %v1247_v28, %v361_v45  ;;  %v530_v55 = vmax.f32 %v466_v48, 0.0  ;;  %v393_v56 = vmul.f32 %v1243_v26, %v317_v49 }
  0x3f   : > { %v552_v54 = vpack.c.bf16 %v498_v47, %v496_v42  ;;  %v284_v57 = vunpack.c.l.bf16 %v242_v18  ;;  %v439_v58 = vadd.f32 %v1247_v28, %v363_v51  ;;  %v395_v60 = vmul.f32 %v1243_v26, %v319_v53  ;;  %v246_v42 = vld [vmem:[%s1223_s17 + $0x70] sm:$0xff]  ;;  %v247_v51 = vld [vmem:[%s1223_s17 + $0x78] sm:$0xff] }
  0x40   : > { %v528_v50 = vmax.f32 %v464_v43, 0.0  ;;  %v501_v59 = vmax.f32 %v437_v52, 0.0  ;;  %v286_v61 = vunpack.c.l.bf16 %v243_v31  ;;  %v469_v0 = vadd.f32 %v1247_v28, %v393_v56  ;;  %v262_v56 = vld [vmem:[%s1223_s17 + $0xf0] sm:$0xff] }
  0x41   : > { %v360_v1 = vmul.f32 %v1241_v25, %v284_v57  ;;  %v316_v2 = vunpack.c.l.bf16 %v258_v36  ;;  %v503_v3 = vmax.f32 %v439_v58, 0.0  ;;  %v471_v4 = vadd.f32 %v1247_v28, %v395_v60 }
  0x42   : > { %v568_v63 = vpack.c.bf16 %v530_v55, %v528_v50  ;;  %v362_v5 = vmul.f32 %v1241_v25, %v286_v61  ;;  %v318_v6 = vunpack.c.l.bf16 %v259_v41  ;;  %v533_v8 = vmax.f32 %v469_v0, 0.0  ;;  %v263_v61 = vld [vmem:[%s1223_s17 + $0xf8] sm:$0xff] }
  0x43   : > { %v436_v9 = vadd.f32 %v1245_v27, %v360_v1  ;;  %v289_v11 = vunpack.c.h.bf16 %v244_v62  ;;  %v555_v13 = vpack.c.bf16 %v503_v3, %v501_v59  ;;  %v535_v14 = vmax.f32 %v471_v4, 0.0 }
  0x44   : > { %768 = vmatmul.mubr.bf16.gmra.mxu0 %v550_v10  ;;  %832 = vmatmul.mubr.bf16.gmra.mxu1 %v566_v19  ;;  %v392_v10 = vmul.f32 %v1241_v25, %v316_v2  ;;  %v438_v15 = vadd.f32 %v1245_v27, %v362_v5  ;;  %v394_v16 = vmul.f32 %v1241_v25, %v318_v6  ;;  %v291_v20 = vunpack.c.h.bf16 %v245_v7 }
  0x45   : > { %775 = vmatprep.mubr.bf16.mxu0 %v553_v37  ;;  %839 = vmatprep.mubr.bf16.mxu1 %v569_v46  ;;  %v500_v18 = vmax.f32 %v436_v9, 0.0  ;;  %v365_v21 = vmul.f32 %v1243_v26, %v289_v11  ;;  %v571_v22 = vpack.c.bf16 %v535_v14, %v533_v8  ;;  %v321_v29 = vunpack.c.h.bf16 %v260_v12 }
  0x46   : > { %v468_v19 = vadd.f32 %v1245_v27, %v392_v10  ;;  %v502_v23 = vmax.f32 %v438_v15, 0.0  ;;  %v470_v24 = vadd.f32 %v1245_v27, %v394_v16  ;;  %v367_v31 = vmul.f32 %v1243_v26, %v291_v20 }
  0x47   : > { %v441_v32 = vadd.f32 %v1247_v28, %v365_v21  ;;  %v323_v33 = vunpack.c.h.bf16 %v261_v17  ;;  %v397_v36 = vmul.f32 %v1243_v26, %v321_v29  ;;  %v288_v37 = vunpack.c.l.bf16 %v244_v62 }
  0x48   : > { %v532_v30 = vmax.f32 %v468_v19, 0.0  ;;  %v554_v34 = vpack.c.bf16 %v502_v23, %v500_v18  ;;  %v534_v35 = vmax.f32 %v470_v24, 0.0  ;;  %v443_v38 = vadd.f32 %v1247_v28, %v367_v31 }
  0x49   : > { %v505_v39 = vmax.f32 %v441_v32, 0.0  ;;  %v399_v40 = vmul.f32 %v1243_v26, %v323_v33  ;;  %v290_v41 = vunpack.c.l.bf16 %v245_v7  ;;  %v473_v44 = vadd.f32 %v1247_v28, %v397_v36 }
  0x4a   : > { %v570_v43 = vpack.c.bf16 %v534_v35, %v532_v30  ;;  %v364_v45 = vmul.f32 %v1241_v25, %v288_v37  ;;  %v320_v46 = vunpack.c.l.bf16 %v260_v12  ;;  %v507_v47 = vmax.f32 %v443_v38, 0.0 }
  0x4b   : > { %v475_v48 = vadd.f32 %v1247_v28, %v399_v40  ;;  %v366_v49 = vmul.f32 %v1241_v25, %v290_v41  ;;  %v322_v50 = vunpack.c.l.bf16 %v261_v17  ;;  %v537_v52 = vmax.f32 %v473_v44, 0.0 }
  0x4c   : > { %776 = vmatmul.mubr.bf16.gmra.mxu0 %v552_v54  ;;  %840 = vmatmul.mubr.bf16.gmra.mxu1 %v568_v63  ;;  %v440_v53 = vadd.f32 %v1245_v27, %v364_v45  ;;  %v396_v54 = vmul.f32 %v1241_v25, %v320_v46  ;;  %v293_v55 = vunpack.c.h.bf16 %v246_v42  ;;  %v557_v57 = vpack.c.bf16 %v507_v47, %v505_v39 }
  0x4d   : > { %783 = vmatprep.mubr.bf16.mxu0 %v555_v13  ;;  %847 = vmatprep.mubr.bf16.mxu1 %v571_v22  ;;  %v539_v58 = vmax.f32 %v475_v48, 0.0  ;;  %v442_v59 = vadd.f32 %v1245_v27, %v366_v49  ;;  %v398_v60 = vmul.f32 %v1241_v25, %v322_v50  ;;  %v295_v0 = vunpack.c.h.bf16 %v247_v51 }
  0x4e   : > { %v504_v62 = vmax.f32 %v440_v53, 0.0  ;;  %v472_v63 = vadd.f32 %v1245_v27, %v396_v54  ;;  %v369_v1 = vmul.f32 %v1243_v26, %v293_v55  ;;  %v325_v5 = vunpack.c.h.bf16 %v262_v56 }
  0x4f   : > { %v573_v2 = vpack.c.bf16 %v539_v58, %v537_v52  ;;  %v506_v3 = vmax.f32 %v442_v59, 0.0  ;;  %v474_v4 = vadd.f32 %v1245_v27, %v398_v60  ;;  %v371_v7 = vmul.f32 %v1243_v26, %v295_v0 }
  0x50   : > { %v536_v6 = vmax.f32 %v472_v63, 0.0  ;;  %v445_v8 = vadd.f32 %v1247_v28, %v369_v1  ;;  %v327_v9 = vunpack.c.h.bf16 %v263_v61  ;;  %v401_v12 = vmul.f32 %v1243_v26, %v325_v5 }
  0x51   : > { %v556_v10 = vpack.c.bf16 %v506_v3, %v504_v62  ;;  %v538_v11 = vmax.f32 %v474_v4, 0.0  ;;  %v292_v13 = vunpack.c.l.bf16 %v246_v42  ;;  %v447_v14 = vadd.f32 %v1247_v28, %v371_v7 }
  0x52   : > { %v509_v15 = vmax.f32 %v445_v8, 0.0  ;;  %v403_v16 = vmul.f32 %v1243_v26, %v327_v9  ;;  %v294_v17 = vunpack.c.l.bf16 %v247_v51  ;;  %v477_v19 = vadd.f32 %v1247_v28, %v401_v12 }
  0x53   : > { %v572_v18 = vpack.c.bf16 %v538_v11, %v536_v6  ;;  %v368_v20 = vmul.f32 %v1241_v25, %v292_v13  ;;  %v324_v21 = vunpack.c.l.bf16 %v262_v56  ;;  %v511_v22 = vmax.f32 %v447_v14, 0.0 }
  0x54   : > { %784 = vmatmul.mubr.bf16.gmra.mxu0 %v554_v34  ;;  %848 = vmatmul.mubr.bf16.gmra.mxu1 %v570_v43  ;;  %v479_v23 = vadd.f32 %v1247_v28, %v403_v16  ;;  %v370_v24 = vmul.f32 %v1241_v25, %v294_v17  ;;  %v326_v29 = vunpack.c.l.bf16 %v263_v61  ;;  %v541_v30 = vmax.f32 %v477_v19, 0.0 }
  0x55   : > { %791 = vmatprep.mubr.bf16.mxu0 %v557_v57  ;;  %855 = vmatprep.mubr.bf16.mxu1 %v573_v2  ;;  %v444_v31 = vadd.f32 %v1245_v27, %v368_v20  ;;  %v400_v26 = vmul.f32 %v1241_v25, %v324_v21  ;;  %v559_v32 = vpack.c.bf16 %v511_v22, %v509_v15 }
  0x56   : > { %v543_v33 = vmax.f32 %v479_v23, 0.0  ;;  %v446_v34 = vadd.f32 %v1245_v27, %v370_v24  ;;  %v402_v35 = vmul.f32 %v1241_v25, %v326_v29  ;;  %v1427_v25 = vld [vmem:[%s1507_s4] ss:$0 sm:$0xff] }
  0x57   : > { %v508_v36 = vmax.f32 %v444_v31, 0.0  ;;  %v476_v37 = vadd.f32 %v1245_v27, %v400_v26 }
  0x58   : > { %v575_v28 = vpack.c.bf16 %v543_v33, %v541_v30  ;;  %v510_v38 = vmax.f32 %v446_v34, 0.0  ;;  %v478_v39 = vadd.f32 %v1245_v27, %v402_v35 }
  0x59   : > { %v540_v40 = vmax.f32 %v476_v37, 0.0 }
  0x5a   : > { %v558_v41 = vpack.c.bf16 %v510_v38, %v508_v36  ;;  %v542_v42 = vmax.f32 %v478_v39, 0.0 }
  0x5c   : > { %792 = vmatmul.mubr.bf16.gmra.mxu0 %v556_v10  ;;  %856 = vmatmul.mubr.bf16.gmra.mxu1 %v572_v18  ;;  %v574_v43 = vpack.c.bf16 %v542_v42, %v540_v40 }
  0x5d   : > { %799 = vmatprep.mubr.bf16.mxu0 %v559_v32  ;;  %863 = vmatprep.mubr.bf16.mxu1 %v575_v28 }
  0x64   : > { %800 = vmatmul.mubr.bf16.gmra.mxu0 %v558_v41  ;;  %864 = vmatmul.mubr.bf16.gmra.mxu1 %v574_v43 }
  0xec   : > { %v1006_v44 = vpop.f32.mrf.mxu0  ;;  %v1054_v45 = vpop.f32.mrf.mxu1 }
  0xee   : > { %v1007_v46 = vpop.f32.mrf.mxu0  ;;  %v1055_v47 = vpop.f32.mrf.mxu1 }
  0xef   : > { %v1008_v48 = vadd.f32 %v1007_v46, %v1006_v44  ;;  %v1056_v49 = vadd.f32 %v1055_v47, %v1054_v45 }
  0xf0   : > { %v1009_v27 = vpop.f32.mrf.mxu0  ;;  %v1057_v50 = vpop.f32.mrf.mxu1 }
  0xf1   : > { %v746_v51 = vadd.f32 %v1008_v48, %v1427_v25  ;;  %v810_v52 = vadd.f32 %v1056_v49, %v1427_v25 }
  0xf2   : > { %v1010_v53 = vpop.f32.mrf.mxu0  ;;  %v1058_v54 = vpop.f32.mrf.mxu1 }
  0xf3   : > { %872 = vst [vmem:[%s1434_s19] sm:$0xff] %v746_v51  ;;  %888 = vst [vmem:[%s1434_s19 + $0x80] sm:$0xff] %v810_v52  ;;  %v1011_v55 = vadd.f32 %v1010_v53, %v1009_v27  ;;  %v1059_v56 = vadd.f32 %v1058_v54, %v1057_v50 }
  0xf4   : > { %v1012_v57 = vpop.f32.mrf.mxu0  ;;  %v1060_v58 = vpop.f32.mrf.mxu1 }
  0xf5   : > { %v749_v59 = vadd.f32 %v1011_v55, %v1427_v25  ;;  %v813_v60 = vadd.f32 %v1059_v56, %v1427_v25 }
  0xf6   : > { %v1013_v61 = vpop.f32.mrf.mxu0  ;;  %v1061_v62 = vpop.f32.mrf.mxu1 }
  0xf7   : > { %873 = vst [vmem:[%s1434_s19 + $0x8] sm:$0xff] %v749_v59  ;;  %889 = vst [vmem:[%s1434_s19 + $0x88] sm:$0xff] %v813_v60  ;;  %v1014_v63 = vadd.f32 %v1013_v61, %v1012_v57  ;;  %v1062_v0 = vadd.f32 %v1061_v62, %v1060_v58 }
  0xf8   : > { %v1015_v1 = vpop.f32.mrf.mxu0  ;;  %v1063_v2 = vpop.f32.mrf.mxu1 }
  0xf9   : > { %v754_v3 = vadd.f32 %v1014_v63, %v1427_v25  ;;  %v818_v4 = vadd.f32 %v1062_v0, %v1427_v25 }
  0xfa   : > { %v1016_v5 = vpop.f32.mrf.mxu0  ;;  %v1064_v6 = vpop.f32.mrf.mxu1 }
  0xfb   : > { %874 = vst [vmem:[%s1434_s19 + $0x10] sm:$0xff] %v754_v3  ;;  %890 = vst [vmem:[%s1434_s19 + $0x90] sm:$0xff] %v818_v4  ;;  %v1017_v7 = vadd.f32 %v1016_v5, %v1015_v1  ;;  %v1065_v8 = vadd.f32 %v1064_v6, %v1063_v2 }
  0xfc   : > { %v1018_v9 = vpop.f32.mrf.mxu0  ;;  %v1066_v10 = vpop.f32.mrf.mxu1 }
  0xfd   : > { %v757_v11 = vadd.f32 %v1017_v7, %v1427_v25  ;;  %v821_v12 = vadd.f32 %v1065_v8, %v1427_v25 }
  0xfe   : > { %v1019_v13 = vpop.f32.mrf.mxu0  ;;  %v1067_v14 = vpop.f32.mrf.mxu1 }
  0xff   : > { %875 = vst [vmem:[%s1434_s19 + $0x18] sm:$0xff] %v757_v11  ;;  %891 = vst [vmem:[%s1434_s19 + $0x98] sm:$0xff] %v821_v12  ;;  %v1020_v15 = vadd.f32 %v1019_v13, %v1018_v9  ;;  %v1068_v16 = vadd.f32 %v1067_v14, %v1066_v10 }
 0x100   : > { %v1021_v17 = vpop.f32.mrf.mxu0  ;;  %v1069_v18 = vpop.f32.mrf.mxu1 }
 0x101   : > { %v762_v19 = vadd.f32 %v1020_v15, %v1427_v25  ;;  %v826_v20 = vadd.f32 %v1068_v16, %v1427_v25 }
 0x102   : > { %v1022_v21 = vpop.f32.mrf.mxu0  ;;  %v1070_v22 = vpop.f32.mrf.mxu1 }
 0x103   : > { %876 = vst [vmem:[%s1434_s19 + $0x20] sm:$0xff] %v762_v19  ;;  %892 = vst [vmem:[%s1434_s19 + $0xa0] sm:$0xff] %v826_v20  ;;  %v1023_v23 = vadd.f32 %v1022_v21, %v1021_v17  ;;  %v1071_v24 = vadd.f32 %v1070_v22, %v1069_v18 }
 0x104   : > { %v1024_v29 = vpop.f32.mrf.mxu0  ;;  %v1072_v26 = vpop.f32.mrf.mxu1 }
 0x105   : > { %v765_v30 = vadd.f32 %v1023_v23, %v1427_v25  ;;  %v829_v31 = vadd.f32 %v1071_v24, %v1427_v25 }
 0x106   : > { %v1025_v32 = vpop.f32.mrf.mxu0  ;;  %v1073_v34 = vpop.f32.mrf.mxu1 }
 0x107   : > { %877 = vst [vmem:[%s1434_s19 + $0x28] sm:$0xff] %v765_v30  ;;  %893 = vst [vmem:[%s1434_s19 + $0xa8] sm:$0xff] %v829_v31  ;;  %v1026_v33 = vadd.f32 %v1025_v32, %v1024_v29  ;;  %v1074_v35 = vadd.f32 %v1073_v34, %v1072_v26 }
 0x108   : > { %v1027_v36 = vpop.f32.mrf.mxu0  ;;  %v1075_v28 = vpop.f32.mrf.mxu1 }
 0x109   : > { %v770_v37 = vadd.f32 %v1026_v33, %v1427_v25  ;;  %v834_v38 = vadd.f32 %v1074_v35, %v1427_v25 }
 0x10a   : > { %v1028_v39 = vpop.f32.mrf.mxu0  ;;  %v1076_v41 = vpop.f32.mrf.mxu1 }
 0x10b   : > { %878 = vst [vmem:[%s1434_s19 + $0x30] sm:$0xff] %v770_v37  ;;  %v1029_v40 = vadd.f32 %v1028_v39, %v1027_v36  ;;  %894 = vst [vmem:[%s1434_s19 + $0xb0] sm:$0xff] %v834_v38  ;;  %v1077_v42 = vadd.f32 %v1076_v41, %v1075_v28 }
 0x10c   : > { %v1030_v43 = vpop.f32.mrf.mxu0  ;;  %v1078_v46 = vpop.f32.mrf.mxu1 }
 0x10d   : > { %v773_v44 = vadd.f32 %v1029_v40, %v1427_v25  ;;  %v837_v45 = vadd.f32 %v1077_v42, %v1427_v25 }
 0x10e   : > { %v1031_v47 = vpop.f32.mrf.mxu0  ;;  %v1079_v49 = vpop.f32.mrf.mxu1 }
 0x10f   : > { %879 = vst [vmem:[%s1434_s19 + $0x38] sm:$0xff] %v773_v44  ;;  %v1032_v48 = vadd.f32 %v1031_v47, %v1030_v43  ;;  %895 = vst [vmem:[%s1434_s19 + $0xb8] sm:$0xff] %v837_v45  ;;  %v1080_v51 = vadd.f32 %v1079_v49, %v1078_v46 }
 0x110   : > { %v1033_v27 = vpop.f32.mrf.mxu0  ;;  %v1081_v52 = vpop.f32.mrf.mxu1 }
 0x111   : > { %v778_v50 = vadd.f32 %v1032_v48, %v1427_v25  ;;  %v842_v54 = vadd.f32 %v1080_v51, %v1427_v25 }
 0x112   : > { %v1034_v53 = vpop.f32.mrf.mxu0  ;;  %v1082_v56 = vpop.f32.mrf.mxu1 }
 0x113   : > { %880 = vst [vmem:[%s1434_s19 + $0x40] sm:$0xff] %v778_v50  ;;  %v1035_v55 = vadd.f32 %v1034_v53, %v1033_v27  ;;  %896 = vst [vmem:[%s1434_s19 + $0xc0] sm:$0xff] %v842_v54  ;;  %v1083_v58 = vadd.f32 %v1082_v56, %v1081_v52 }
 0x114   : > { %v1036_v59 = vpop.f32.mrf.mxu0  ;;  %v1084_v61 = vpop.f32.mrf.mxu1 }
 0x115   : > { %v781_v57 = vadd.f32 %v1035_v55, %v1427_v25  ;;  %v845_v60 = vadd.f32 %v1083_v58, %v1427_v25 }
 0x116   : > { %v1037_v62 = vpop.f32.mrf.mxu0  ;;  %v1085_v0 = vpop.f32.mrf.mxu1 }
 0x117   : > { %881 = vst [vmem:[%s1434_s19 + $0x48] sm:$0xff] %v781_v57  ;;  %v1038_v63 = vadd.f32 %v1037_v62, %v1036_v59  ;;  %897 = vst [vmem:[%s1434_s19 + $0xc8] sm:$0xff] %v845_v60  ;;  %v1086_v3 = vadd.f32 %v1085_v0, %v1084_v61 }
 0x118   : > { %v1039_v1 = vpop.f32.mrf.mxu0  ;;  %v1087_v4 = vpop.f32.mrf.mxu1 }
 0x119   : > { %v786_v2 = vadd.f32 %v1038_v63, %v1427_v25  ;;  %v850_v6 = vadd.f32 %v1086_v3, %v1427_v25 }
 0x11a   : > { %v1040_v5 = vpop.f32.mrf.mxu0  ;;  %v1088_v8 = vpop.f32.mrf.mxu1 }
 0x11b   : > { %882 = vst [vmem:[%s1434_s19 + $0x50] sm:$0xff] %v786_v2  ;;  %v1041_v7 = vadd.f32 %v1040_v5, %v1039_v1  ;;  %898 = vst [vmem:[%s1434_s19 + $0xd0] sm:$0xff] %v850_v6  ;;  %v1089_v10 = vadd.f32 %v1088_v8, %v1087_v4 }
 0x11c   : > { %v1042_v11 = vpop.f32.mrf.mxu0  ;;  %v1090_v13 = vpop.f32.mrf.mxu1 }
 0x11d   : > { %v789_v9 = vadd.f32 %v1041_v7, %v1427_v25  ;;  %v853_v12 = vadd.f32 %v1089_v10, %v1427_v25 }
 0x11e   : > { %v1043_v14 = vpop.f32.mrf.mxu0  ;;  %v1091_v16 = vpop.f32.mrf.mxu1 }
 0x11f   : > { %883 = vst [vmem:[%s1434_s19 + $0x58] sm:$0xff] %v789_v9  ;;  %v1044_v15 = vadd.f32 %v1043_v14, %v1042_v11  ;;  %899 = vst [vmem:[%s1434_s19 + $0xd8] sm:$0xff] %v853_v12  ;;  %v1092_v19 = vadd.f32 %v1091_v16, %v1090_v13 }
 0x120   : > { %v1045_v17 = vpop.f32.mrf.mxu0  ;;  %v1093_v20 = vpop.f32.mrf.mxu1 }
 0x121   : > { %v794_v18 = vadd.f32 %v1044_v15, %v1427_v25  ;;  %v858_v22 = vadd.f32 %v1092_v19, %v1427_v25 }
 0x122   : > { %v1046_v21 = vpop.f32.mrf.mxu0  ;;  %v1094_v24 = vpop.f32.mrf.mxu1 }
 0x123   : > { %884 = vst [vmem:[%s1434_s19 + $0x60] sm:$0xff] %v794_v18  ;;  %v1047_v23 = vadd.f32 %v1046_v21, %v1045_v17  ;;  %900 = vst [vmem:[%s1434_s19 + $0xe0] sm:$0xff] %v858_v22  ;;  %v1095_v30 = vadd.f32 %v1094_v24, %v1093_v20 }
 0x124   : > { %v1048_v31 = vpop.f32.mrf.mxu0  ;;  %v1096_v32 = vpop.f32.mrf.mxu1 }
 0x125   : > { %v797_v29 = vadd.f32 %v1047_v23, %v1427_v25  ;;  %v861_v26 = vadd.f32 %v1095_v30, %v1427_v25 }
 0x126   : > { %v1049_v33 = vpop.f32.mrf.mxu0  ;;  %v1097_v35 = vpop.f32.mrf.mxu1 }
 0x127   : > { %885 = vst [vmem:[%s1434_s19 + $0x68] sm:$0xff] %v797_v29  ;;  %v1050_v34 = vadd.f32 %v1049_v33, %v1048_v31  ;;  %901 = vst [vmem:[%s1434_s19 + $0xe8] sm:$0xff] %v861_v26  ;;  %v1098_v28 = vadd.f32 %v1097_v35, %v1096_v32 }
 0x128   : > { %v1051_v36 = vpop.f32.mrf.mxu0  ;;  %v1099_v38 = vpop.f32.mrf.mxu1 }
 0x129   : > { %v802_v37 = vadd.f32 %v1050_v34, %v1427_v25  ;;  %v866_v40 = vadd.f32 %v1098_v28, %v1427_v25 }
 0x12a   : > { %v1052_v39 = vpop.f32.mrf.mxu0  ;;  %v1100_v42 = vpop.f32.mrf.mxu1 }
 0x12b   : > { %886 = vst [vmem:[%s1434_s19 + $0x70] sm:$0xff] %v802_v37  ;;  %v1053_v41 = vadd.f32 %v1052_v39, %v1051_v36  ;;  %902 = vst [vmem:[%s1434_s19 + $0xf0] sm:$0xff] %v866_v40  ;;  %v1101_v44 = vadd.f32 %v1100_v42, %v1099_v38 }
 0x12d   : > { %v805_v43 = vadd.f32 %v1053_v41, %v1427_v25  ;;  %v869_v45 = vadd.f32 %v1101_v44, %v1427_v25 }
 0x12f   : > { %887 = vst [vmem:[%s1434_s19 + $0x78] sm:$0xff] %v805_v43  ;;  %903 = vst [vmem:[%s1434_s19 + $0xf8] sm:$0xff] %v869_v45 }
 0x130 PF: > { %s15_s18 = sadd.s32 1, %s1148_s18  }
 0x131   : > { %p12_p4 = scmp.ge.s32.totalorder %s15_s18, 4  }
 0x133   :  { %14 = sbr.rel (!%p12_p4) target bundleno = 1 (0x1), region = 70 }

// kernel: deeperlab_seg_head_forward.6
= control target key start
LH: loop header
LB: loop body
LE: loop exit
PB: predicated region body
PF: predicated region fallthrough
CT: control target
= control target key end

     0   :  { %s1406_s9 = smov 0   ;;  %s1823_s0 = inlined_call_operand.vmem [shape: f32[64,16], index: 0, kind: input, shape index: {}]   ;;  %s1824_s1 = inlined_call_operand.vmem [shape: f32[2,16,2048], index: 1, kind: input, shape index: {}]   ;;  %s1825_s2 = inlined_call_operand.vmem [shape: f32[2,64,2048], index: 2, kind: output, shape index: {}]  }
   0x1 LB: > { %s1296_s10 = sadd.s32 4294967295, %s1388_s9   ;;  %p1300_p0 = scmp.ge.s32.totalorder %s1388_s9, 1  ;;  %s1388_s9 = sphi %s1406_s9, %s12_s9  }
   0x2   : > { %p112_p1 = scmp.lt.s32.totalorder %s1388_s9, 3 }
   0x4   : > { %p113_p2 = pnand %p1300_p0, %p112_p1 }
   0x5   : > { %p134_p3 = scmp.lt.s32.totalorder (!%p113_p2), %s1296_s10, 1 }
   0x6   : > { %116 = sbr.rel (%p113_p2) target bundleno = 339 (0x153), region = 28 }
   0xb   : > { %v1390_v0 = vmov 0.0   ;;  %s1827_s10 = smov (!%p134_p3, %s1296_s10), 1  ;;  %v1435_v9 = vld [vmem:[%s1823_s0] sm:$0xff]  ;;  %vm184_vm0 = vcmask 130048   ;;  %v1448_v14 = vld [vmem:[%s1823_s0 + $0x8] sm:$0xff]  ;;  %v1465_v19 = vld [vmem:[%s1823_s0 + $0x10] sm:$0xff] }
   0xc   : > { %273 = vmatprep.mubr.f32.mxu0 %v1390_v0  ;;  %386 = vmatprep.mubr.f32.mxu1 %v1390_v0  ;;  %s1371_s11 = sshll.u32 %s1827_s10, 8  ;;  %v1478_v22 = vld [vmem:[%s1823_s0 + $0x18] sm:$0xff]  ;;  %v1489_v23 = vld [vmem:[%s1823_s0 + $0x20] sm:$0xff]  ;;  %v1500_v24 = vld [vmem:[%s1823_s0 + $0x28] sm:$0xff]  ;;  %s1372_s3 = sshll.u32 %s1827_s10, 10 }
   0xd   : > { %s1422_s14 = scalar_lea.vmem %s1824_s1, %s1371_s11  ;;  %v1511_v25 = vld [vmem:[%s1823_s0 + $0x30] sm:$0xff]  ;;  %v1522_v26 = vld [vmem:[%s1823_s0 + $0x38] sm:$0xff]  ;;  %s1690_s6 = scalar_lea.vmem %s1825_s2, %s1372_s3 }
   0xe   : > { %v169_v1 = vld [vmem:[%s1422_s14 + $0x88] sm:$0xff]  ;;  %v171_v2 = vld [vmem:[%s1422_s14 + $0x98] sm:$0xff]  ;;  %v168_v3 = vld [vmem:[%s1422_s14 + $0x80] sm:$0xff] }
   0xf   : > { %237 = vmatprep.subr.mxu0 %v169_v1  ;;  %350 = vmatprep.subr.mxu1 %v171_v2  ;;  %v170_v4 = vld [vmem:[%s1422_s14 + $0x90] sm:$0xff]  ;;  %v153_v5 = vld [vmem:[%s1422_s14 + $0x8] sm:$0xff]  ;;  %v155_v6 = vld [vmem:[%s1422_s14 + $0x18] sm:$0xff] }
  0x10   : > { %238 = vmatpush1.msra.mxu0 %v168_v3  ;;  %351 = vmatpush1.msra.mxu1 %v170_v4  ;;  %v152_v7 = vld [vmem:[%s1422_s14] sm:$0xff]  ;;  %v154_v8 = vld [vmem:[%s1422_s14 + $0x10] sm:$0xff]  ;;  %v173_v10 = vld [vmem:[%s1422_s14 + $0xa8] sm:$0xff] }
  0x11   : > { %239 = vmatprep.subr.mxu0 %v153_v5  ;;  %352 = vmatprep.subr.mxu1 %v155_v6  ;;  %v175_v11 = vld [vmem:[%s1422_s14 + $0xb8] sm:$0xff]  ;;  %v172_v12 = vld [vmem:[%s1422_s14 + $0xa0] sm:$0xff]  ;;  %v174_v13 = vld [vmem:[%s1422_s14 + $0xb0] sm:$0xff] }
  0x12   : > { %240 = vmatpush1.msra.mxu0 %v152_v7  ;;  %353 = vmatpush1.msra.mxu1 %v154_v8  ;;  %v157_v15 = vld [vmem:[%s1422_s14 + $0x28] sm:$0xff]  ;;  %v159_v16 = vld [vmem:[%s1422_s14 + $0x38] sm:$0xff]  ;;  %v156_v17 = vld [vmem:[%s1422_s14 + $0x20] sm:$0xff] }
  0x13   : > { %1305 = vmatmul.mubr.msk.f32.vlgmr.msra.gmra.mxu0 %vm184_vm0, %v1435_v9  ;;  %1313 = vmatmul.mubr.msk.f32.vlgmr.msra.gmra.mxu1 %vm184_vm0, %v1435_v9  ;;  %v158_v18 = vld [vmem:[%s1422_s14 + $0x30] sm:$0xff]  ;;  %v177_v20 = vld [vmem:[%s1422_s14 + $0xc8] sm:$0xff]  ;;  %v179_v21 = vld [vmem:[%s1422_s14 + $0xd8] sm:$0xff] }
  0x14   : > { %463 = vmatprep.subr.mxu0 %v173_v10  ;;  %576 = vmatprep.subr.mxu1 %v175_v11  ;;  %v176_v27 = vld [vmem:[%s1422_s14 + $0xc0] sm:$0xff]  ;;  %v178_v28 = vld [vmem:[%s1422_s14 + $0xd0] sm:$0xff]  ;;  %v161_v29 = vld [vmem:[%s1422_s14 + $0x48] sm:$0xff] }
  0x15   : > { %464 = vmatpush1.msra.mxu0 %v172_v12  ;;  %577 = vmatpush1.msra.mxu1 %v174_v13  ;;  %v163_v30 = vld [vmem:[%s1422_s14 + $0x58] sm:$0xff]  ;;  %v160_v31 = vld [vmem:[%s1422_s14 + $0x40] sm:$0xff]  ;;  %v162_v32 = vld [vmem:[%s1422_s14 + $0x50] sm:$0xff] }
  0x16   : > { %279 = vmatprep.mubr.f32.mxu0 %v1390_v0  ;;  %392 = vmatprep.mubr.f32.mxu1 %v1390_v0  ;;  %v181_v33 = vld [vmem:[%s1422_s14 + $0xe8] sm:$0xff]  ;;  %v183_v34 = vld [vmem:[%s1422_s14 + $0xf8] sm:$0xff]  ;;  %v180_v35 = vld [vmem:[%s1422_s14 + $0xe0] sm:$0xff] }
  0x17   : > { %1306 = vmatmul.mubr.msk.f32.gmra.mxu0 %vm184_vm0, %v1448_v14  ;;  %1314 = vmatmul.mubr.msk.f32.gmra.mxu1 %vm184_vm0, %v1448_v14  ;;  %v182_v36 = vld [vmem:[%s1422_s14 + $0xf0] sm:$0xff]  ;;  %v165_v37 = vld [vmem:[%s1422_s14 + $0x68] sm:$0xff]  ;;  %v167_v38 = vld [vmem:[%s1422_s14 + $0x78] sm:$0xff] }
  0x18   : > { %285 = vmatprep.mubr.f32.mxu0 %v1390_v0  ;;  %398 = vmatprep.mubr.f32.mxu1 %v1390_v0  ;;  %v164_v39 = vld [vmem:[%s1422_s14 + $0x60] sm:$0xff]  ;;  %v166_v40 = vld [vmem:[%s1422_s14 + $0x70] sm:$0xff] }
  0x19   : > { %465 = vmatprep.subr.mxu0 %v157_v15  ;;  %578 = vmatprep.subr.mxu1 %v159_v16 }
  0x1a   : > { %466 = vmatpush1.msra.mxu0 %v156_v17  ;;  %579 = vmatpush1.msra.mxu1 %v158_v18 }
  0x1b   : > { %1307 = vmatmul.mubr.msk.f32.gmra.mxu0 %vm184_vm0, %v1465_v19  ;;  %1315 = vmatmul.mubr.msk.f32.gmra.mxu1 %vm184_vm0, %v1465_v19 }
  0x1c   : > { %291 = vmatprep.mubr.f32.mxu0 %v1390_v0  ;;  %404 = vmatprep.mubr.f32.mxu1 %v1390_v0 }
  0x1d   : > { %689 = vmatprep.subr.mxu0 %v177_v20  ;;  %802 = vmatprep.subr.mxu1 %v179_v21 }
  0x1f   : > { %1308 = vmatmul.mubr.msk.f32.gmra.mxu0 %vm184_vm0, %v1478_v22  ;;  %1316 = vmatmul.mubr.msk.f32.gmra.mxu1 %vm184_vm0, %v1478_v22 }
  0x20   : > { %297 = vmatprep.mubr.f32.mxu0 %v1390_v0  ;;  %410 = vmatprep.mubr.f32.mxu1 %v1390_v0 }
  0x23   : > { %1309 = vmatmul.mubr.msk.f32.gmra.mxu0 %vm184_vm0, %v1489_v23  ;;  %1317 = vmatmul.mubr.msk.f32.gmra.mxu1 %vm184_vm0, %v1489_v23 }
  0x24   : > { %303 = vmatprep.mubr.f32.mxu0 %v1390_v0  ;;  %416 = vmatprep.mubr.f32.mxu1 %v1390_v0 }
  0x27   : > { %1310 = vmatmul.mubr.msk.f32.gmra.mxu0 %vm184_vm0, %v1500_v24  ;;  %1318 = vmatmul.mubr.msk.f32.gmra.mxu1 %vm184_vm0, %v1500_v24 }
  0x28   : > { %309 = vmatprep.mubr.f32.mxu0 %v1390_v0  ;;  %422 = vmatprep.mubr.f32.mxu1 %v1390_v0 }
  0x2b   : > { %1311 = vmatmul.mubr.msk.f32.gmra.mxu0 %vm184_vm0, %v1511_v25  ;;  %1319 = vmatmul.mubr.msk.f32.gmra.mxu1 %vm184_vm0, %v1511_v25 }
  0x2c   : > { %315 = vmatprep.mubr.f32.mxu0 %v1390_v0  ;;  %428 = vmatprep.mubr.f32.mxu1 %v1390_v0 }
  0x2f   : > { %1312 = vmatmul.mubr.msk.f32.gmra.mxu0 %vm184_vm0, %v1522_v26  ;;  %1320 = vmatmul.mubr.msk.f32.gmra.mxu1 %vm184_vm0, %v1522_v26 }
  0x30   : > { %499 = vmatprep.mubr.f32.mxu0 %v1390_v0  ;;  %612 = vmatprep.mubr.f32.mxu1 %v1390_v0 }
  0x33   : > { %1321 = vmatmul.mubr.msk.f32.vlgmr.msra.gmra.mxu0 %vm184_vm0, %v1435_v9  ;;  %1329 = vmatmul.mubr.msk.f32.vlgmr.msra.gmra.mxu1 %vm184_vm0, %v1435_v9 }
  0x34   : > { %690 = vmatpush1.msra.mxu0 %v176_v27  ;;  %803 = vmatpush1.msra.mxu1 %v178_v28 }
  0x35   : > { %505 = vmatprep.mubr.f32.mxu0 %v1390_v0  ;;  %618 = vmatprep.mubr.f32.mxu1 %v1390_v0 }
  0x36   : > { %691 = vmatprep.subr.mxu0 %v161_v29  ;;  %804 = vmatprep.subr.mxu1 %v163_v30 }
  0x37   : > { %1322 = vmatmul.mubr.msk.f32.gmra.mxu0 %vm184_vm0, %v1448_v14  ;;  %1330 = vmatmul.mubr.msk.f32.gmra.mxu1 %vm184_vm0, %v1448_v14 }
  0x38   : > { %511 = vmatprep.mubr.f32.mxu0 %v1390_v0  ;;  %624 = vmatprep.mubr.f32.mxu1 %v1390_v0 }
  0x39   : > { %692 = vmatpush1.msra.mxu0 %v160_v31  ;;  %805 = vmatpush1.msra.mxu1 %v162_v32 }
  0x3a   : > { %915 = vmatprep.subr.mxu0 %v181_v33  ;;  %1028 = vmatprep.subr.mxu1 %v183_v34 }
  0x3b   : > { %1323 = vmatmul.mubr.msk.f32.gmra.mxu0 %vm184_vm0, %v1465_v19  ;;  %1331 = vmatmul.mubr.msk.f32.gmra.mxu1 %vm184_vm0, %v1465_v19 }
  0x3c   : > { %517 = vmatprep.mubr.f32.mxu0 %v1390_v0  ;;  %630 = vmatprep.mubr.f32.mxu1 %v1390_v0 }
  0x3f   : > { %1324 = vmatmul.mubr.msk.f32.gmra.mxu0 %vm184_vm0, %v1478_v22  ;;  %1332 = vmatmul.mubr.msk.f32.gmra.mxu1 %vm184_vm0, %v1478_v22 }
  0x40   : > { %523 = vmatprep.mubr.f32.mxu0 %v1390_v0  ;;  %636 = vmatprep.mubr.f32.mxu1 %v1390_v0 }
  0x43   : > { %1325 = vmatmul.mubr.msk.f32.gmra.mxu0 %vm184_vm0, %v1489_v23  ;;  %1333 = vmatmul.mubr.msk.f32.gmra.mxu1 %vm184_vm0, %v1489_v23 }
  0x44   : > { %529 = vmatprep.mubr.f32.mxu0 %v1390_v0  ;;  %642 = vmatprep.mubr.f32.mxu1 %v1390_v0 }
  0x47   : > { %1326 = vmatmul.mubr.msk.f32.gmra.mxu0 %vm184_vm0, %v1500_v24  ;;  %1334 = vmatmul.mubr.msk.f32.gmra.mxu1 %vm184_vm0, %v1500_v24 }
  0x48   : > { %535 = vmatprep.mubr.f32.mxu0 %v1390_v0  ;;  %648 = vmatprep.mubr.f32.mxu1 %v1390_v0 }
  0x4b   : > { %1327 = vmatmul.mubr.msk.f32.gmra.mxu0 %vm184_vm0, %v1511_v25  ;;  %1335 = vmatmul.mubr.msk.f32.gmra.mxu1 %vm184_vm0, %v1511_v25 }
  0x4c   : > { %541 = vmatprep.mubr.f32.mxu0 %v1390_v0  ;;  %654 = vmatprep.mubr.f32.mxu1 %v1390_v0 }
  0x4f   : > { %1328 = vmatmul.mubr.msk.f32.gmra.mxu0 %vm184_vm0, %v1522_v26  ;;  %1336 = vmatmul.mubr.msk.f32.gmra.mxu1 %vm184_vm0, %v1522_v26 }
  0x50   : > { %725 = vmatprep.mubr.f32.mxu0 %v1390_v0  ;;  %838 = vmatprep.mubr.f32.mxu1 %v1390_v0 }
  0x53   : > { %1337 = vmatmul.mubr.msk.f32.vlgmr.msra.gmra.mxu0 %vm184_vm0, %v1435_v9  ;;  %1345 = vmatmul.mubr.msk.f32.vlgmr.msra.gmra.mxu1 %vm184_vm0, %v1435_v9 }
  0x54   : > { %916 = vmatpush1.msra.mxu0 %v180_v35  ;;  %1029 = vmatpush1.msra.mxu1 %v182_v36 }
  0x55   : > { %731 = vmatprep.mubr.f32.mxu0 %v1390_v0  ;;  %844 = vmatprep.mubr.f32.mxu1 %v1390_v0 }
  0x56   : > { %917 = vmatprep.subr.mxu0 %v165_v37  ;;  %1030 = vmatprep.subr.mxu1 %v167_v38 }
  0x57   : > { %1338 = vmatmul.mubr.msk.f32.gmra.mxu0 %vm184_vm0, %v1448_v14  ;;  %1346 = vmatmul.mubr.msk.f32.gmra.mxu1 %vm184_vm0, %v1448_v14 }
  0x58   : > { %737 = vmatprep.mubr.f32.mxu0 %v1390_v0  ;;  %850 = vmatprep.mubr.f32.mxu1 %v1390_v0 }
  0x59   : > { %918 = vmatpush1.msra.mxu0 %v164_v39  ;;  %1031 = vmatpush1.msra.mxu1 %v166_v40 }
  0x5b   : > { %1339 = vmatmul.mubr.msk.f32.gmra.mxu0 %vm184_vm0, %v1465_v19  ;;  %1347 = vmatmul.mubr.msk.f32.gmra.mxu1 %vm184_vm0, %v1465_v19 }
  0x5c   : > { %743 = vmatprep.mubr.f32.mxu0 %v1390_v0  ;;  %856 = vmatprep.mubr.f32.mxu1 %v1390_v0 }
  0x5f   : > { %1340 = vmatmul.mubr.msk.f32.gmra.mxu0 %vm184_vm0, %v1478_v22  ;;  %1348 = vmatmul.mubr.msk.f32.gmra.mxu1 %vm184_vm0, %v1478_v22 }
  0x60   : > { %749 = vmatprep.mubr.f32.mxu0 %v1390_v0  ;;  %862 = vmatprep.mubr.f32.mxu1 %v1390_v0 }
  0x63   : > { %1341 = vmatmul.mubr.msk.f32.gmra.mxu0 %vm184_vm0, %v1489_v23  ;;  %1349 = vmatmul.mubr.msk.f32.gmra.mxu1 %vm184_vm0, %v1489_v23 }
  0x64   : > { %755 = vmatprep.mubr.f32.mxu0 %v1390_v0  ;;  %868 = vmatprep.mubr.f32.mxu1 %v1390_v0 }
  0x67   : > { %1342 = vmatmul.mubr.msk.f32.gmra.mxu0 %vm184_vm0, %v1500_v24  ;;  %1350 = vmatmul.mubr.msk.f32.gmra.mxu1 %vm184_vm0, %v1500_v24 }
  0x68   : > { %761 = vmatprep.mubr.f32.mxu0 %v1390_v0  ;;  %874 = vmatprep.mubr.f32.mxu1 %v1390_v0 }
  0x6b   : > { %1343 = vmatmul.mubr.msk.f32.gmra.mxu0 %vm184_vm0, %v1511_v25  ;;  %1351 = vmatmul.mubr.msk.f32.gmra.mxu1 %vm184_vm0, %v1511_v25 }
  0x6c   : > { %767 = vmatprep.mubr.f32.mxu0 %v1390_v0  ;;  %880 = vmatprep.mubr.f32.mxu1 %v1390_v0 }
  0x6f   : > { %1344 = vmatmul.mubr.msk.f32.gmra.mxu0 %vm184_vm0, %v1522_v26  ;;  %1352 = vmatmul.mubr.msk.f32.gmra.mxu1 %vm184_vm0, %v1522_v26 }
  0x70   : > { %951 = vmatprep.mubr.f32.mxu0 %v1390_v0  ;;  %1064 = vmatprep.mubr.f32.mxu1 %v1390_v0 }
  0x73   : > { %1353 = vmatmul.mubr.msk.f32.vlgmr.msra.gmra.mxu0 %vm184_vm0, %v1435_v9  ;;  %1361 = vmatmul.mubr.msk.f32.vlgmr.msra.gmra.mxu1 %vm184_vm0, %v1435_v9 }
  0x74   : > { %957 = vmatprep.mubr.f32.mxu0 %v1390_v0  ;;  %1070 = vmatprep.mubr.f32.mxu1 %v1390_v0 }
  0x77   : > { %1354 = vmatmul.mubr.msk.f32.gmra.mxu0 %vm184_vm0, %v1448_v14  ;;  %1362 = vmatmul.mubr.msk.f32.gmra.mxu1 %vm184_vm0, %v1448_v14 }
  0x78   : > { %963 = vmatprep.mubr.f32.mxu0 %v1390_v0  ;;  %1076 = vmatprep.mubr.f32.mxu1 %v1390_v0 }
  0x7b   : > { %1355 = vmatmul.mubr.msk.f32.gmra.mxu0 %vm184_vm0, %v1465_v19  ;;  %1363 = vmatmul.mubr.msk.f32.gmra.mxu1 %vm184_vm0, %v1465_v19 }
  0x7c   : > { %969 = vmatprep.mubr.f32.mxu0 %v1390_v0  ;;  %1082 = vmatprep.mubr.f32.mxu1 %v1390_v0 }
  0x7f   : > { %1356 = vmatmul.mubr.msk.f32.gmra.mxu0 %vm184_vm0, %v1478_v22  ;;  %1364 = vmatmul.mubr.msk.f32.gmra.mxu1 %vm184_vm0, %v1478_v22 }
  0x80   : > { %975 = vmatprep.mubr.f32.mxu0 %v1390_v0  ;;  %1088 = vmatprep.mubr.f32.mxu1 %v1390_v0 }
  0x83   : > { %1357 = vmatmul.mubr.msk.f32.gmra.mxu0 %vm184_vm0, %v1489_v23  ;;  %1365 = vmatmul.mubr.msk.f32.gmra.mxu1 %vm184_vm0, %v1489_v23 }
  0x84   : > { %981 = vmatprep.mubr.f32.mxu0 %v1390_v0  ;;  %1094 = vmatprep.mubr.f32.mxu1 %v1390_v0 }
  0x87   : > { %1358 = vmatmul.mubr.msk.f32.gmra.mxu0 %vm184_vm0, %v1500_v24  ;;  %1366 = vmatmul.mubr.msk.f32.gmra.mxu1 %vm184_vm0, %v1500_v24 }
  0x88   : > { %987 = vmatprep.mubr.f32.mxu0 %v1390_v0  ;;  %1100 = vmatprep.mubr.f32.mxu1 %v1390_v0 }
  0x8b   : > { %1359 = vmatmul.mubr.msk.f32.gmra.mxu0 %vm184_vm0, %v1511_v25  ;;  %1367 = vmatmul.mubr.msk.f32.gmra.mxu1 %vm184_vm0, %v1511_v25 }
  0x8c   : > { %993 = vmatprep.mubr.f32.mxu0 %v1390_v0  ;;  %1106 = vmatprep.mubr.f32.mxu1 %v1390_v0 }
  0x8f   : > { %1360 = vmatmul.mubr.msk.f32.gmra.mxu0 %vm184_vm0, %v1522_v26  ;;  %1368 = vmatmul.mubr.msk.f32.gmra.mxu1 %vm184_vm0, %v1522_v26 }
  0xd3   : > { %v275_v41 = vpop.f32.mrf.mxu0  ;;  %v388_v42 = vpop.f32.mrf.mxu1 }
  0xd4   : > { %1113 = vst [vmem:[%s1690_s6] sm:$0xff] %v275_v41  ;;  %1115 = vst [vmem:[%s1690_s6 + $0x10] sm:$0xff] %v388_v42 }
  0xd5   : > { %v277_v43 = vpop.f32.mrf.mxu0  ;;  %v390_v44 = vpop.f32.mrf.mxu1 }
  0xd6   : > { %1114 = vst [vmem:[%s1690_s6 + $0x8] sm:$0xff] %v277_v43  ;;  %1116 = vst [vmem:[%s1690_s6 + $0x18] sm:$0xff] %v390_v44 }
  0xd7   : > { %v281_v45 = vpop.f32.mrf.mxu0  ;;  %v394_v46 = vpop.f32.mrf.mxu1 }
  0xd8   : > { %1129 = vst [vmem:[%s1690_s6 + $0x80] sm:$0xff] %v281_v45  ;;  %1131 = vst [vmem:[%s1690_s6 + $0x90] sm:$0xff] %v394_v46 }
  0xd9   : > { %v283_v47 = vpop.f32.mrf.mxu0  ;;  %v396_v48 = vpop.f32.mrf.mxu1 }
  0xda   : > { %1130 = vst [vmem:[%s1690_s6 + $0x88] sm:$0xff] %v283_v47  ;;  %1132 = vst [vmem:[%s1690_s6 + $0x98] sm:$0xff] %v396_v48 }
  0xdb   : > { %v287_v49 = vpop.f32.mrf.mxu0  ;;  %v400_v50 = vpop.f32.mrf.mxu1 }
  0xdc   : > { %1145 = vst [vmem:[%s1690_s6 + $0x100] sm:$0xff] %v287_v49  ;;  %1147 = vst [vmem:[%s1690_s6 + $0x110] sm:$0xff] %v400_v50 }
  0xdd   : > { %v289_v51 = vpop.f32.mrf.mxu0  ;;  %v402_v52 = vpop.f32.mrf.mxu1 }
  0xde   : > { %1146 = vst [vmem:[%s1690_s6 + $0x108] sm:$0xff] %v289_v51  ;;  %1148 = vst [vmem:[%s1690_s6 + $0x118] sm:$0xff] %v402_v52 }
  0xdf   : > { %v293_v53 = vpop.f32.mrf.mxu0  ;;  %v406_v54 = vpop.f32.mrf.mxu1 }
  0xe0   : > { %1161 = vst [vmem:[%s1690_s6 + $0x180] sm:$0xff] %v293_v53  ;;  %1163 = vst [vmem:[%s1690_s6 + $0x190] sm:$0xff] %v406_v54 }
  0xe1   : > { %v295_v55 = vpop.f32.mrf.mxu0  ;;  %v408_v56 = vpop.f32.mrf.mxu1 }
  0xe2   : > { %1162 = vst [vmem:[%s1690_s6 + $0x188] sm:$0xff] %v295_v55  ;;  %1164 = vst [vmem:[%s1690_s6 + $0x198] sm:$0xff] %v408_v56 }
  0xe3   : > { %v299_v57 = vpop.f32.mrf.mxu0  ;;  %v412_v58 = vpop.f32.mrf.mxu1 }
  0xe4   : > { %1177 = vst [vmem:[%s1690_s6 + $0x200] sm:$0xff] %v299_v57  ;;  %1179 = vst [vmem:[%s1690_s6 + $0x210] sm:$0xff] %v412_v58 }
  0xe5   : > { %v301_v59 = vpop.f32.mrf.mxu0  ;;  %v414_v60 = vpop.f32.mrf.mxu1 }
  0xe6   : > { %1178 = vst [vmem:[%s1690_s6 + $0x208] sm:$0xff] %v301_v59  ;;  %1180 = vst [vmem:[%s1690_s6 + $0x218] sm:$0xff] %v414_v60 }
  0xe7   : > { %v305_v61 = vpop.f32.mrf.mxu0  ;;  %v418_v62 = vpop.f32.mrf.mxu1 }
  0xe8   : > { %1193 = vst [vmem:[%s1690_s6 + $0x280] sm:$0xff] %v305_v61  ;;  %1195 = vst [vmem:[%s1690_s6 + $0x290] sm:$0xff] %v418_v62 }
  0xe9   : > { %v307_v63 = vpop.f32.mrf.mxu0  ;;  %v420_v0 = vpop.f32.mrf.mxu1 }
  0xea   : > { %1194 = vst [vmem:[%s1690_s6 + $0x288] sm:$0xff] %v307_v63  ;;  %1196 = vst [vmem:[%s1690_s6 + $0x298] sm:$0xff] %v420_v0 }
  0xeb   : > { %v311_v1 = vpop.f32.mrf.mxu0  ;;  %v424_v2 = vpop.f32.mrf.mxu1 }
  0xec   : > { %1209 = vst [vmem:[%s1690_s6 + $0x300] sm:$0xff] %v311_v1  ;;  %1211 = vst [vmem:[%s1690_s6 + $0x310] sm:$0xff] %v424_v2 }
  0xed   : > { %v313_v3 = vpop.f32.mrf.mxu0  ;;  %v426_v4 = vpop.f32.mrf.mxu1 }
  0xee   : > { %1210 = vst [vmem:[%s1690_s6 + $0x308] sm:$0xff] %v313_v3  ;;  %1212 = vst [vmem:[%s1690_s6 + $0x318] sm:$0xff] %v426_v4 }
  0xef   : > { %v317_v5 = vpop.f32.mrf.mxu0  ;;  %v430_v6 = vpop.f32.mrf.mxu1 }
  0xf0   : > { %1225 = vst [vmem:[%s1690_s6 + $0x380] sm:$0xff] %v317_v5  ;;  %1227 = vst [vmem:[%s1690_s6 + $0x390] sm:$0xff] %v430_v6 }
  0xf1   : > { %v319_v7 = vpop.f32.mrf.mxu0  ;;  %v432_v8 = vpop.f32.mrf.mxu1 }
  0xf2   : > { %1226 = vst [vmem:[%s1690_s6 + $0x388] sm:$0xff] %v319_v7  ;;  %1228 = vst [vmem:[%s1690_s6 + $0x398] sm:$0xff] %v432_v8 }
  0xf3   : > { %v501_v9 = vpop.f32.mrf.mxu0  ;;  %v614_v10 = vpop.f32.mrf.mxu1 }
  0xf4   : > { %1117 = vst [vmem:[%s1690_s6 + $0x20] sm:$0xff] %v501_v9  ;;  %1119 = vst [vmem:[%s1690_s6 + $0x30] sm:$0xff] %v614_v10 }
  0xf5   : > { %v503_v11 = vpop.f32.mrf.mxu0  ;;  %v616_v12 = vpop.f32.mrf.mxu1 }
  0xf6   : > { %1118 = vst [vmem:[%s1690_s6 + $0x28] sm:$0xff] %v503_v11  ;;  %1120 = vst [vmem:[%s1690_s6 + $0x38] sm:$0xff] %v616_v12 }
  0xf7   : > { %v507_v13 = vpop.f32.mrf.mxu0  ;;  %v620_v14 = vpop.f32.mrf.mxu1 }
  0xf8   : > { %1133 = vst [vmem:[%s1690_s6 + $0xa0] sm:$0xff] %v507_v13  ;;  %1135 = vst [vmem:[%s1690_s6 + $0xb0] sm:$0xff] %v620_v14 }
  0xf9   : > { %v509_v15 = vpop.f32.mrf.mxu0  ;;  %v622_v16 = vpop.f32.mrf.mxu1 }
  0xfa   : > { %1134 = vst [vmem:[%s1690_s6 + $0xa8] sm:$0xff] %v509_v15  ;;  %1136 = vst [vmem:[%s1690_s6 + $0xb8] sm:$0xff] %v622_v16 }
  0xfb   : > { %v513_v17 = vpop.f32.mrf.mxu0  ;;  %v626_v18 = vpop.f32.mrf.mxu1 }
  0xfc   : > { %1149 = vst [vmem:[%s1690_s6 + $0x120] sm:$0xff] %v513_v17  ;;  %1151 = vst [vmem:[%s1690_s6 + $0x130] sm:$0xff] %v626_v18 }
  0xfd   : > { %v515_v19 = vpop.f32.mrf.mxu0  ;;  %v628_v20 = vpop.f32.mrf.mxu1 }
  0xfe   : > { %1150 = vst [vmem:[%s1690_s6 + $0x128] sm:$0xff] %v515_v19  ;;  %1152 = vst [vmem:[%s1690_s6 + $0x138] sm:$0xff] %v628_v20 }
  0xff   : > { %v519_v21 = vpop.f32.mrf.mxu0  ;;  %v632_v22 = vpop.f32.mrf.mxu1 }
 0x100   : > { %1165 = vst [vmem:[%s1690_s6 + $0x1a0] sm:$0xff] %v519_v21  ;;  %1167 = vst [vmem:[%s1690_s6 + $0x1b0] sm:$0xff] %v632_v22 }
 0x101   : > { %v521_v23 = vpop.f32.mrf.mxu0  ;;  %v634_v24 = vpop.f32.mrf.mxu1 }
 0x102   : > { %1166 = vst [vmem:[%s1690_s6 + $0x1a8] sm:$0xff] %v521_v23  ;;  %1168 = vst [vmem:[%s1690_s6 + $0x1b8] sm:$0xff] %v634_v24 }
 0x103   : > { %v525_v25 = vpop.f32.mrf.mxu0  ;;  %v638_v26 = vpop.f32.mrf.mxu1 }
 0x104   : > { %1181 = vst [vmem:[%s1690_s6 + $0x220] sm:$0xff] %v525_v25  ;;  %1183 = vst [vmem:[%s1690_s6 + $0x230] sm:$0xff] %v638_v26 }
 0x105   : > { %v527_v27 = vpop.f32.mrf.mxu0  ;;  %v640_v28 = vpop.f32.mrf.mxu1 }
 0x106   : > { %1182 = vst [vmem:[%s1690_s6 + $0x228] sm:$0xff] %v527_v27  ;;  %1184 = vst [vmem:[%s1690_s6 + $0x238] sm:$0xff] %v640_v28 }
 0x107   : > { %v531_v29 = vpop.f32.mrf.mxu0  ;;  %v644_v30 = vpop.f32.mrf.mxu1 }
 0x108   : > { %1197 = vst [vmem:[%s1690_s6 + $0x2a0] sm:$0xff] %v531_v29  ;;  %1199 = vst [vmem:[%s1690_s6 + $0x2b0] sm:$0xff] %v644_v30 }
 0x109   : > { %v533_v31 = vpop.f32.mrf.mxu0  ;;  %v646_v32 = vpop.f32.mrf.mxu1 }
 0x10a   : > { %1198 = vst [vmem:[%s1690_s6 + $0x2a8] sm:$0xff] %v533_v31  ;;  %1200 = vst [vmem:[%s1690_s6 + $0x2b8] sm:$0xff] %v646_v32 }
 0x10b   : > { %v537_v33 = vpop.f32.mrf.mxu0  ;;  %v650_v34 = vpop.f32.mrf.mxu1 }
 0x10c   : > { %1213 = vst [vmem:[%s1690_s6 + $0x320] sm:$0xff] %v537_v33  ;;  %1215 = vst [vmem:[%s1690_s6 + $0x330] sm:$0xff] %v650_v34 }
 0x10d   : > { %v539_v35 = vpop.f32.mrf.mxu0  ;;  %v652_v36 = vpop.f32.mrf.mxu1 }
 0x10e   : > { %1214 = vst [vmem:[%s1690_s6 + $0x328] sm:$0xff] %v539_v35  ;;  %1216 = vst [vmem:[%s1690_s6 + $0x338] sm:$0xff] %v652_v36 }
 0x10f   : > { %v543_v37 = vpop.f32.mrf.mxu0  ;;  %v656_v38 = vpop.f32.mrf.mxu1 }
 0x110   : > { %1229 = vst [vmem:[%s1690_s6 + $0x3a0] sm:$0xff] %v543_v37  ;;  %1231 = vst [vmem:[%s1690_s6 + $0x3b0] sm:$0xff] %v656_v38 }
 0x111   : > { %v545_v39 = vpop.f32.mrf.mxu0  ;;  %v658_v40 = vpop.f32.mrf.mxu1 }
 0x112   : > { %1230 = vst [vmem:[%s1690_s6 + $0x3a8] sm:$0xff] %v545_v39  ;;  %1232 = vst [vmem:[%s1690_s6 + $0x3b8] sm:$0xff] %v658_v40 }
 0x113   : > { %v727_v41 = vpop.f32.mrf.mxu0  ;;  %v840_v42 = vpop.f32.mrf.mxu1 }
 0x114   : > { %1121 = vst [vmem:[%s1690_s6 + $0x40] sm:$0xff] %v727_v41  ;;  %1123 = vst [vmem:[%s1690_s6 + $0x50] sm:$0xff] %v840_v42 }
 0x115   : > { %v729_v43 = vpop.f32.mrf.mxu0  ;;  %v842_v44 = vpop.f32.mrf.mxu1 }
 0x116   : > { %1122 = vst [vmem:[%s1690_s6 + $0x48] sm:$0xff] %v729_v43  ;;  %1124 = vst [vmem:[%s1690_s6 + $0x58] sm:$0xff] %v842_v44 }
 0x117   : > { %v733_v45 = vpop.f32.mrf.mxu0  ;;  %v846_v46 = vpop.f32.mrf.mxu1 }
 0x118   : > { %1137 = vst [vmem:[%s1690_s6 + $0xc0] sm:$0xff] %v733_v45  ;;  %1139 = vst [vmem:[%s1690_s6 + $0xd0] sm:$0xff] %v846_v46 }
 0x119   : > { %v735_v47 = vpop.f32.mrf.mxu0  ;;  %v848_v48 = vpop.f32.mrf.mxu1 }
 0x11a   : > { %1138 = vst [vmem:[%s1690_s6 + $0xc8] sm:$0xff] %v735_v47  ;;  %1140 = vst [vmem:[%s1690_s6 + $0xd8] sm:$0xff] %v848_v48 }
 0x11b   : > { %v739_v49 = vpop.f32.mrf.mxu0  ;;  %v852_v50 = vpop.f32.mrf.mxu1 }
 0x11c   : > { %1153 = vst [vmem:[%s1690_s6 + $0x140] sm:$0xff] %v739_v49  ;;  %1155 = vst [vmem:[%s1690_s6 + $0x150] sm:$0xff] %v852_v50 }
 0x11d   : > { %v741_v51 = vpop.f32.mrf.mxu0  ;;  %v854_v52 = vpop.f32.mrf.mxu1 }
 0x11e   : > { %1154 = vst [vmem:[%s1690_s6 + $0x148] sm:$0xff] %v741_v51  ;;  %1156 = vst [vmem:[%s1690_s6 + $0x158] sm:$0xff] %v854_v52 }
 0x11f   : > { %v745_v53 = vpop.f32.mrf.mxu0  ;;  %v858_v54 = vpop.f32.mrf.mxu1 }
 0x120   : > { %1169 = vst [vmem:[%s1690_s6 + $0x1c0] sm:$0xff] %v745_v53  ;;  %1171 = vst [vmem:[%s1690_s6 + $0x1d0] sm:$0xff] %v858_v54 }
 0x121   : > { %v747_v55 = vpop.f32.mrf.mxu0  ;;  %v860_v56 = vpop.f32.mrf.mxu1 }
 0x122   : > { %1170 = vst [vmem:[%s1690_s6 + $0x1c8] sm:$0xff] %v747_v55  ;;  %1172 = vst [vmem:[%s1690_s6 + $0x1d8] sm:$0xff] %v860_v56 }
 0x123   : > { %v751_v57 = vpop.f32.mrf.mxu0  ;;  %v864_v58 = vpop.f32.mrf.mxu1 }
 0x124   : > { %1185 = vst [vmem:[%s1690_s6 + $0x240] sm:$0xff] %v751_v57  ;;  %1187 = vst [vmem:[%s1690_s6 + $0x250] sm:$0xff] %v864_v58 }
 0x125   : > { %v753_v59 = vpop.f32.mrf.mxu0  ;;  %v866_v60 = vpop.f32.mrf.mxu1 }
 0x126   : > { %1186 = vst [vmem:[%s1690_s6 + $0x248] sm:$0xff] %v753_v59  ;;  %1188 = vst [vmem:[%s1690_s6 + $0x258] sm:$0xff] %v866_v60 }
 0x127   : > { %v757_v61 = vpop.f32.mrf.mxu0  ;;  %v870_v62 = vpop.f32.mrf.mxu1 }
 0x128   : > { %1201 = vst [vmem:[%s1690_s6 + $0x2c0] sm:$0xff] %v757_v61  ;;  %1203 = vst [vmem:[%s1690_s6 + $0x2d0] sm:$0xff] %v870_v62 }
 0x129   : > { %v759_v63 = vpop.f32.mrf.mxu0  ;;  %v872_v0 = vpop.f32.mrf.mxu1 }
 0x12a   : > { %1202 = vst [vmem:[%s1690_s6 + $0x2c8] sm:$0xff] %v759_v63  ;;  %1204 = vst [vmem:[%s1690_s6 + $0x2d8] sm:$0xff] %v872_v0 }
 0x12b   : > { %v763_v1 = vpop.f32.mrf.mxu0  ;;  %v876_v2 = vpop.f32.mrf.mxu1 }
 0x12c   : > { %1217 = vst [vmem:[%s1690_s6 + $0x340] sm:$0xff] %v763_v1  ;;  %1219 = vst [vmem:[%s1690_s6 + $0x350] sm:$0xff] %v876_v2 }
 0x12d   : > { %v765_v3 = vpop.f32.mrf.mxu0  ;;  %v878_v4 = vpop.f32.mrf.mxu1 }
 0x12e   : > { %1218 = vst [vmem:[%s1690_s6 + $0x348] sm:$0xff] %v765_v3  ;;  %1220 = vst [vmem:[%s1690_s6 + $0x358] sm:$0xff] %v878_v4 }
 0x12f   : > { %v769_v5 = vpop.f32.mrf.mxu0  ;;  %v882_v6 = vpop.f32.mrf.mxu1 }
 0x130   : > { %1233 = vst [vmem:[%s1690_s6 + $0x3c0] sm:$0xff] %v769_v5  ;;  %1235 = vst [vmem:[%s1690_s6 + $0x3d0] sm:$0xff] %v882_v6 }
 0x131   : > { %v771_v7 = vpop.f32.mrf.mxu0  ;;  %v884_v8 = vpop.f32.mrf.mxu1 }
 0x132   : > { %1234 = vst [vmem:[%s1690_s6 + $0x3c8] sm:$0xff] %v771_v7  ;;  %1236 = vst [vmem:[%s1690_s6 + $0x3d8] sm:$0xff] %v884_v8 }
 0x133   : > { %v953_v9 = vpop.f32.mrf.mxu0  ;;  %v1066_v10 = vpop.f32.mrf.mxu1 }
 0x134   : > { %1125 = vst [vmem:[%s1690_s6 + $0x60] sm:$0xff] %v953_v9  ;;  %1127 = vst [vmem:[%s1690_s6 + $0x70] sm:$0xff] %v1066_v10 }
 0x135   : > { %v955_v11 = vpop.f32.mrf.mxu0  ;;  %v1068_v12 = vpop.f32.mrf.mxu1 }
 0x136   : > { %1126 = vst [vmem:[%s1690_s6 + $0x68] sm:$0xff] %v955_v11  ;;  %1128 = vst [vmem:[%s1690_s6 + $0x78] sm:$0xff] %v1068_v12 }
 0x137   : > { %v959_v13 = vpop.f32.mrf.mxu0  ;;  %v1072_v14 = vpop.f32.mrf.mxu1 }
 0x138   : > { %1141 = vst [vmem:[%s1690_s6 + $0xe0] sm:$0xff] %v959_v13  ;;  %1143 = vst [vmem:[%s1690_s6 + $0xf0] sm:$0xff] %v1072_v14 }
 0x139   : > { %v961_v15 = vpop.f32.mrf.mxu0  ;;  %v1074_v16 = vpop.f32.mrf.mxu1 }
 0x13a   : > { %1142 = vst [vmem:[%s1690_s6 + $0xe8] sm:$0xff] %v961_v15  ;;  %1144 = vst [vmem:[%s1690_s6 + $0xf8] sm:$0xff] %v1074_v16 }
 0x13b   : > { %v965_v17 = vpop.f32.mrf.mxu0  ;;  %v1078_v18 = vpop.f32.mrf.mxu1 }
 0x13c   : > { %1157 = vst [vmem:[%s1690_s6 + $0x160] sm:$0xff] %v965_v17  ;;  %1159 = vst [vmem:[%s1690_s6 + $0x170] sm:$0xff] %v1078_v18 }
 0x13d   : > { %v967_v19 = vpop.f32.mrf.mxu0  ;;  %v1080_v20 = vpop.f32.mrf.mxu1 }
 0x13e   : > { %1158 = vst [vmem:[%s1690_s6 + $0x168] sm:$0xff] %v967_v19  ;;  %1160 = vst [vmem:[%s1690_s6 + $0x178] sm:$0xff] %v1080_v20 }
 0x13f   : > { %v971_v21 = vpop.f32.mrf.mxu0  ;;  %v1084_v22 = vpop.f32.mrf.mxu1 }
 0x140   : > { %1173 = vst [vmem:[%s1690_s6 + $0x1e0] sm:$0xff] %v971_v21  ;;  %1175 = vst [vmem:[%s1690_s6 + $0x1f0] sm:$0xff] %v1084_v22 }
 0x141   : > { %v973_v23 = vpop.f32.mrf.mxu0  ;;  %v1086_v24 = vpop.f32.mrf.mxu1 }
 0x142   : > { %1174 = vst [vmem:[%s1690_s6 + $0x1e8] sm:$0xff] %v973_v23  ;;  %1176 = vst [vmem:[%s1690_s6 + $0x1f8] sm:$0xff] %v1086_v24 }
 0x143   : > { %v977_v25 = vpop.f32.mrf.mxu0  ;;  %v1090_v26 = vpop.f32.mrf.mxu1 }
 0x144   : > { %1189 = vst [vmem:[%s1690_s6 + $0x260] sm:$0xff] %v977_v25  ;;  %1191 = vst [vmem:[%s1690_s6 + $0x270] sm:$0xff] %v1090_v26 }
 0x145   : > { %v979_v27 = vpop.f32.mrf.mxu0  ;;  %v1092_v28 = vpop.f32.mrf.mxu1 }
 0x146   : > { %1190 = vst [vmem:[%s1690_s6 + $0x268] sm:$0xff] %v979_v27  ;;  %1192 = vst [vmem:[%s1690_s6 + $0x278] sm:$0xff] %v1092_v28 }
 0x147   : > { %v983_v29 = vpop.f32.mrf.mxu0  ;;  %v1096_v30 = vpop.f32.mrf.mxu1 }
 0x148   : > { %1205 = vst [vmem:[%s1690_s6 + $0x2e0] sm:$0xff] %v983_v29  ;;  %1207 = vst [vmem:[%s1690_s6 + $0x2f0] sm:$0xff] %v1096_v30 }
 0x149   : > { %v985_v31 = vpop.f32.mrf.mxu0  ;;  %v1098_v32 = vpop.f32.mrf.mxu1 }
 0x14a   : > { %1206 = vst [vmem:[%s1690_s6 + $0x2e8] sm:$0xff] %v985_v31  ;;  %1208 = vst [vmem:[%s1690_s6 + $0x2f8] sm:$0xff] %v1098_v32 }
 0x14b   : > { %v989_v33 = vpop.f32.mrf.mxu0  ;;  %v1102_v34 = vpop.f32.mrf.mxu1 }
 0x14c   : > { %1221 = vst [vmem:[%s1690_s6 + $0x360] sm:$0xff] %v989_v33  ;;  %1223 = vst [vmem:[%s1690_s6 + $0x370] sm:$0xff] %v1102_v34 }
 0x14d   : > { %v991_v35 = vpop.f32.mrf.mxu0  ;;  %v1104_v36 = vpop.f32.mrf.mxu1 }
 0x14e   : > { %1222 = vst [vmem:[%s1690_s6 + $0x368] sm:$0xff] %v991_v35  ;;  %1224 = vst [vmem:[%s1690_s6 + $0x378] sm:$0xff] %v1104_v36 }
 0x14f   : > { %v995_v37 = vpop.f32.mrf.mxu0  ;;  %v1108_v38 = vpop.f32.mrf.mxu1 }
 0x150   : > { %1237 = vst [vmem:[%s1690_s6 + $0x3e0] sm:$0xff] %v995_v37  ;;  %1239 = vst [vmem:[%s1690_s6 + $0x3f0] sm:$0xff] %v1108_v38 }
 0x151   : > { %v997_v39 = vpop.f32.mrf.mxu0  ;;  %v1110_v40 = vpop.f32.mrf.mxu1 }
 0x152   : > { %1238 = vst [vmem:[%s1690_s6 + $0x3e8] sm:$0xff] %v997_v39  ;;  %1240 = vst [vmem:[%s1690_s6 + $0x3f8] sm:$0xff] %v1110_v40 }
 0x153 PF: > { %s12_s9 = sadd.s32 1, %s1388_s9  }
 0x154   : > { %p9_p4 = scmp.ge.s32.totalorder %s12_s9, 4  }
 0x156   :  { %11 = sbr.rel (!%p9_p4) target bundleno = 1 (0x1), region = 58 }

// kernel: deeperlab_seg_head_forward.4
= control target key start
LH: loop header
LB: loop body
LE: loop exit
PB: predicated region body
PF: predicated region fallthrough
CT: control target
= control target key end

     0   :  { %s2065_s12 = smov 0   ;;  %s2067_s13 = smov 0   ;;  %s2577_s0 = inlined_call_operand.vmem [shape: bf16[512,256], index: 0, kind: input, shape index: {}]   ;;  %s2578_s1 = inlined_call_operand.vmem [shape: bf16[256,256], index: 1, kind: input, shape index: {}]   ;;  %s2579_s2 = inlined_call_operand.vmem [shape: bf16[512,256], index: 2, kind: output, shape index: {0}]   ;;  %s2580_s3 = inlined_call_operand.vmem [shape: f32[2,2,256], index: 3, kind: output, shape index: {1}]  }
   0x1   :  { %s2069_s14 = smov 0  }
   0x2 LB: > { %s26_s15 = sadd.s32 1, %s2039_s13  ;;  %p1726_p0 = scmp.ge.s32.totalorder %s2043_s14, 1  ;;  %s2043_s14 = sphi %s2069_s14, %s14_s14   ;;  %s2039_s13 = sphi %s2067_s13, %s2582_s13   ;;  %s2035_s12 = sphi %s2065_s12, %s2581_s12  }
   0x3   : > { %p28_p1 = scmp.ge.s32.totalorder %s26_s15, 2  ;;  %p173_p2 = scmp.lt.s32.totalorder %s2043_s14, 3 }
   0x5   : > { %s2584_s15 = smov (%p28_p1, %s26_s15), 0  ;;  %p174_p3 = pnand %p1726_p0, %p173_p2 }
   0x6   : > { %s1727_s26 = sshll.u32 (!%p174_p3), %s2035_s12, 5  ;;  %p240_p5 = scmp.lt.s32.totalorder (!%p174_p3), %s2035_s12, 1 }
   0x7   : > { %177 = sbr.rel (%p174_p3) target bundleno = 385 (0x181), region = 28  ;;  %p216_p4 = scmp.lt.s32.totalorder (!%p174_p3), %s1727_s26, 63 }
   0xc   : > { %v1925_v0 = vld [vmem:[%s2578_s1 + $0x74] ss:$8 sps:$4 sm:$0xff]   ;;  %v1927_v1 = vld [vmem:[%s2578_s1 + $0x70] ss:$8 sps:$4 sm:$0xff]   ;;  %v1928_v2 = vld [vmem:[%s2578_s1 + $0x64] ss:$8 sps:$4 sm:$0xff]  }
   0xd   : > { %761 = vmatprep.subr.bf16.mxu0 %v1925_v0  ;;  %1869 = vmatprep.subr.bf16.mxu1 %v1925_v0  ;;  %v1930_v3 = vld [vmem:[%s2578_s1 + $0x60] ss:$8 sps:$4 sm:$0xff]   ;;  %v1931_v4 = vld [vmem:[%s2578_s1 + $0x54] ss:$8 sps:$4 sm:$0xff]   ;;  %v1933_v5 = vld [vmem:[%s2578_s1 + $0x50] ss:$8 sps:$4 sm:$0xff]  }
   0xe   : > { %762 = vmatpush1.bf16.msra.mxu0 %v1927_v1  ;;  %1885 = vmatpush1.bf16.msra.mxu1 %v1927_v1  ;;  %v1934_v6 = vld [vmem:[%s2578_s1 + $0x44] ss:$8 sps:$4 sm:$0xff]   ;;  %v1936_v7 = vld [vmem:[%s2578_s1 + $0x40] ss:$8 sps:$4 sm:$0xff]   ;;  %v1937_v8 = vld [vmem:[%s2578_s1 + $0x34] ss:$8 sps:$4 sm:$0xff]  }
   0xf   : > { %763 = vmatprep.subr.bf16.mxu0 %v1928_v2  ;;  %1870 = vmatprep.subr.bf16.mxu1 %v1928_v2  ;;  %s2586_s26 = smov (!%p216_p4, %s1727_s26), 63  ;;  %v1939_v9 = vld [vmem:[%s2578_s1 + $0x30] ss:$8 sps:$4 sm:$0xff]   ;;  %v1940_v10 = vld [vmem:[%s2578_s1 + $0x24] ss:$8 sps:$4 sm:$0xff]   ;;  %s2588_s12 = smov (!%p240_p5, %s2035_s12), 1 }
  0x10   : > { %s1834_s16 = sshll.u32 %s2586_s26, 3  ;;  %v1942_v11 = vld [vmem:[%s2578_s1 + $0x20] ss:$8 sps:$4 sm:$0xff]   ;;  %v1943_v12 = vld [vmem:[%s2578_s1 + $0x14] ss:$8 sps:$4 sm:$0xff]   ;;  %vm1585_vm0 = vcmask 1040384  }
  0x11   : > { %s2130_s21 = scalar_lea.vmem %s2577_s0, %s1834_s16  ;;  %v1945_v14 = vld [vmem:[%s2578_s1 + $0x10] ss:$8 sps:$4 sm:$0xff]   ;;  %v1946_v15 = vld [vmem:[%s2578_s1 + $0x4] ss:$8 sps:$4 sm:$0xff]   ;;  %v1948_v16 = vld [vmem:[%s2578_s1] ss:$8 sps:$4 sm:$0xff]   ;;  %s2233_s24 = scalar_lea.vmem %s2579_s2, %s1834_s16 }
  0x12   : > { %764 = vmatpush1.bf16.msra.mxu0 %v1930_v3  ;;  %1886 = vmatpush1.bf16.msra.mxu1 %v1930_v3  ;;  %v1975_v13 = vld [vmem:[%s2130_s21 + $0x4] ss:$8 sps:$4 sm:$0xff]   ;;  %v1949_v18 = vld [vmem:[%s2578_s1 + $0xf4] ss:$8 sps:$4 sm:$0xff]   ;;  %v1951_v19 = vld [vmem:[%s2578_s1 + $0xf0] ss:$8 sps:$4 sm:$0xff]  }
  0x13   : > { %765 = vmatprep.subr.bf16.mxu0 %v1931_v4  ;;  %1871 = vmatprep.subr.bf16.mxu1 %v1931_v4  ;;  %v1987_v17 = vld [vmem:[%s2130_s21 + $0x84] ss:$8 sps:$4 sm:$0xff]   ;;  %v1954_v21 = vld [vmem:[%s2578_s1 + $0xe0] ss:$8 sps:$4 sm:$0xff]   ;;  %v1955_v22 = vld [vmem:[%s2578_s1 + $0xd4] ss:$8 sps:$4 sm:$0xff]  }
  0x14   : > { %793 = vmatprep.mubr.bf16.mxu0 %v1975_v13  ;;  %873 = vmatprep.mubr.bf16.mxu1 %v1987_v17  ;;  %v1952_v20 = vld [vmem:[%s2578_s1 + $0xe4] ss:$8 sps:$4 sm:$0xff]   ;;  %v1957_v23 = vld [vmem:[%s2578_s1 + $0xd0] ss:$8 sps:$4 sm:$0xff]   ;;  %v1960_v25 = vld [vmem:[%s2578_s1 + $0xc0] ss:$8 sps:$4 sm:$0xff]  }
  0x15   : > { %v1958_v24 = vld [vmem:[%s2578_s1 + $0xc4] ss:$8 sps:$4 sm:$0xff]   ;;  %v1961_v26 = vld [vmem:[%s2578_s1 + $0xb4] ss:$8 sps:$4 sm:$0xff]   ;;  %v1963_v27 = vld [vmem:[%s2578_s1 + $0xb0] ss:$8 sps:$4 sm:$0xff]  }
  0x16   : > { %766 = vmatpush1.bf16.msra.mxu0 %v1933_v5  ;;  %1887 = vmatpush1.bf16.msra.mxu1 %v1933_v5  ;;  %v1964_v28 = vld [vmem:[%s2578_s1 + $0xa4] ss:$8 sps:$4 sm:$0xff]   ;;  %v1966_v29 = vld [vmem:[%s2578_s1 + $0xa0] ss:$8 sps:$4 sm:$0xff]   ;;  %v1967_v30 = vld [vmem:[%s2578_s1 + $0x94] ss:$8 sps:$4 sm:$0xff]  }
  0x17   : > { %767 = vmatprep.subr.bf16.mxu0 %v1934_v6  ;;  %1872 = vmatprep.subr.bf16.mxu1 %v1934_v6  ;;  %v1969_v31 = vld [vmem:[%s2578_s1 + $0x90] ss:$8 sps:$4 sm:$0xff]   ;;  %v1970_v32 = vld [vmem:[%s2578_s1 + $0x84] ss:$8 sps:$4 sm:$0xff]   ;;  %v1972_v33 = vld [vmem:[%s2578_s1 + $0x80] ss:$8 sps:$4 sm:$0xff]  }
  0x18   : > { %v1973_v34 = vld [vmem:[%s2130_s21] ss:$8 sps:$4 sm:$0xff]   ;;  %v1976_v36 = vld [vmem:[%s2130_s21 + $0x14] ss:$8 sps:$4 sm:$0xff]   ;;  %v1978_v38 = vld [vmem:[%s2130_s21 + $0x10] ss:$8 sps:$4 sm:$0xff]  }
  0x19   : > { %v1985_v35 = vld [vmem:[%s2130_s21 + $0x80] ss:$8 sps:$4 sm:$0xff]   ;;  %v1991_v37 = vld [vmem:[%s2130_s21 + $0x94] ss:$8 sps:$4 sm:$0xff]   ;;  %v1993_v39 = vld [vmem:[%s2130_s21 + $0x90] ss:$8 sps:$4 sm:$0xff]  }
  0x1a   : > { %768 = vmatpush1.bf16.msra.mxu0 %v1936_v7  ;;  %1888 = vmatpush1.bf16.msra.mxu1 %v1936_v7  ;;  %v1979_v40 = vld [vmem:[%s2130_s21 + $0x24] ss:$8 sps:$4 sm:$0xff]   ;;  %v1981_v42 = vld [vmem:[%s2130_s21 + $0x20] ss:$8 sps:$4 sm:$0xff]   ;;  %v1982_v44 = vld [vmem:[%s2130_s21 + $0x34] ss:$8 sps:$4 sm:$0xff]  }
  0x1b   : > { %769 = vmatprep.subr.bf16.mxu0 %v1937_v8  ;;  %1873 = vmatprep.subr.bf16.mxu1 %v1937_v8  ;;  %v1997_v41 = vld [vmem:[%s2130_s21 + $0xa4] ss:$8 sps:$4 sm:$0xff]   ;;  %v1999_v43 = vld [vmem:[%s2130_s21 + $0xa0] ss:$8 sps:$4 sm:$0xff]   ;;  %v2003_v45 = vld [vmem:[%s2130_s21 + $0xb4] ss:$8 sps:$4 sm:$0xff]  }
  0x1c   : > { %v1984_v46 = vld [vmem:[%s2130_s21 + $0x30] ss:$8 sps:$4 sm:$0xff]   ;;  %v1988_v48 = vld [vmem:[%s2130_s21 + $0x44] ss:$8 sps:$4 sm:$0xff]   ;;  %v1990_v50 = vld [vmem:[%s2130_s21 + $0x40] ss:$8 sps:$4 sm:$0xff]  }
  0x1d   : > { %v2005_v47 = vld [vmem:[%s2130_s21 + $0xb0] ss:$8 sps:$4 sm:$0xff]   ;;  %v2009_v49 = vld [vmem:[%s2130_s21 + $0xc4] ss:$8 sps:$4 sm:$0xff]   ;;  %v2011_v51 = vld [vmem:[%s2130_s21 + $0xc0] ss:$8 sps:$4 sm:$0xff]  }
  0x1e   : > { %770 = vmatpush1.bf16.msra.mxu0 %v1939_v9  ;;  %1889 = vmatpush1.bf16.msra.mxu1 %v1939_v9  ;;  %v1994_v52 = vld [vmem:[%s2130_s21 + $0x54] ss:$8 sps:$4 sm:$0xff]   ;;  %v1996_v54 = vld [vmem:[%s2130_s21 + $0x50] ss:$8 sps:$4 sm:$0xff]   ;;  %v2000_v56 = vld [vmem:[%s2130_s21 + $0x64] ss:$8 sps:$4 sm:$0xff]  }
  0x1f   : > { %771 = vmatprep.subr.bf16.mxu0 %v1940_v10  ;;  %1874 = vmatprep.subr.bf16.mxu1 %v1940_v10  ;;  %v2012_v53 = vld [vmem:[%s2130_s21 + $0xd4] ss:$8 sps:$4 sm:$0xff]   ;;  %v2014_v55 = vld [vmem:[%s2130_s21 + $0xd0] ss:$8 sps:$4 sm:$0xff]   ;;  %v2015_v57 = vld [vmem:[%s2130_s21 + $0xe4] ss:$8 sps:$4 sm:$0xff]  }
  0x20   : > { %v2002_v58 = vld [vmem:[%s2130_s21 + $0x60] ss:$8 sps:$4 sm:$0xff]   ;;  %v2006_v60 = vld [vmem:[%s2130_s21 + $0x74] ss:$8 sps:$4 sm:$0xff]   ;;  %v2008_v62 = vld [vmem:[%s2130_s21 + $0x70] ss:$8 sps:$4 sm:$0xff]  }
  0x21   : > { %v2017_v59 = vld [vmem:[%s2130_s21 + $0xe0] ss:$8 sps:$4 sm:$0xff]   ;;  %v2018_v61 = vld [vmem:[%s2130_s21 + $0xf4] ss:$8 sps:$4 sm:$0xff]   ;;  %v2020_v63 = vld [vmem:[%s2130_s21 + $0xf0] ss:$8 sps:$4 sm:$0xff]  }
  0x22   : > { %772 = vmatpush1.bf16.msra.mxu0 %v1942_v11  ;;  %1890 = vmatpush1.bf16.msra.mxu1 %v1942_v11  ;;  %s1836_s26 = sshll.u32 %s2588_s12, 2 }
  0x23   : > { %773 = vmatprep.subr.bf16.mxu0 %v1943_v12  ;;  %1875 = vmatprep.subr.bf16.mxu1 %v1943_v12  ;;  %s244_s25 = scalar_lea.vmem %s2580_s3, %s1836_s26 }
  0x26   : > { %774 = vmatpush1.bf16.msra.mxu0 %v1945_v14  ;;  %1891 = vmatpush1.bf16.msra.mxu1 %v1945_v14 }
  0x27   : > { %775 = vmatprep.subr.bf16.mxu0 %v1946_v15  ;;  %1876 = vmatprep.subr.bf16.mxu1 %v1946_v15 }
  0x2a   : > { %776 = vmatpush1.bf16.msra.mxu0 %v1948_v16  ;;  %1892 = vmatpush1.bf16.msra.mxu1 %v1948_v16 }
  0x2b   : > { %777 = vmatprep.subr.bf16.mxu0 %v1949_v18  ;;  %1877 = vmatprep.subr.bf16.mxu1 %v1949_v18 }
  0x2e   : > { %778 = vmatpush2.bf16.msra.mxu0 %v1951_v19  ;;  %1893 = vmatpush2.bf16.msra.mxu1 %v1951_v19 }
  0x2f   : > { %779 = vmatprep.subr.bf16.mxu0 %v1952_v20  ;;  %1878 = vmatprep.subr.bf16.mxu1 %v1952_v20 }
  0x32   : > { %780 = vmatpush2.bf16.msra.mxu0 %v1954_v21  ;;  %1894 = vmatpush2.bf16.msra.mxu1 %v1954_v21 }
  0x33   : > { %781 = vmatprep.subr.bf16.mxu0 %v1955_v22  ;;  %1879 = vmatprep.subr.bf16.mxu1 %v1955_v22 }
  0x36   : > { %782 = vmatpush2.bf16.msra.mxu0 %v1957_v23  ;;  %1895 = vmatpush2.bf16.msra.mxu1 %v1957_v23 }
  0x37   : > { %783 = vmatprep.subr.bf16.mxu0 %v1958_v24  ;;  %1880 = vmatprep.subr.bf16.mxu1 %v1958_v24 }
  0x3a   : > { %784 = vmatpush2.bf16.msra.mxu0 %v1960_v25  ;;  %1896 = vmatpush2.bf16.msra.mxu1 %v1960_v25 }
  0x3b   : > { %785 = vmatprep.subr.bf16.mxu0 %v1961_v26  ;;  %1881 = vmatprep.subr.bf16.mxu1 %v1961_v26 }
  0x3e   : > { %786 = vmatpush2.bf16.msra.mxu0 %v1963_v27  ;;  %1897 = vmatpush2.bf16.msra.mxu1 %v1963_v27 }
  0x3f   : > { %787 = vmatprep.subr.bf16.mxu0 %v1964_v28  ;;  %1882 = vmatprep.subr.bf16.mxu1 %v1964_v28 }
  0x42   : > { %788 = vmatpush2.bf16.msra.mxu0 %v1966_v29  ;;  %1898 = vmatpush2.bf16.msra.mxu1 %v1966_v29 }
  0x43   : > { %789 = vmatprep.subr.bf16.mxu0 %v1967_v30  ;;  %1883 = vmatprep.subr.bf16.mxu1 %v1967_v30 }
  0x46   : > { %790 = vmatpush2.bf16.msra.mxu0 %v1969_v31  ;;  %1899 = vmatpush2.bf16.msra.mxu1 %v1969_v31 }
  0x47   : > { %791 = vmatprep.subr.bf16.mxu0 %v1970_v32  ;;  %1884 = vmatprep.subr.bf16.mxu1 %v1970_v32 }
  0x4a   : > { %792 = vmatpush2.bf16.msra.mxu0 %v1972_v33  ;;  %1900 = vmatpush2.bf16.msra.mxu1 %v1972_v33 }
  0x4d   : > { %794 = vmatmul.mubr.bf16.vlgmr.msra.gmra.mxu0 %v1973_v34  ;;  %874 = vmatmul.mubr.bf16.vlgmr.msra.gmra.mxu1 %v1985_v35 }
  0x4e   : > { %803 = vmatprep.mubr.bf16.mxu0 %v1976_v36  ;;  %883 = vmatprep.mubr.bf16.mxu1 %v1991_v37 }
  0x55   : > { %804 = vmatmul.mubr.bf16.gmra.mxu0 %v1978_v38  ;;  %884 = vmatmul.mubr.bf16.gmra.mxu1 %v1993_v39 }
  0x56   : > { %813 = vmatprep.mubr.bf16.mxu0 %v1979_v40  ;;  %893 = vmatprep.mubr.bf16.mxu1 %v1997_v41 }
  0x5d   : > { %814 = vmatmul.mubr.bf16.gmra.mxu0 %v1981_v42  ;;  %894 = vmatmul.mubr.bf16.gmra.mxu1 %v1999_v43 }
  0x5e   : > { %823 = vmatprep.mubr.bf16.mxu0 %v1982_v44  ;;  %903 = vmatprep.mubr.bf16.mxu1 %v2003_v45 }
  0x65   : > { %824 = vmatmul.mubr.bf16.gmra.mxu0 %v1984_v46  ;;  %904 = vmatmul.mubr.bf16.gmra.mxu1 %v2005_v47 }
  0x66   : > { %833 = vmatprep.mubr.bf16.mxu0 %v1988_v48  ;;  %913 = vmatprep.mubr.bf16.mxu1 %v2009_v49 }
  0x6d   : > { %834 = vmatmul.mubr.bf16.gmra.mxu0 %v1990_v50  ;;  %914 = vmatmul.mubr.bf16.gmra.mxu1 %v2011_v51 }
  0x6e   : > { %843 = vmatprep.mubr.bf16.mxu0 %v1994_v52  ;;  %923 = vmatprep.mubr.bf16.mxu1 %v2012_v53 }
  0x75   : > { %844 = vmatmul.mubr.bf16.gmra.mxu0 %v1996_v54  ;;  %924 = vmatmul.mubr.bf16.gmra.mxu1 %v2014_v55 }
  0x76   : > { %853 = vmatprep.mubr.bf16.mxu0 %v2000_v56  ;;  %933 = vmatprep.mubr.bf16.mxu1 %v2015_v57 }
  0x7d   : > { %854 = vmatmul.mubr.bf16.gmra.mxu0 %v2002_v58  ;;  %934 = vmatmul.mubr.bf16.gmra.mxu1 %v2017_v59 }
  0x7e   : > { %863 = vmatprep.mubr.bf16.mxu0 %v2006_v60  ;;  %943 = vmatprep.mubr.bf16.mxu1 %v2018_v61 }
  0x85   : > { %864 = vmatmul.mubr.bf16.gmra.mxu0 %v2008_v62  ;;  %944 = vmatmul.mubr.bf16.gmra.mxu1 %v2020_v63 }
 0x10d   : > { %v2224_v0 = vpop.f32.mrf.mxu0  ;;  %v2226_v1 = vpop.f32.mrf.mxu1 }
 0x10e   : > { %v1447_v49 = vmul.f32 %v2224_v0, %v2224_v0 }
 0x10f   : > { %v2235_v2 = vpop.f32.mrf.mxu0  ;;  %v2237_v3 = vpop.f32.mrf.mxu1 }
 0x110   : > { %v1837_v4 = vpack.c.bf16 %v2235_v2, %v2224_v0  ;;  %v1853_v5 = vpack.c.bf16 %v2237_v3, %v2226_v1  ;;  %v1448_v54 = vmul.f32 %v2235_v2, %v2235_v2 }
 0x111   : > { %v2243_v6 = vpop.f32.mrf.mxu0  ;;  %v2245_v7 = vpop.f32.mrf.mxu1 }
 0x112   : > { %1341 = vst [vmem:[%s2233_s24] sm:$0xff] %v1837_v4  ;;  %1357 = vst [vmem:[%s2233_s24 + $0x80] sm:$0xff] %v1853_v5  ;;  %v1449_v44 = vmul.f32 %v2243_v6, %v2243_v6  ;;  %v1373_v55 = vadd.f32 %v2243_v6, %v2224_v0 }
 0x113   : > { %v2249_v8 = vpop.f32.mrf.mxu0  ;;  %v2251_v9 = vpop.f32.mrf.mxu1 }
 0x114   : > { %v1838_v10 = vpack.c.bf16 %v2249_v8, %v2243_v6  ;;  %v1854_v12 = vpack.c.bf16 %v2251_v9, %v2245_v7  ;;  %v1450_v47 = vmul.f32 %v2249_v8, %v2249_v8  ;;  %v1511_v56 = vadd.f32 %v1449_v44, %v1447_v49 }
 0x115   : > { %v2255_v11 = vpop.f32.mrf.mxu0  ;;  %v2259_v13 = vpop.f32.mrf.mxu1  ;;  %v1410_v61 = vadd.f32 %v2249_v8, %v2235_v2 }
 0x116   : > { %1342 = vst [vmem:[%s2233_s24 + $0x8] sm:$0xff] %v1838_v10  ;;  %1358 = vst [vmem:[%s2233_s24 + $0x88] sm:$0xff] %v1854_v12  ;;  %v1451_v50 = vmul.f32 %v2255_v11, %v2255_v11  ;;  %v1548_v62 = vadd.f32 %v1450_v47, %v1448_v54  ;;  %v1374_v63 = vadd.f32 %v1373_v55, %v2255_v11 }
 0x117   : > { %v2262_v14 = vpop.f32.mrf.mxu0  ;;  %v2265_v15 = vpop.f32.mrf.mxu1 }
 0x118   : > { %v1839_v16 = vpack.c.bf16 %v2262_v14, %v2255_v11  ;;  %v1855_v18 = vpack.c.bf16 %v2265_v15, %v2259_v13  ;;  %v1452_v57 = vmul.f32 %v2262_v14, %v2262_v14  ;;  %v1512_v4 = vadd.f32 %v1511_v56, %v1451_v50 }
 0x119   : > { %v2269_v17 = vpop.f32.mrf.mxu0  ;;  %v2273_v19 = vpop.f32.mrf.mxu1  ;;  %v1411_v2 = vadd.f32 %v1410_v61, %v2262_v14 }
 0x11a   : > { %1343 = vst [vmem:[%s2233_s24 + $0x10] sm:$0xff] %v1839_v16  ;;  %1359 = vst [vmem:[%s2233_s24 + $0x90] sm:$0xff] %v1855_v18  ;;  %v1453_v58 = vmul.f32 %v2269_v17, %v2269_v17  ;;  %v1375_v8 = vadd.f32 %v1374_v63, %v2269_v17  ;;  %v1549_v11 = vadd.f32 %v1548_v62, %v1452_v57 }
 0x11b   : > { %v2276_v20 = vpop.f32.mrf.mxu0  ;;  %v2279_v21 = vpop.f32.mrf.mxu1 }
 0x11c   : > { %v1840_v22 = vpack.c.bf16 %v2276_v20, %v2269_v17  ;;  %v1856_v24 = vpack.c.bf16 %v2279_v21, %v2273_v19  ;;  %v1454_v5 = vmul.f32 %v2276_v20, %v2276_v20  ;;  %v1513_v18 = vadd.f32 %v1512_v4, %v1453_v58 }
 0x11d   : > { %v2283_v23 = vpop.f32.mrf.mxu0  ;;  %v2287_v25 = vpop.f32.mrf.mxu1 }
 0x11e   : > { %1344 = vst [vmem:[%s2233_s24 + $0x18] sm:$0xff] %v1840_v22  ;;  %1360 = vst [vmem:[%s2233_s24 + $0x98] sm:$0xff] %v1856_v24  ;;  %v1455_v6 = vmul.f32 %v2283_v23, %v2283_v23  ;;  %v1376_v14 = vadd.f32 %v1375_v8, %v2283_v23 }
 0x11f   : > { %v2290_v26 = vpop.f32.mrf.mxu0  ;;  %v2293_v27 = vpop.f32.mrf.mxu1 }
 0x120   : > { %v1841_v28 = vpack.c.bf16 %v2290_v26, %v2283_v23  ;;  %v1857_v30 = vpack.c.bf16 %v2293_v27, %v2287_v25  ;;  %v1456_v22 = vmul.f32 %v2290_v26, %v2290_v26 }
 0x121   : > { %v2297_v29 = vpop.f32.mrf.mxu0  ;;  %v2301_v31 = vpop.f32.mrf.mxu1 }
 0x122   : > { %1345 = vst [vmem:[%s2233_s24 + $0x20] sm:$0xff] %v1841_v28  ;;  %1361 = vst [vmem:[%s2233_s24 + $0xa0] sm:$0xff] %v1857_v30  ;;  %v1457_v24 = vmul.f32 %v2297_v29, %v2297_v29  ;;  %v1377_v50 = vadd.f32 %v1376_v14, %v2297_v29 }
 0x123   : > { %v2304_v32 = vpop.f32.mrf.mxu0  ;;  %v2307_v33 = vpop.f32.mrf.mxu1 }
 0x124   : > { %v1842_v34 = vpack.c.bf16 %v2304_v32, %v2297_v29  ;;  %v1858_v36 = vpack.c.bf16 %v2307_v33, %v2301_v31 }
 0x125   : > { %v2311_v35 = vpop.f32.mrf.mxu0  ;;  %v2315_v37 = vpop.f32.mrf.mxu1 }
 0x126   : > { %1346 = vst [vmem:[%s2233_s24 + $0x28] sm:$0xff] %v1842_v34  ;;  %1362 = vst [vmem:[%s2233_s24 + $0xa8] sm:$0xff] %v1858_v36  ;;  %v1412_v34 = vadd.f32 %v1411_v2, %v2276_v20  ;;  %v1550_v36 = vadd.f32 %v1549_v11, %v1454_v5  ;;  %v1458_v20 = vmul.f32 %v2304_v32, %v2304_v32 }
 0x127   : > { %v2318_v38 = vpop.f32.mrf.mxu0  ;;  %v2321_v39 = vpop.f32.mrf.mxu1 }
 0x128   : > { %v1843_v40 = vpack.c.bf16 %v2318_v38, %v2311_v35  ;;  %v1859_v42 = vpack.c.bf16 %v2321_v39, %v2315_v37  ;;  %v1413_v49 = vadd.f32 %v1412_v34, %v2290_v26  ;;  %v1551_v23 = vadd.f32 %v1550_v36, %v1456_v22 }
 0x129   : > { %v2325_v41 = vpop.f32.mrf.mxu0  ;;  %v2329_v43 = vpop.f32.mrf.mxu1  ;;  %v1378_v26 = vadd.f32 %v1377_v50, %v2311_v35  ;;  %v1460_v29 = vmul.f32 %v2318_v38, %v2318_v38 }
 0x12a   : > { %1347 = vst [vmem:[%s2233_s24 + $0x30] sm:$0xff] %v1843_v40  ;;  %1363 = vst [vmem:[%s2233_s24 + $0xb0] sm:$0xff] %v1859_v42  ;;  %v1514_v40 = vadd.f32 %v1513_v18, %v1455_v6  ;;  %v1459_v42 = vmul.f32 %v2311_v35, %v2311_v35  ;;  %v1461_v54 = vmul.f32 %v2325_v41, %v2325_v41 }
 0x12b   : > { %v2334_v45 = vpop.f32.mrf.mxu0  ;;  %v2337_v46 = vpop.f32.mrf.mxu1  ;;  %v1414_v57 = vadd.f32 %v1413_v49, %v2304_v32  ;;  %v1552_v5 = vadd.f32 %v1551_v23, %v1458_v20  ;;  %v1379_v35 = vadd.f32 %v1378_v26, %v2325_v41 }
 0x12c   : > { %v1844_v48 = vpack.c.bf16 %v2334_v45, %v2325_v41  ;;  %v1860_v52 = vpack.c.bf16 %v2337_v46, %v2329_v43 }
 0x12d   : > { %v2347_v51 = vpop.f32.mrf.mxu0  ;;  %v2351_v53 = vpop.f32.mrf.mxu1  ;;  %v1415_v32 = vadd.f32 %v1414_v57, %v2318_v38  ;;  %v1553_v18 = vadd.f32 %v1552_v5, %v1460_v29 }
 0x12e   : > { %1348 = vst [vmem:[%s2233_s24 + $0x38] sm:$0xff] %v1844_v48  ;;  %1364 = vst [vmem:[%s2233_s24 + $0xb8] sm:$0xff] %v1860_v52  ;;  %v1515_v52 = vadd.f32 %v1514_v40, %v1457_v24  ;;  %v1463_v62 = vmul.f32 %v2347_v51, %v2347_v51  ;;  %v1380_v24 = vadd.f32 %v1379_v35, %v2347_v51 }
 0x12f   : > { %v2362_v59 = vpop.f32.mrf.mxu0  ;;  %v2365_v60 = vpop.f32.mrf.mxu1  ;;  %v1416_v22 = vadd.f32 %v1415_v32, %v2334_v45 }
 0x130   : > { %v1845_v0 = vpack.c.bf16 %v2362_v59, %v2347_v51  ;;  %v1861_v12 = vpack.c.bf16 %v2365_v60, %v2351_v53  ;;  %v1516_v61 = vadd.f32 %v1515_v52, %v1459_v42  ;;  %v1464_v41 = vmul.f32 %v2362_v59, %v2362_v59 }
 0x131   : > { %v839_v10 = vpop.f32.mrf.mxu0  ;;  %v2378_v16 = vpop.f32.mrf.mxu1  ;;  %v1417_v42 = vadd.f32 %v1416_v22, %v2362_v59 }
 0x132   : > { %1349 = vst [vmem:[%s2233_s24 + $0x40] sm:$0xff] %v1845_v0  ;;  %1365 = vst [vmem:[%s2233_s24 + $0xc0] sm:$0xff] %v1861_v12  ;;  %v1517_v6 = vadd.f32 %v1516_v61, %v1461_v54  ;;  %v1462_v12 = vmul.f32 %v2334_v45, %v2334_v45  ;;  %v1465_v2 = vmul.f32 %v839_v10, %v839_v10 }
 0x133   : > { %v841_v28 = vpop.f32.mrf.mxu0  ;;  %v2388_v30 = vpop.f32.mrf.mxu1 }
 0x134   : > { %v1846_v17 = vpack.c.bf16 %v841_v28, %v839_v10  ;;  %v1862_v47 = vpack.c.bf16 %v2388_v30, %v2378_v16  ;;  %v1518_v34 = vadd.f32 %v1517_v6, %v1463_v62  ;;  %v1554_v45 = vadd.f32 %v1553_v18, %v1462_v12 }
 0x135   : > { %v845_v44 = vpop.f32.mrf.mxu0  ;;  %v2396_v48 = vpop.f32.mrf.mxu1  ;;  %v1466_v51 = vmul.f32 %v841_v28, %v841_v28  ;;  %v1418_v52 = vadd.f32 %v1417_v42, %v841_v28 }
 0x136   : > { %1350 = vst [vmem:[%s2233_s24 + $0x48] sm:$0xff] %v1846_v17  ;;  %1366 = vst [vmem:[%s2233_s24 + $0xc8] sm:$0xff] %v1862_v47  ;;  %v1467_v14 = vmul.f32 %v845_v44, %v845_v44  ;;  %v1381_v47 = vadd.f32 %v1380_v24, %v839_v10  ;;  %v1519_v49 = vadd.f32 %v1518_v34, %v1465_v2 }
 0x137   : > { %v847_v55 = vpop.f32.mrf.mxu0  ;;  %v2406_v56 = vpop.f32.mrf.mxu1  ;;  %v1555_v26 = vadd.f32 %v1554_v45, %v1464_v41 }
 0x138   : > { %v1847_v58 = vpack.c.bf16 %v847_v55, %v845_v44  ;;  %v1863_v0 = vpack.c.bf16 %v2406_v56, %v2396_v48  ;;  %v1382_v54 = vadd.f32 %v1381_v47, %v845_v44  ;;  %v1520_v29 = vadd.f32 %v1519_v49, %v1467_v14 }
 0x139   : > { %v849_v63 = vpop.f32.mrf.mxu0  ;;  %v2416_v4 = vpop.f32.mrf.mxu1  ;;  %v1419_v62 = vadd.f32 %v1418_v52, %v847_v55  ;;  %v1556_v32 = vadd.f32 %v1555_v26, %v1466_v51 }
 0x13a   : > { %1351 = vst [vmem:[%s2233_s24 + $0x50] sm:$0xff] %v1847_v58  ;;  %1367 = vst [vmem:[%s2233_s24 + $0xd0] sm:$0xff] %v1863_v0  ;;  %v1469_v50 = vmul.f32 %v849_v63, %v849_v63  ;;  %v1468_v58 = vmul.f32 %v847_v55, %v847_v55  ;;  %v1383_v0 = vadd.f32 %v1382_v54, %v849_v63 }
 0x13b   : > { %v851_v8 = vpop.f32.mrf.mxu0  ;;  %v2424_v11 = vpop.f32.mrf.mxu1 }
 0x13c   : > { %v1848_v38 = vpack.c.bf16 %v851_v8, %v849_v63  ;;  %v1864_v36 = vpack.c.bf16 %v2424_v11, %v2416_v4  ;;  %v1521_v35 = vadd.f32 %v1520_v29, %v1469_v50  ;;  %v1470_v6 = vmul.f32 %v851_v8, %v851_v8 }
 0x13d   : > { %v855_v17 = vpop.f32.mrf.mxu0  ;;  %v2432_v40 = vpop.f32.mrf.mxu1  ;;  %v1420_v12 = vadd.f32 %v1419_v62, %v851_v8  ;;  %v1557_v24 = vadd.f32 %v1556_v32, %v1468_v58 }
 0x13e   : > { %1352 = vst [vmem:[%s2233_s24 + $0x58] sm:$0xff] %v1848_v38  ;;  %1368 = vst [vmem:[%s2233_s24 + $0xd8] sm:$0xff] %v1864_v36  ;;  %v1471_v5 = vmul.f32 %v855_v17, %v855_v17  ;;  %v1384_v2 = vadd.f32 %v1383_v0, %v855_v17  ;;  %v1479_v0 = vmul.f32 %v2226_v1, %v2226_v1 }
 0x13f   : > { %v857_v20 = vpop.f32.mrf.mxu0  ;;  %v2437_v23 = vpop.f32.mrf.mxu1  ;;  %v1558_v47 = vadd.f32 %v1557_v24, %v1470_v6 }
 0x140   : > { %v1849_v57 = vpack.c.bf16 %v857_v20, %v855_v17  ;;  %v1865_v59 = vpack.c.bf16 %v2437_v23, %v2432_v40  ;;  %v1472_v38 = vmul.f32 %v857_v20, %v857_v20  ;;  %v1522_v41 = vadd.f32 %v1521_v35, %v1471_v5 }
 0x141   : > { %v859_v61 = vpop.f32.mrf.mxu0  ;;  %v2441_v10 = vpop.f32.mrf.mxu1  ;;  %v1421_v14 = vadd.f32 %v1420_v12, %v857_v20 }
 0x142   : > { %1353 = vst [vmem:[%s2233_s24 + $0x60] sm:$0xff] %v1849_v57  ;;  %1369 = vst [vmem:[%s2233_s24 + $0xe0] sm:$0xff] %v1865_v59  ;;  %v1473_v18 = vmul.f32 %v859_v61, %v859_v61  ;;  %v1385_v36 = vadd.f32 %v1384_v2, %v859_v61  ;;  %v1559_v54 = vadd.f32 %v1558_v47, %v1472_v38 }
 0x143   : > { %v861_v28 = vpop.f32.mrf.mxu0  ;;  %v2445_v44 = vpop.f32.mrf.mxu1  ;;  %v1481_v38 = vmul.f32 %v2245_v7, %v2245_v7 }
 0x144   : > { %v1850_v22 = vpack.c.bf16 %v861_v28, %v859_v61  ;;  %v1866_v55 = vpack.c.bf16 %v2445_v44, %v2441_v10  ;;  %v1474_v8 = vmul.f32 %v861_v28, %v861_v28  ;;  %v1523_v49 = vadd.f32 %v1522_v41, %v1473_v18 }
 0x145   : > { %v865_v34 = vpop.f32.mrf.mxu0  ;;  %v2449_v63 = vpop.f32.mrf.mxu1  ;;  %v1422_v51 = vadd.f32 %v1421_v14, %v861_v28 }
 0x146   : > { %1354 = vst [vmem:[%s2233_s24 + $0x68] sm:$0xff] %v1850_v22  ;;  %v1475_v42 = vmul.f32 %v865_v34, %v865_v34  ;;  %1370 = vst [vmem:[%s2233_s24 + $0xe8] sm:$0xff] %v1866_v55  ;;  %v1386_v50 = vadd.f32 %v1385_v36, %v865_v34  ;;  %v1560_v5 = vadd.f32 %v1559_v54, %v1474_v8 }
 0x147   : > { %v867_v17 = vpop.f32.mrf.mxu0  ;;  %v2453_v45 = vpop.f32.mrf.mxu1  ;;  %v1483_v36 = vmul.f32 %v2259_v13, %v2259_v13 }
 0x148   : > { %v1851_v52 = vpack.c.bf16 %v867_v17, %v865_v34  ;;  %v1476_v57 = vmul.f32 %v867_v17, %v867_v17  ;;  %v1867_v20 = vpack.c.bf16 %v2453_v45, %v2449_v63  ;;  %v1524_v58 = vadd.f32 %v1523_v49, %v1475_v42 }
 0x149   : > { %v869_v26 = vpop.f32.mrf.mxu0  ;;  %v2457_v29 = vpop.f32.mrf.mxu1  ;;  %v1423_v61 = vadd.f32 %v1422_v51, %v867_v17  ;;  %v1485_v49 = vmul.f32 %v2273_v19, %v2273_v19 }
 0x14a   : > { %1355 = vst [vmem:[%s2233_s24 + $0x70] sm:$0xff] %v1851_v52  ;;  %v1387_v59 = vadd.f32 %v1386_v50, %v869_v26  ;;  %v1477_v62 = vmul.f32 %v869_v26, %v869_v26  ;;  %1371 = vst [vmem:[%s2233_s24 + $0xf0] sm:$0xff] %v1867_v20  ;;  %v1561_v18 = vadd.f32 %v1560_v5, %v1476_v57 }
 0x14b   : > { %v871_v32 = vpop.f32.mrf.mxu0  ;;  %v2463_v35 = vpop.f32.mrf.mxu1  ;;  %v1484_v52 = vmul.f32 %v2265_v15, %v2265_v15  ;;  %v1486_v20 = vmul.f32 %v2279_v21, %v2279_v21  ;;  %v1491_v5 = vmul.f32 %v2315_v37, %v2315_v37 }
 0x14c   : > { %v1388_v6 = vadd.f32 %v1387_v59, %v2226_v1  ;;  %v1525_v28 = vadd.f32 %v1524_v58, %v1477_v62  ;;  %v1852_v12 = vpack.c.bf16 %v871_v32, %v869_v26  ;;  %v1424_v2 = vadd.f32 %v1423_v61, %v871_v32 }
 0x14d   : > { %v1478_v22 = vmul.f32 %v871_v32, %v871_v32  ;;  %v1868_v24 = vpack.c.bf16 %v2463_v35, %v2457_v29  ;;  %v1480_v1 = vmul.f32 %v2237_v3, %v2237_v3  ;;  %v1488_v62 = vmul.f32 %v2293_v27, %v2293_v27 }
 0x14e   : > { %v1389_v34 = vadd.f32 %v1388_v6, %v2245_v7  ;;  %v1526_v55 = vadd.f32 %v1525_v28, %v1479_v0  ;;  %1356 = vst [vmem:[%s2233_s24 + $0x78] sm:$0xff] %v1852_v12  ;;  %v1425_v41 = vadd.f32 %v1424_v2, %v2237_v3  ;;  %v1482_v7 = vmul.f32 %v2251_v9, %v2251_v9 }
 0x14f   : > { %v1562_v14 = vadd.f32 %v1561_v18, %v1478_v22  ;;  %1372 = vst [vmem:[%s2233_s24 + $0xf8] sm:$0xff] %v1868_v24  ;;  %v1490_v6 = vmul.f32 %v2307_v33, %v2307_v33  ;;  %v1492_v18 = vmul.f32 %v2321_v39, %v2321_v39 }
 0x150   : > { %v1390_v42 = vadd.f32 %v1389_v34, %v2259_v13  ;;  %v1527_v47 = vadd.f32 %v1526_v55, %v1481_v38  ;;  %v1426_v8 = vadd.f32 %v1425_v41, %v2251_v9  ;;  %v1487_v13 = vmul.f32 %v2287_v25, %v2287_v25 }
 0x151   : > { %v1563_v17 = vadd.f32 %v1562_v14, %v1480_v1  ;;  %v1494_v34 = vmul.f32 %v2337_v46, %v2337_v46  ;;  %v1497_v41 = vmul.f32 %v2378_v16, %v2378_v16  ;;  %v1496_v14 = vmul.f32 %v2365_v60, %v2365_v60 }
 0x152   : > { %v1391_v51 = vadd.f32 %v1390_v42, %v2273_v19  ;;  %v1528_v3 = vadd.f32 %v1527_v47, %v1483_v36  ;;  %v1427_v50 = vadd.f32 %v1426_v8, %v2265_v15  ;;  %v1489_v19 = vmul.f32 %v2301_v31, %v2301_v31 }
 0x153   : > { %v1564_v54 = vadd.f32 %v1563_v17, %v1482_v7  ;;  %v1498_v8 = vmul.f32 %v2388_v30, %v2388_v30 }
 0x154   : > { %v1529_v57 = vadd.f32 %v1528_v3, %v1485_v49  ;;  %v1428_v26 = vadd.f32 %v1427_v50, %v2279_v21  ;;  %v1392_v9 = vadd.f32 %v1391_v51, %v2287_v25  ;;  %v1500_v3 = vmul.f32 %v2406_v56, %v2406_v56 }
 0x155   : > { %v1565_v58 = vadd.f32 %v1564_v54, %v1484_v52 }
 0x156   : > { %v1429_v61 = vadd.f32 %v1428_v26, %v2293_v27  ;;  %v1393_v15 = vadd.f32 %v1392_v9, %v2301_v31  ;;  %v1530_v59 = vadd.f32 %v1529_v57, %v1487_v13  ;;  %v1493_v31 = vmul.f32 %v2329_v43, %v2329_v43 }
 0x157   : > { %v1566_v0 = vadd.f32 %v1565_v58, %v1486_v20  ;;  %v1502_v13 = vmul.f32 %v2424_v11, %v2424_v11  ;;  %v1504_v20 = vmul.f32 %v2437_v23, %v2437_v23 }
 0x158   : > { %v1394_v25 = vadd.f32 %v1393_v15, %v2315_v37  ;;  %v1531_v32 = vadd.f32 %v1530_v59, %v1489_v19  ;;  %v1430_v21 = vadd.f32 %v1429_v61, %v2307_v33  ;;  %v1495_v37 = vmul.f32 %v2351_v53, %v2351_v53 }
 0x159   : > { %v1567_v28 = vadd.f32 %v1566_v0, %v1488_v62  ;;  %v1506_v15 = vmul.f32 %v2445_v44, %v2445_v44 }
 0x15a   : > { %v1395_v12 = vadd.f32 %v1394_v25, %v2329_v43  ;;  %v1532_v2 = vadd.f32 %v1531_v32, %v1491_v5  ;;  %v1431_v27 = vadd.f32 %v1430_v21, %v2321_v39  ;;  %v1508_v5 = vmul.f32 %v2453_v45, %v2453_v45 }
 0x15b   : > { %v1568_v22 = vadd.f32 %v1567_v28, %v1490_v6 }
 0x15c   : > { %v1396_v24 = vadd.f32 %v1395_v12, %v2351_v53  ;;  %v1533_v38 = vadd.f32 %v1532_v2, %v1493_v31  ;;  %v1432_v33 = vadd.f32 %v1431_v27, %v2337_v46  ;;  %v1499_v46 = vmul.f32 %v2396_v48, %v2396_v48 }
 0x15d   : > { %v1569_v55 = vadd.f32 %v1568_v22, %v1492_v18 }
 0x15e   : > { %v1397_v43 = vadd.f32 %v1396_v24, %v2378_v16  ;;  %v1534_v1 = vadd.f32 %v1533_v38, %v1495_v37  ;;  %v1433_v39 = vadd.f32 %v1432_v33, %v2365_v60  ;;  %v1501_v60 = vmul.f32 %v2416_v4, %v2416_v4 }
 0x15f   : > { %v1570_v36 = vadd.f32 %v1569_v55, %v1494_v34 }
 0x160   : > { %v1535_v53 = vadd.f32 %v1534_v1, %v1497_v41  ;;  %v1434_v42 = vadd.f32 %v1433_v39, %v2388_v30  ;;  %v1398_v47 = vadd.f32 %v1397_v43, %v2396_v48  ;;  %v1503_v30 = vmul.f32 %v2432_v40, %v2432_v40 }
 0x161   : > { %v1571_v7 = vadd.f32 %v1570_v36, %v1496_v14 }
 0x162   : > { %v1536_v16 = vadd.f32 %v1535_v53, %v1499_v46  ;;  %v1435_v17 = vadd.f32 %v1434_v42, %v2406_v56  ;;  %v1399_v49 = vadd.f32 %v1398_v47, %v2416_v4  ;;  %v1505_v56 = vmul.f32 %v2441_v10, %v2441_v10 }
 0x163   : > { %v1572_v51 = vadd.f32 %v1571_v7, %v1498_v8 }
 0x164   : > { %v1537_v50 = vadd.f32 %v1536_v16, %v1501_v60  ;;  %v1436_v52 = vadd.f32 %v1435_v17, %v2424_v11  ;;  %v1400_v48 = vadd.f32 %v1399_v49, %v2432_v40  ;;  %v1507_v11 = vmul.f32 %v2449_v63, %v2449_v63 }
 0x165   : > { %v1573_v54 = vadd.f32 %v1572_v51, %v1500_v3 }
 0x166   : > { %v1538_v57 = vadd.f32 %v1537_v50, %v1503_v30  ;;  %v1437_v26 = vadd.f32 %v1436_v52, %v2437_v23  ;;  %v1401_v4 = vadd.f32 %v1400_v48, %v2441_v10  ;;  %v1509_v23 = vmul.f32 %v2457_v29, %v2457_v29 }
 0x167   : > { %v1574_v9 = vadd.f32 %v1573_v54, %v1502_v13 }
 0x168   : > { %v1539_v58 = vadd.f32 %v1538_v57, %v1505_v56  ;;  %v1438_v19 = vadd.f32 %v1437_v26, %v2445_v44  ;;  %v1402_v40 = vadd.f32 %v1401_v4, %v2449_v63  ;;  %v1510_v44 = vmul.f32 %v2463_v35, %v2463_v35 }
 0x169   : > { %v1575_v61 = vadd.f32 %v1574_v9, %v1504_v20 }
 0x16a   : > { %v1540_v59 = vadd.f32 %v1539_v58, %v1507_v11  ;;  %v1439_v62 = vadd.f32 %v1438_v19, %v2453_v45  ;;  %v1403_v10 = vadd.f32 %v1402_v40, %v2457_v29 }
 0x16b   : > { %v1576_v0 = vadd.f32 %v1575_v61, %v1506_v15 }
 0x16c   : > { %v1404_v25 = vrot.slane %v1403_v10, 4  ;;  %v1541_v32 = vadd.f32 %v1540_v59, %v1509_v23  ;;  %v1440_v63 = vadd.f32 %v1439_v62, %v2463_v35 }
 0x16d   : > { %v1577_v21 = vadd.f32 %v1576_v0, %v1508_v5 }
 0x16e   : > { %v1405_v6 = vadd.f32 %v1404_v25, %v1403_v10  ;;  %v1542_v28 = vrot.slane %v1541_v32, 4  ;;  %v1441_v31 = vrot.slane %v1440_v63, 4 }
 0x16f   : > { %v1578_v12 = vadd.f32 %v1577_v21, %v1510_v44 }
 0x170   : > { %v1406_v2 = vrot.slane %v1405_v6, 2  ;;  %v1543_v29 = vadd.f32 %v1542_v28, %v1541_v32  ;;  %v1442_v27 = vadd.f32 %v1441_v31, %v1440_v63 }
 0x171   : > { %v1579_v18 = vrot.slane %v1578_v12, 4 }
 0x172   : > { %v1407_v22 = vadd.f32 %v1406_v2, %v1405_v6  ;;  %v1544_v45 = vrot.slane %v1543_v29, 2  ;;  %v1443_v37 = vrot.slane %v1442_v27, 2 }
 0x173   : > { %v1580_v24 = vadd.f32 %v1579_v18, %v1578_v12 }
 0x174   : > { %v1408_v38 = vrot.slane %v1407_v22, 1  ;;  %v1545_v33 = vadd.f32 %v1544_v45, %v1543_v29  ;;  %v1444_v34 = vadd.f32 %v1443_v37, %v1442_v27 }
 0x175   : > { %v1581_v55 = vrot.slane %v1580_v24, 2 }
 0x176   : > { %v1546_v43 = vrot.slane %v1545_v33, 1  ;;  %v1445_v35 = vrot.slane %v1444_v34, 1  ;;  %v1409_v1 = vadd.f32 %v1408_v38, %v1407_v22 }
 0x177   : > { %v1582_v41 = vadd.f32 %v1581_v55, %v1580_v24 }
 0x178   : > { %v1547_v39 = vadd.f32 %v1546_v43, %v1545_v33  ;;  %v1446_v53 = vadd.f32 %v1445_v35, %v1444_v34 }
 0x179   : > { %v1583_v14 = vrot.slane %v1582_v41, 1 }
 0x17a   : > { %v1586_v36 = vsel %vm1585_vm0, %v1409_v1, %v1547_v39 }
 0x17b   : > { %v1584_v42 = vadd.f32 %v1583_v14, %v1582_v41 }
 0x17d   : > { %v1587_v47 = vsel %vm1585_vm0, %v1446_v53, %v1584_v42 }
 0x17e   : > { %v1590_v46 = vcombine.low %v1586_v36, %v1587_v47 }
 0x180   : > { %1831 = vst.sshfl [vmem:[%s244_s25] sm:$0x33 pattern:$0x76325410] %v1590_v46 }
 0x181 PF: > { %s14_s14 = sadd.s32 1, %s2043_s14   ;;  %s2581_s12 = smov %s2039_s13 }
 0x182   : > { %p11_p6 = scmp.ge.s32.totalorder %s14_s14, 4   ;;  %s2582_s13 = smov %s2584_s15 }
 0x184   :  { %13 = sbr.rel (!%p11_p6) target bundleno = 2 (0x2), region = 81 }

// kernel: deeperlab_seg_head_forward.7
= control target key start
LH: loop header
LB: loop body
LE: loop exit
PB: predicated region body
PF: predicated region fallthrough
CT: control target
= control target key end

     0   :  { %s3333_s9 = smov 0   ;;  %s3814_s0 = inlined_call_operand.vmem [shape: f32[64,16], index: 0, kind: input, shape index: {}]   ;;  %s3815_s1 = inlined_call_operand.vmem [shape: f32[128,16,128], index: 1, kind: input, shape index: {}]   ;;  %s3816_s2 = inlined_call_operand.vmem [shape: f32[128,64,128], index: 2, kind: output, shape index: {}]  }
   0x1 LB: > { %s2593_s10 = sadd.s32 4294967295, %s3316_s9   ;;  %p2597_p0 = scmp.ge.s32.totalorder %s3316_s9, 1  ;;  %s3316_s9 = sphi %s3333_s9, %s12_s9  }
   0x2   : > { %p114_p1 = scmp.lt.s32.totalorder %s3316_s9, 9 }
   0x4   : > { %p115_p2 = pnand %p2597_p0, %p114_p1 }
   0x5   : > { %s2598_s11 = sshll.u32 (!%p115_p2), %s2593_s10, 4 }
   0x6   : > { %118 = sbr.rel (%p115_p2) target bundleno = 339 (0x153), region = 28  ;;  %p139_p3 = scmp.lt.s32.totalorder (!%p115_p2), %s2598_s11, 127 }
   0xb   : > { %v3344_v0 = vld [vmem:[%s3814_s0] sm:$0xff]  ;;  %vm162_vm0 = vcmask 130048   ;;  %s3818_s11 = smov (!%p139_p3, %s2598_s11), 127  ;;  %v3365_v5 = vld [vmem:[%s3814_s0 + $0x8] sm:$0xff]  ;;  %v3376_v8 = vld [vmem:[%s3814_s0 + $0x10] sm:$0xff] }
   0xc   : > { %3050 = vmatprep.mubr.msk.f32.mxu0 %vm162_vm0, %v3344_v0  ;;  %3066 = vmatprep.mubr.msk.f32.mxu1 %vm162_vm0, %v3344_v0  ;;  %s2884_s14 = sshll.u32 %s3818_s11, 4  ;;  %v3381_v9 = vld [vmem:[%s3814_s0 + $0x18] sm:$0xff]  ;;  %v3386_v10 = vld [vmem:[%s3814_s0 + $0x20] sm:$0xff]  ;;  %v3405_v13 = vld [vmem:[%s3814_s0 + $0x28] sm:$0xff]  ;;  %s2885_s4 = sshll.u32 %s3818_s11, 6 }
   0xd   : > { %s3356_s17 = scalar_lea.vmem %s3815_s1, %s2884_s14  ;;  %v3410_v14 = vld [vmem:[%s3814_s0 + $0x30] sm:$0xff]  ;;  %v3425_v17 = vld [vmem:[%s3814_s0 + $0x38] sm:$0xff]  ;;  %s3681_s7 = scalar_lea.vmem %s3816_s2, %s2885_s4 }
   0xe   : > { %v161_v1 = vld [vmem:[%s3356_s17 + $0x8] sm:$0xff]  ;;  %v2613_v2 = vld [vmem:[%s3356_s17 + $0x18] sm:$0xff]  ;;  %v160_v3 = vld [vmem:[%s3356_s17] sm:$0xff] }
   0xf   : > { %3046 = vmatprep.subr.mxu0 %v161_v1  ;;  %3062 = vmatprep.subr.mxu1 %v2613_v2  ;;  %v2612_v4 = vld [vmem:[%s3356_s17 + $0x10] sm:$0xff]  ;;  %v2631_v6 = vld [vmem:[%s3356_s17 + $0x28] sm:$0xff]  ;;  %v2649_v7 = vld [vmem:[%s3356_s17 + $0x38] sm:$0xff] }
  0x10   : > { %3047 = vmatpush3.msra.mxu0 %v161_v1  ;;  %3063 = vmatpush3.msra.mxu1 %v2613_v2  ;;  %v2630_v11 = vld [vmem:[%s3356_s17 + $0x20] sm:$0xff]  ;;  %v2648_v12 = vld [vmem:[%s3356_s17 + $0x30] sm:$0xff]  ;;  %v2667_v15 = vld [vmem:[%s3356_s17 + $0x48] sm:$0xff] }
  0x11   : > { %3048 = vmatprep.subr.mxu0 %v160_v3  ;;  %3064 = vmatprep.subr.mxu1 %v2612_v4  ;;  %v2685_v16 = vld [vmem:[%s3356_s17 + $0x58] sm:$0xff]  ;;  %v2666_v18 = vld [vmem:[%s3356_s17 + $0x40] sm:$0xff]  ;;  %v2684_v19 = vld [vmem:[%s3356_s17 + $0x50] sm:$0xff] }
  0x12   : > { %3049 = vmatpush3.msra.mxu0 %v160_v3  ;;  %3065 = vmatpush3.msra.mxu1 %v2612_v4  ;;  %v2703_v20 = vld [vmem:[%s3356_s17 + $0x68] sm:$0xff]  ;;  %v2721_v21 = vld [vmem:[%s3356_s17 + $0x78] sm:$0xff]  ;;  %v2702_v22 = vld [vmem:[%s3356_s17 + $0x60] sm:$0xff] }
  0x13   : > { %3051 = vmatmul.mubr.msk.f32.vlgmr.msra.gmra.mxu0 %vm162_vm0, %v3365_v5  ;;  %3067 = vmatmul.mubr.msk.f32.vlgmr.msra.gmra.mxu1 %vm162_vm0, %v3365_v5  ;;  %v2720_v23 = vld [vmem:[%s3356_s17 + $0x70] sm:$0xff]  ;;  %v2739_v24 = vld [vmem:[%s3356_s17 + $0x88] sm:$0xff]  ;;  %v2757_v25 = vld [vmem:[%s3356_s17 + $0x98] sm:$0xff] }
  0x14   : > { %3078 = vmatprep.subr.mxu0 %v2631_v6  ;;  %3094 = vmatprep.subr.mxu1 %v2649_v7  ;;  %v2738_v26 = vld [vmem:[%s3356_s17 + $0x80] sm:$0xff]  ;;  %v2756_v27 = vld [vmem:[%s3356_s17 + $0x90] sm:$0xff]  ;;  %v2775_v28 = vld [vmem:[%s3356_s17 + $0xa8] sm:$0xff] }
  0x15   : > { %3079 = vmatpush3.msra.mxu0 %v2631_v6  ;;  %3095 = vmatpush3.msra.mxu1 %v2649_v7  ;;  %v2793_v29 = vld [vmem:[%s3356_s17 + $0xb8] sm:$0xff]  ;;  %v2774_v30 = vld [vmem:[%s3356_s17 + $0xa0] sm:$0xff]  ;;  %v2792_v31 = vld [vmem:[%s3356_s17 + $0xb0] sm:$0xff] }
  0x16   : > { %3053 = vmatprep.mubr.msk.f32.mxu0 %vm162_vm0, %v3376_v8  ;;  %3069 = vmatprep.mubr.msk.f32.mxu1 %vm162_vm0, %v3376_v8  ;;  %v2811_v32 = vld [vmem:[%s3356_s17 + $0xc8] sm:$0xff]  ;;  %v2829_v33 = vld [vmem:[%s3356_s17 + $0xd8] sm:$0xff]  ;;  %v2810_v34 = vld [vmem:[%s3356_s17 + $0xc0] sm:$0xff] }
  0x17   : > { %3054 = vmatmul.mubr.msk.f32.gmra.mxu0 %vm162_vm0, %v3381_v9  ;;  %3070 = vmatmul.mubr.msk.f32.gmra.mxu1 %vm162_vm0, %v3381_v9  ;;  %v2828_v35 = vld [vmem:[%s3356_s17 + $0xd0] sm:$0xff]  ;;  %v2847_v36 = vld [vmem:[%s3356_s17 + $0xe8] sm:$0xff]  ;;  %v2865_v37 = vld [vmem:[%s3356_s17 + $0xf8] sm:$0xff] }
  0x18   : > { %3056 = vmatprep.mubr.msk.f32.mxu0 %vm162_vm0, %v3386_v10  ;;  %3072 = vmatprep.mubr.msk.f32.mxu1 %vm162_vm0, %v3386_v10  ;;  %v2846_v38 = vld [vmem:[%s3356_s17 + $0xe0] sm:$0xff]  ;;  %v2864_v39 = vld [vmem:[%s3356_s17 + $0xf0] sm:$0xff] }
  0x19   : > { %3080 = vmatprep.subr.mxu0 %v2630_v11  ;;  %3096 = vmatprep.subr.mxu1 %v2648_v12 }
  0x1a   : > { %3081 = vmatpush3.msra.mxu0 %v2630_v11  ;;  %3097 = vmatpush3.msra.mxu1 %v2648_v12 }
  0x1b   : > { %3057 = vmatmul.mubr.msk.f32.gmra.mxu0 %vm162_vm0, %v3405_v13  ;;  %3073 = vmatmul.mubr.msk.f32.gmra.mxu1 %vm162_vm0, %v3405_v13 }
  0x1c   : > { %3059 = vmatprep.mubr.msk.f32.mxu0 %vm162_vm0, %v3410_v14  ;;  %3075 = vmatprep.mubr.msk.f32.mxu1 %vm162_vm0, %v3410_v14 }
  0x1d   : > { %3110 = vmatprep.subr.mxu0 %v2667_v15  ;;  %3126 = vmatprep.subr.mxu1 %v2685_v16 }
  0x1f   : > { %3060 = vmatmul.mubr.msk.f32.gmra.mxu0 %vm162_vm0, %v3425_v17  ;;  %3076 = vmatmul.mubr.msk.f32.gmra.mxu1 %vm162_vm0, %v3425_v17 }
  0x20   : > { %3082 = vmatprep.mubr.msk.f32.mxu0 %vm162_vm0, %v3344_v0  ;;  %3098 = vmatprep.mubr.msk.f32.mxu1 %vm162_vm0, %v3344_v0 }
  0x23   : > { %3083 = vmatmul.mubr.msk.f32.vlgmr.msra.gmra.mxu0 %vm162_vm0, %v3365_v5  ;;  %3099 = vmatmul.mubr.msk.f32.vlgmr.msra.gmra.mxu1 %vm162_vm0, %v3365_v5 }
  0x24   : > { %3111 = vmatpush3.msra.mxu0 %v2667_v15  ;;  %3127 = vmatpush3.msra.mxu1 %v2685_v16 }
  0x25   : > { %3085 = vmatprep.mubr.msk.f32.mxu0 %vm162_vm0, %v3376_v8  ;;  %3101 = vmatprep.mubr.msk.f32.mxu1 %vm162_vm0, %v3376_v8 }
  0x26   : > { %3112 = vmatprep.subr.mxu0 %v2666_v18  ;;  %3128 = vmatprep.subr.mxu1 %v2684_v19 }
  0x27   : > { %3086 = vmatmul.mubr.msk.f32.gmra.mxu0 %vm162_vm0, %v3381_v9  ;;  %3102 = vmatmul.mubr.msk.f32.gmra.mxu1 %vm162_vm0, %v3381_v9 }
  0x28   : > { %3088 = vmatprep.mubr.msk.f32.mxu0 %vm162_vm0, %v3386_v10  ;;  %3104 = vmatprep.mubr.msk.f32.mxu1 %vm162_vm0, %v3386_v10 }
  0x29   : > { %3113 = vmatpush3.msra.mxu0 %v2666_v18  ;;  %3129 = vmatpush3.msra.mxu1 %v2684_v19 }
  0x2a   : > { %3142 = vmatprep.subr.mxu0 %v2703_v20  ;;  %3158 = vmatprep.subr.mxu1 %v2721_v21 }
  0x2b   : > { %3089 = vmatmul.mubr.msk.f32.gmra.mxu0 %vm162_vm0, %v3405_v13  ;;  %3105 = vmatmul.mubr.msk.f32.gmra.mxu1 %vm162_vm0, %v3405_v13 }
  0x2c   : > { %3091 = vmatprep.mubr.msk.f32.mxu0 %vm162_vm0, %v3410_v14  ;;  %3107 = vmatprep.mubr.msk.f32.mxu1 %vm162_vm0, %v3410_v14 }
  0x2f   : > { %3092 = vmatmul.mubr.msk.f32.gmra.mxu0 %vm162_vm0, %v3425_v17  ;;  %3108 = vmatmul.mubr.msk.f32.gmra.mxu1 %vm162_vm0, %v3425_v17 }
  0x30   : > { %3114 = vmatprep.mubr.msk.f32.mxu0 %vm162_vm0, %v3344_v0  ;;  %3130 = vmatprep.mubr.msk.f32.mxu1 %vm162_vm0, %v3344_v0 }
  0x33   : > { %3115 = vmatmul.mubr.msk.f32.vlgmr.msra.gmra.mxu0 %vm162_vm0, %v3365_v5  ;;  %3131 = vmatmul.mubr.msk.f32.vlgmr.msra.gmra.mxu1 %vm162_vm0, %v3365_v5 }
  0x34   : > { %3143 = vmatpush3.msra.mxu0 %v2703_v20  ;;  %3159 = vmatpush3.msra.mxu1 %v2721_v21 }
  0x35   : > { %3117 = vmatprep.mubr.msk.f32.mxu0 %vm162_vm0, %v3376_v8  ;;  %3133 = vmatprep.mubr.msk.f32.mxu1 %vm162_vm0, %v3376_v8 }
  0x36   : > { %3144 = vmatprep.subr.mxu0 %v2702_v22  ;;  %3160 = vmatprep.subr.mxu1 %v2720_v23 }
  0x37   : > { %3118 = vmatmul.mubr.msk.f32.gmra.mxu0 %vm162_vm0, %v3381_v9  ;;  %3134 = vmatmul.mubr.msk.f32.gmra.mxu1 %vm162_vm0, %v3381_v9 }
  0x38   : > { %3120 = vmatprep.mubr.msk.f32.mxu0 %vm162_vm0, %v3386_v10  ;;  %3136 = vmatprep.mubr.msk.f32.mxu1 %vm162_vm0, %v3386_v10 }
  0x39   : > { %3145 = vmatpush3.msra.mxu0 %v2702_v22  ;;  %3161 = vmatpush3.msra.mxu1 %v2720_v23 }
  0x3a   : > { %3174 = vmatprep.subr.mxu0 %v2739_v24  ;;  %3190 = vmatprep.subr.mxu1 %v2757_v25 }
  0x3b   : > { %3121 = vmatmul.mubr.msk.f32.gmra.mxu0 %vm162_vm0, %v3405_v13  ;;  %3137 = vmatmul.mubr.msk.f32.gmra.mxu1 %vm162_vm0, %v3405_v13 }
  0x3c   : > { %3123 = vmatprep.mubr.msk.f32.mxu0 %vm162_vm0, %v3410_v14  ;;  %3139 = vmatprep.mubr.msk.f32.mxu1 %vm162_vm0, %v3410_v14 }
  0x3f   : > { %3124 = vmatmul.mubr.msk.f32.gmra.mxu0 %vm162_vm0, %v3425_v17  ;;  %3140 = vmatmul.mubr.msk.f32.gmra.mxu1 %vm162_vm0, %v3425_v17 }
  0x40   : > { %3146 = vmatprep.mubr.msk.f32.mxu0 %vm162_vm0, %v3344_v0  ;;  %3162 = vmatprep.mubr.msk.f32.mxu1 %vm162_vm0, %v3344_v0 }
  0x43   : > { %3147 = vmatmul.mubr.msk.f32.vlgmr.msra.gmra.mxu0 %vm162_vm0, %v3365_v5  ;;  %3163 = vmatmul.mubr.msk.f32.vlgmr.msra.gmra.mxu1 %vm162_vm0, %v3365_v5 }
  0x44   : > { %3175 = vmatpush3.msra.mxu0 %v2739_v24  ;;  %3191 = vmatpush3.msra.mxu1 %v2757_v25 }
  0x45   : > { %3149 = vmatprep.mubr.msk.f32.mxu0 %vm162_vm0, %v3376_v8  ;;  %3165 = vmatprep.mubr.msk.f32.mxu1 %vm162_vm0, %v3376_v8 }
  0x46   : > { %3176 = vmatprep.subr.mxu0 %v2738_v26  ;;  %3192 = vmatprep.subr.mxu1 %v2756_v27 }
  0x47   : > { %3150 = vmatmul.mubr.msk.f32.gmra.mxu0 %vm162_vm0, %v3381_v9  ;;  %3166 = vmatmul.mubr.msk.f32.gmra.mxu1 %vm162_vm0, %v3381_v9 }
  0x48   : > { %3152 = vmatprep.mubr.msk.f32.mxu0 %vm162_vm0, %v3386_v10  ;;  %3168 = vmatprep.mubr.msk.f32.mxu1 %vm162_vm0, %v3386_v10 }
  0x49   : > { %3177 = vmatpush3.msra.mxu0 %v2738_v26  ;;  %3193 = vmatpush3.msra.mxu1 %v2756_v27 }
  0x4a   : > { %3206 = vmatprep.subr.mxu0 %v2775_v28  ;;  %3222 = vmatprep.subr.mxu1 %v2793_v29 }
  0x4b   : > { %3153 = vmatmul.mubr.msk.f32.gmra.mxu0 %vm162_vm0, %v3405_v13  ;;  %3169 = vmatmul.mubr.msk.f32.gmra.mxu1 %vm162_vm0, %v3405_v13 }
  0x4c   : > { %3155 = vmatprep.mubr.msk.f32.mxu0 %vm162_vm0, %v3410_v14  ;;  %3171 = vmatprep.mubr.msk.f32.mxu1 %vm162_vm0, %v3410_v14 }
  0x4f   : > { %3156 = vmatmul.mubr.msk.f32.gmra.mxu0 %vm162_vm0, %v3425_v17  ;;  %3172 = vmatmul.mubr.msk.f32.gmra.mxu1 %vm162_vm0, %v3425_v17 }
  0x50   : > { %3178 = vmatprep.mubr.msk.f32.mxu0 %vm162_vm0, %v3344_v0  ;;  %3194 = vmatprep.mubr.msk.f32.mxu1 %vm162_vm0, %v3344_v0 }
  0x53   : > { %3179 = vmatmul.mubr.msk.f32.vlgmr.msra.gmra.mxu0 %vm162_vm0, %v3365_v5  ;;  %3195 = vmatmul.mubr.msk.f32.vlgmr.msra.gmra.mxu1 %vm162_vm0, %v3365_v5 }
  0x54   : > { %3207 = vmatpush3.msra.mxu0 %v2775_v28  ;;  %3223 = vmatpush3.msra.mxu1 %v2793_v29 }
  0x55   : > { %3181 = vmatprep.mubr.msk.f32.mxu0 %vm162_vm0, %v3376_v8  ;;  %3197 = vmatprep.mubr.msk.f32.mxu1 %vm162_vm0, %v3376_v8 }
  0x56   : > { %3208 = vmatprep.subr.mxu0 %v2774_v30  ;;  %3224 = vmatprep.subr.mxu1 %v2792_v31 }
  0x57   : > { %3182 = vmatmul.mubr.msk.f32.gmra.mxu0 %vm162_vm0, %v3381_v9  ;;  %3198 = vmatmul.mubr.msk.f32.gmra.mxu1 %vm162_vm0, %v3381_v9 }
  0x58   : > { %3184 = vmatprep.mubr.msk.f32.mxu0 %vm162_vm0, %v3386_v10  ;;  %3200 = vmatprep.mubr.msk.f32.mxu1 %vm162_vm0, %v3386_v10 }
  0x59   : > { %3209 = vmatpush3.msra.mxu0 %v2774_v30  ;;  %3225 = vmatpush3.msra.mxu1 %v2792_v31 }
  0x5a   : > { %3238 = vmatprep.subr.mxu0 %v2811_v32  ;;  %3254 = vmatprep.subr.mxu1 %v2829_v33 }
  0x5b   : > { %3185 = vmatmul.mubr.msk.f32.gmra.mxu0 %vm162_vm0, %v3405_v13  ;;  %3201 = vmatmul.mubr.msk.f32.gmra.mxu1 %vm162_vm0, %v3405_v13 }
  0x5c   : > { %3187 = vmatprep.mubr.msk.f32.mxu0 %vm162_vm0, %v3410_v14  ;;  %3203 = vmatprep.mubr.msk.f32.mxu1 %vm162_vm0, %v3410_v14 }
  0x5f   : > { %3188 = vmatmul.mubr.msk.f32.gmra.mxu0 %vm162_vm0, %v3425_v17  ;;  %3204 = vmatmul.mubr.msk.f32.gmra.mxu1 %vm162_vm0, %v3425_v17 }
  0x60   : > { %3210 = vmatprep.mubr.msk.f32.mxu0 %vm162_vm0, %v3344_v0  ;;  %3226 = vmatprep.mubr.msk.f32.mxu1 %vm162_vm0, %v3344_v0 }
  0x63   : > { %3211 = vmatmul.mubr.msk.f32.vlgmr.msra.gmra.mxu0 %vm162_vm0, %v3365_v5  ;;  %3227 = vmatmul.mubr.msk.f32.vlgmr.msra.gmra.mxu1 %vm162_vm0, %v3365_v5 }
  0x64   : > { %3239 = vmatpush3.msra.mxu0 %v2811_v32  ;;  %3255 = vmatpush3.msra.mxu1 %v2829_v33 }
  0x65   : > { %3213 = vmatprep.mubr.msk.f32.mxu0 %vm162_vm0, %v3376_v8  ;;  %3229 = vmatprep.mubr.msk.f32.mxu1 %vm162_vm0, %v3376_v8 }
  0x66   : > { %3240 = vmatprep.subr.mxu0 %v2810_v34  ;;  %3256 = vmatprep.subr.mxu1 %v2828_v35 }
  0x67   : > { %3214 = vmatmul.mubr.msk.f32.gmra.mxu0 %vm162_vm0, %v3381_v9  ;;  %3230 = vmatmul.mubr.msk.f32.gmra.mxu1 %vm162_vm0, %v3381_v9 }
  0x68   : > { %3216 = vmatprep.mubr.msk.f32.mxu0 %vm162_vm0, %v3386_v10  ;;  %3232 = vmatprep.mubr.msk.f32.mxu1 %vm162_vm0, %v3386_v10 }
  0x69   : > { %3241 = vmatpush3.msra.mxu0 %v2810_v34  ;;  %3257 = vmatpush3.msra.mxu1 %v2828_v35 }
  0x6a   : > { %3270 = vmatprep.subr.mxu0 %v2847_v36  ;;  %3286 = vmatprep.subr.mxu1 %v2865_v37 }
  0x6b   : > { %3217 = vmatmul.mubr.msk.f32.gmra.mxu0 %vm162_vm0, %v3405_v13  ;;  %3233 = vmatmul.mubr.msk.f32.gmra.mxu1 %vm162_vm0, %v3405_v13 }
  0x6c   : > { %3219 = vmatprep.mubr.msk.f32.mxu0 %vm162_vm0, %v3410_v14  ;;  %3235 = vmatprep.mubr.msk.f32.mxu1 %vm162_vm0, %v3410_v14 }
  0x6f   : > { %3220 = vmatmul.mubr.msk.f32.gmra.mxu0 %vm162_vm0, %v3425_v17  ;;  %3236 = vmatmul.mubr.msk.f32.gmra.mxu1 %vm162_vm0, %v3425_v17 }
  0x70   : > { %3242 = vmatprep.mubr.msk.f32.mxu0 %vm162_vm0, %v3344_v0  ;;  %3258 = vmatprep.mubr.msk.f32.mxu1 %vm162_vm0, %v3344_v0 }
  0x73   : > { %3243 = vmatmul.mubr.msk.f32.vlgmr.msra.gmra.mxu0 %vm162_vm0, %v3365_v5  ;;  %3259 = vmatmul.mubr.msk.f32.vlgmr.msra.gmra.mxu1 %vm162_vm0, %v3365_v5 }
  0x74   : > { %3271 = vmatpush3.msra.mxu0 %v2847_v36  ;;  %3287 = vmatpush3.msra.mxu1 %v2865_v37 }
  0x75   : > { %3245 = vmatprep.mubr.msk.f32.mxu0 %vm162_vm0, %v3376_v8  ;;  %3261 = vmatprep.mubr.msk.f32.mxu1 %vm162_vm0, %v3376_v8 }
  0x76   : > { %3272 = vmatprep.subr.mxu0 %v2846_v38  ;;  %3288 = vmatprep.subr.mxu1 %v2864_v39 }
  0x77   : > { %3246 = vmatmul.mubr.msk.f32.gmra.mxu0 %vm162_vm0, %v3381_v9  ;;  %3262 = vmatmul.mubr.msk.f32.gmra.mxu1 %vm162_vm0, %v3381_v9 }
  0x78   : > { %3248 = vmatprep.mubr.msk.f32.mxu0 %vm162_vm0, %v3386_v10  ;;  %3264 = vmatprep.mubr.msk.f32.mxu1 %vm162_vm0, %v3386_v10 }
  0x79   : > { %3273 = vmatpush3.msra.mxu0 %v2846_v38  ;;  %3289 = vmatpush3.msra.mxu1 %v2864_v39 }
  0x7b   : > { %3249 = vmatmul.mubr.msk.f32.gmra.mxu0 %vm162_vm0, %v3405_v13  ;;  %3265 = vmatmul.mubr.msk.f32.gmra.mxu1 %vm162_vm0, %v3405_v13 }
  0x7c   : > { %3251 = vmatprep.mubr.msk.f32.mxu0 %vm162_vm0, %v3410_v14  ;;  %3267 = vmatprep.mubr.msk.f32.mxu1 %vm162_vm0, %v3410_v14 }
  0x7f   : > { %3252 = vmatmul.mubr.msk.f32.gmra.mxu0 %vm162_vm0, %v3425_v17  ;;  %3268 = vmatmul.mubr.msk.f32.gmra.mxu1 %vm162_vm0, %v3425_v17 }
  0x80   : > { %3274 = vmatprep.mubr.msk.f32.mxu0 %vm162_vm0, %v3344_v0  ;;  %3290 = vmatprep.mubr.msk.f32.mxu1 %vm162_vm0, %v3344_v0 }
  0x83   : > { %3275 = vmatmul.mubr.msk.f32.vlgmr.msra.gmra.mxu0 %vm162_vm0, %v3365_v5  ;;  %3291 = vmatmul.mubr.msk.f32.vlgmr.msra.gmra.mxu1 %vm162_vm0, %v3365_v5 }
  0x84   : > { %3277 = vmatprep.mubr.msk.f32.mxu0 %vm162_vm0, %v3376_v8  ;;  %3293 = vmatprep.mubr.msk.f32.mxu1 %vm162_vm0, %v3376_v8 }
  0x87   : > { %3278 = vmatmul.mubr.msk.f32.gmra.mxu0 %vm162_vm0, %v3381_v9  ;;  %3294 = vmatmul.mubr.msk.f32.gmra.mxu1 %vm162_vm0, %v3381_v9 }
  0x88   : > { %3280 = vmatprep.mubr.msk.f32.mxu0 %vm162_vm0, %v3386_v10  ;;  %3296 = vmatprep.mubr.msk.f32.mxu1 %vm162_vm0, %v3386_v10 }
  0x8b   : > { %3281 = vmatmul.mubr.msk.f32.gmra.mxu0 %vm162_vm0, %v3405_v13  ;;  %3297 = vmatmul.mubr.msk.f32.gmra.mxu1 %vm162_vm0, %v3405_v13 }
  0x8c   : > { %3283 = vmatprep.mubr.msk.f32.mxu0 %vm162_vm0, %v3410_v14  ;;  %3299 = vmatprep.mubr.msk.f32.mxu1 %vm162_vm0, %v3410_v14 }
  0x8f   : > { %3284 = vmatmul.mubr.msk.f32.gmra.mxu0 %vm162_vm0, %v3425_v17  ;;  %3300 = vmatmul.mubr.msk.f32.gmra.mxu1 %vm162_vm0, %v3425_v17 }
  0xd3   : > { %v3052_v40 = vpop.f32.mrf.mxu0  ;;  %v3068_v41 = vpop.f32.mrf.mxu1 }
  0xd4   : > { %293 = vst [vmem:[%s3681_s7 + $0x8] sm:$0xff] %v3052_v40  ;;  %2623 = vst [vmem:[%s3681_s7 + $0x48] sm:$0xff] %v3068_v41 }
  0xd5   : > { %v253_v42 = vpop.f32.mrf.mxu0  ;;  %v401_v43 = vpop.f32.mrf.mxu1 }
  0xd6   : > { %292 = vst [vmem:[%s3681_s7] sm:$0xff] %v253_v42  ;;  %2622 = vst [vmem:[%s3681_s7 + $0x40] sm:$0xff] %v401_v43 }
  0xd7   : > { %v3055_v44 = vpop.f32.mrf.mxu0  ;;  %v3071_v45 = vpop.f32.mrf.mxu1 }
  0xd8   : > { %295 = vst [vmem:[%s3681_s7 + $0x18] sm:$0xff] %v3055_v44  ;;  %2625 = vst [vmem:[%s3681_s7 + $0x58] sm:$0xff] %v3071_v45 }
  0xd9   : > { %v263_v46 = vpop.f32.mrf.mxu0  ;;  %v411_v47 = vpop.f32.mrf.mxu1 }
  0xda   : > { %294 = vst [vmem:[%s3681_s7 + $0x10] sm:$0xff] %v263_v46  ;;  %2624 = vst [vmem:[%s3681_s7 + $0x50] sm:$0xff] %v411_v47 }
  0xdb   : > { %v3058_v48 = vpop.f32.mrf.mxu0  ;;  %v3074_v49 = vpop.f32.mrf.mxu1 }
  0xdc   : > { %297 = vst [vmem:[%s3681_s7 + $0x28] sm:$0xff] %v3058_v48  ;;  %2627 = vst [vmem:[%s3681_s7 + $0x68] sm:$0xff] %v3074_v49 }
  0xdd   : > { %v273_v50 = vpop.f32.mrf.mxu0  ;;  %v421_v51 = vpop.f32.mrf.mxu1 }
  0xde   : > { %296 = vst [vmem:[%s3681_s7 + $0x20] sm:$0xff] %v273_v50  ;;  %2626 = vst [vmem:[%s3681_s7 + $0x60] sm:$0xff] %v421_v51 }
  0xdf   : > { %v3061_v52 = vpop.f32.mrf.mxu0  ;;  %v3077_v53 = vpop.f32.mrf.mxu1 }
  0xe0   : > { %299 = vst [vmem:[%s3681_s7 + $0x38] sm:$0xff] %v3061_v52  ;;  %2629 = vst [vmem:[%s3681_s7 + $0x78] sm:$0xff] %v3077_v53 }
  0xe1   : > { %v283_v54 = vpop.f32.mrf.mxu0  ;;  %v431_v55 = vpop.f32.mrf.mxu1 }
  0xe2   : > { %298 = vst [vmem:[%s3681_s7 + $0x30] sm:$0xff] %v283_v54  ;;  %2628 = vst [vmem:[%s3681_s7 + $0x70] sm:$0xff] %v431_v55 }
  0xe3   : > { %v3084_v56 = vpop.f32.mrf.mxu0  ;;  %v3100_v57 = vpop.f32.mrf.mxu1 }
  0xe4   : > { %2641 = vst [vmem:[%s3681_s7 + $0x88] sm:$0xff] %v3084_v56  ;;  %2659 = vst [vmem:[%s3681_s7 + $0xc8] sm:$0xff] %v3100_v57 }
  0xe5   : > { %v550_v58 = vpop.f32.mrf.mxu0  ;;  %v699_v59 = vpop.f32.mrf.mxu1 }
  0xe6   : > { %2640 = vst [vmem:[%s3681_s7 + $0x80] sm:$0xff] %v550_v58  ;;  %2658 = vst [vmem:[%s3681_s7 + $0xc0] sm:$0xff] %v699_v59 }
  0xe7   : > { %v3087_v60 = vpop.f32.mrf.mxu0  ;;  %v3103_v61 = vpop.f32.mrf.mxu1 }
  0xe8   : > { %2643 = vst [vmem:[%s3681_s7 + $0x98] sm:$0xff] %v3087_v60  ;;  %2661 = vst [vmem:[%s3681_s7 + $0xd8] sm:$0xff] %v3103_v61 }
  0xe9   : > { %v560_v62 = vpop.f32.mrf.mxu0  ;;  %v709_v63 = vpop.f32.mrf.mxu1 }
  0xea   : > { %2642 = vst [vmem:[%s3681_s7 + $0x90] sm:$0xff] %v560_v62  ;;  %2660 = vst [vmem:[%s3681_s7 + $0xd0] sm:$0xff] %v709_v63 }
  0xeb   : > { %v3090_v0 = vpop.f32.mrf.mxu0  ;;  %v3106_v1 = vpop.f32.mrf.mxu1 }
  0xec   : > { %2645 = vst [vmem:[%s3681_s7 + $0xa8] sm:$0xff] %v3090_v0  ;;  %2663 = vst [vmem:[%s3681_s7 + $0xe8] sm:$0xff] %v3106_v1 }
  0xed   : > { %v570_v2 = vpop.f32.mrf.mxu0  ;;  %v719_v3 = vpop.f32.mrf.mxu1 }
  0xee   : > { %2644 = vst [vmem:[%s3681_s7 + $0xa0] sm:$0xff] %v570_v2  ;;  %2662 = vst [vmem:[%s3681_s7 + $0xe0] sm:$0xff] %v719_v3 }
  0xef   : > { %v3093_v4 = vpop.f32.mrf.mxu0  ;;  %v3109_v5 = vpop.f32.mrf.mxu1 }
  0xf0   : > { %2647 = vst [vmem:[%s3681_s7 + $0xb8] sm:$0xff] %v3093_v4  ;;  %2665 = vst [vmem:[%s3681_s7 + $0xf8] sm:$0xff] %v3109_v5 }
  0xf1   : > { %v580_v6 = vpop.f32.mrf.mxu0  ;;  %v729_v7 = vpop.f32.mrf.mxu1 }
  0xf2   : > { %2646 = vst [vmem:[%s3681_s7 + $0xb0] sm:$0xff] %v580_v6  ;;  %2664 = vst [vmem:[%s3681_s7 + $0xf0] sm:$0xff] %v729_v7 }
  0xf3   : > { %v3116_v8 = vpop.f32.mrf.mxu0  ;;  %v3132_v9 = vpop.f32.mrf.mxu1 }
  0xf4   : > { %2677 = vst [vmem:[%s3681_s7 + $0x108] sm:$0xff] %v3116_v8  ;;  %2695 = vst [vmem:[%s3681_s7 + $0x148] sm:$0xff] %v3132_v9 }
  0xf5   : > { %v848_v10 = vpop.f32.mrf.mxu0  ;;  %v997_v11 = vpop.f32.mrf.mxu1 }
  0xf6   : > { %2676 = vst [vmem:[%s3681_s7 + $0x100] sm:$0xff] %v848_v10  ;;  %2694 = vst [vmem:[%s3681_s7 + $0x140] sm:$0xff] %v997_v11 }
  0xf7   : > { %v3119_v12 = vpop.f32.mrf.mxu0  ;;  %v3135_v13 = vpop.f32.mrf.mxu1 }
  0xf8   : > { %2679 = vst [vmem:[%s3681_s7 + $0x118] sm:$0xff] %v3119_v12  ;;  %2697 = vst [vmem:[%s3681_s7 + $0x158] sm:$0xff] %v3135_v13 }
  0xf9   : > { %v858_v14 = vpop.f32.mrf.mxu0  ;;  %v1007_v15 = vpop.f32.mrf.mxu1 }
  0xfa   : > { %2678 = vst [vmem:[%s3681_s7 + $0x110] sm:$0xff] %v858_v14  ;;  %2696 = vst [vmem:[%s3681_s7 + $0x150] sm:$0xff] %v1007_v15 }
  0xfb   : > { %v3122_v16 = vpop.f32.mrf.mxu0  ;;  %v3138_v17 = vpop.f32.mrf.mxu1 }
  0xfc   : > { %2681 = vst [vmem:[%s3681_s7 + $0x128] sm:$0xff] %v3122_v16  ;;  %2699 = vst [vmem:[%s3681_s7 + $0x168] sm:$0xff] %v3138_v17 }
  0xfd   : > { %v868_v18 = vpop.f32.mrf.mxu0  ;;  %v1017_v19 = vpop.f32.mrf.mxu1 }
  0xfe   : > { %2680 = vst [vmem:[%s3681_s7 + $0x120] sm:$0xff] %v868_v18  ;;  %2698 = vst [vmem:[%s3681_s7 + $0x160] sm:$0xff] %v1017_v19 }
  0xff   : > { %v3125_v20 = vpop.f32.mrf.mxu0  ;;  %v3141_v21 = vpop.f32.mrf.mxu1 }
 0x100   : > { %2683 = vst [vmem:[%s3681_s7 + $0x138] sm:$0xff] %v3125_v20  ;;  %2701 = vst [vmem:[%s3681_s7 + $0x178] sm:$0xff] %v3141_v21 }
 0x101   : > { %v878_v22 = vpop.f32.mrf.mxu0  ;;  %v1027_v23 = vpop.f32.mrf.mxu1 }
 0x102   : > { %2682 = vst [vmem:[%s3681_s7 + $0x130] sm:$0xff] %v878_v22  ;;  %2700 = vst [vmem:[%s3681_s7 + $0x170] sm:$0xff] %v1027_v23 }
 0x103   : > { %v3148_v24 = vpop.f32.mrf.mxu0  ;;  %v3164_v25 = vpop.f32.mrf.mxu1 }
 0x104   : > { %2713 = vst [vmem:[%s3681_s7 + $0x188] sm:$0xff] %v3148_v24  ;;  %2731 = vst [vmem:[%s3681_s7 + $0x1c8] sm:$0xff] %v3164_v25 }
 0x105   : > { %v1146_v26 = vpop.f32.mrf.mxu0  ;;  %v1295_v27 = vpop.f32.mrf.mxu1 }
 0x106   : > { %2712 = vst [vmem:[%s3681_s7 + $0x180] sm:$0xff] %v1146_v26  ;;  %2730 = vst [vmem:[%s3681_s7 + $0x1c0] sm:$0xff] %v1295_v27 }
 0x107   : > { %v3151_v28 = vpop.f32.mrf.mxu0  ;;  %v3167_v29 = vpop.f32.mrf.mxu1 }
 0x108   : > { %2715 = vst [vmem:[%s3681_s7 + $0x198] sm:$0xff] %v3151_v28  ;;  %2733 = vst [vmem:[%s3681_s7 + $0x1d8] sm:$0xff] %v3167_v29 }
 0x109   : > { %v1156_v30 = vpop.f32.mrf.mxu0  ;;  %v1305_v31 = vpop.f32.mrf.mxu1 }
 0x10a   : > { %2714 = vst [vmem:[%s3681_s7 + $0x190] sm:$0xff] %v1156_v30  ;;  %2732 = vst [vmem:[%s3681_s7 + $0x1d0] sm:$0xff] %v1305_v31 }
 0x10b   : > { %v3154_v32 = vpop.f32.mrf.mxu0  ;;  %v3170_v33 = vpop.f32.mrf.mxu1 }
 0x10c   : > { %2717 = vst [vmem:[%s3681_s7 + $0x1a8] sm:$0xff] %v3154_v32  ;;  %2735 = vst [vmem:[%s3681_s7 + $0x1e8] sm:$0xff] %v3170_v33 }
 0x10d   : > { %v1166_v34 = vpop.f32.mrf.mxu0  ;;  %v1315_v35 = vpop.f32.mrf.mxu1 }
 0x10e   : > { %2716 = vst [vmem:[%s3681_s7 + $0x1a0] sm:$0xff] %v1166_v34  ;;  %2734 = vst [vmem:[%s3681_s7 + $0x1e0] sm:$0xff] %v1315_v35 }
 0x10f   : > { %v3157_v36 = vpop.f32.mrf.mxu0  ;;  %v3173_v37 = vpop.f32.mrf.mxu1 }
 0x110   : > { %2719 = vst [vmem:[%s3681_s7 + $0x1b8] sm:$0xff] %v3157_v36  ;;  %2737 = vst [vmem:[%s3681_s7 + $0x1f8] sm:$0xff] %v3173_v37 }
 0x111   : > { %v1176_v38 = vpop.f32.mrf.mxu0  ;;  %v1325_v39 = vpop.f32.mrf.mxu1 }
 0x112   : > { %2718 = vst [vmem:[%s3681_s7 + $0x1b0] sm:$0xff] %v1176_v38  ;;  %2736 = vst [vmem:[%s3681_s7 + $0x1f0] sm:$0xff] %v1325_v39 }
 0x113   : > { %v3180_v40 = vpop.f32.mrf.mxu0  ;;  %v3196_v41 = vpop.f32.mrf.mxu1 }
 0x114   : > { %2749 = vst [vmem:[%s3681_s7 + $0x208] sm:$0xff] %v3180_v40  ;;  %2767 = vst [vmem:[%s3681_s7 + $0x248] sm:$0xff] %v3196_v41 }
 0x115   : > { %v1444_v42 = vpop.f32.mrf.mxu0  ;;  %v1593_v43 = vpop.f32.mrf.mxu1 }
 0x116   : > { %2748 = vst [vmem:[%s3681_s7 + $0x200] sm:$0xff] %v1444_v42  ;;  %2766 = vst [vmem:[%s3681_s7 + $0x240] sm:$0xff] %v1593_v43 }
 0x117   : > { %v3183_v44 = vpop.f32.mrf.mxu0  ;;  %v3199_v45 = vpop.f32.mrf.mxu1 }
 0x118   : > { %2751 = vst [vmem:[%s3681_s7 + $0x218] sm:$0xff] %v3183_v44  ;;  %2769 = vst [vmem:[%s3681_s7 + $0x258] sm:$0xff] %v3199_v45 }
 0x119   : > { %v1454_v46 = vpop.f32.mrf.mxu0  ;;  %v1603_v47 = vpop.f32.mrf.mxu1 }
 0x11a   : > { %2750 = vst [vmem:[%s3681_s7 + $0x210] sm:$0xff] %v1454_v46  ;;  %2768 = vst [vmem:[%s3681_s7 + $0x250] sm:$0xff] %v1603_v47 }
 0x11b   : > { %v3186_v48 = vpop.f32.mrf.mxu0  ;;  %v3202_v49 = vpop.f32.mrf.mxu1 }
 0x11c   : > { %2753 = vst [vmem:[%s3681_s7 + $0x228] sm:$0xff] %v3186_v48  ;;  %2771 = vst [vmem:[%s3681_s7 + $0x268] sm:$0xff] %v3202_v49 }
 0x11d   : > { %v1464_v50 = vpop.f32.mrf.mxu0  ;;  %v1613_v51 = vpop.f32.mrf.mxu1 }
 0x11e   : > { %2752 = vst [vmem:[%s3681_s7 + $0x220] sm:$0xff] %v1464_v50  ;;  %2770 = vst [vmem:[%s3681_s7 + $0x260] sm:$0xff] %v1613_v51 }
 0x11f   : > { %v3189_v52 = vpop.f32.mrf.mxu0  ;;  %v3205_v53 = vpop.f32.mrf.mxu1 }
 0x120   : > { %2755 = vst [vmem:[%s3681_s7 + $0x238] sm:$0xff] %v3189_v52  ;;  %2773 = vst [vmem:[%s3681_s7 + $0x278] sm:$0xff] %v3205_v53 }
 0x121   : > { %v1474_v54 = vpop.f32.mrf.mxu0  ;;  %v1623_v55 = vpop.f32.mrf.mxu1 }
 0x122   : > { %2754 = vst [vmem:[%s3681_s7 + $0x230] sm:$0xff] %v1474_v54  ;;  %2772 = vst [vmem:[%s3681_s7 + $0x270] sm:$0xff] %v1623_v55 }
 0x123   : > { %v3212_v56 = vpop.f32.mrf.mxu0  ;;  %v3228_v57 = vpop.f32.mrf.mxu1 }
 0x124   : > { %2785 = vst [vmem:[%s3681_s7 + $0x288] sm:$0xff] %v3212_v56  ;;  %2803 = vst [vmem:[%s3681_s7 + $0x2c8] sm:$0xff] %v3228_v57 }
 0x125   : > { %v1742_v58 = vpop.f32.mrf.mxu0  ;;  %v1891_v59 = vpop.f32.mrf.mxu1 }
 0x126   : > { %2784 = vst [vmem:[%s3681_s7 + $0x280] sm:$0xff] %v1742_v58  ;;  %2802 = vst [vmem:[%s3681_s7 + $0x2c0] sm:$0xff] %v1891_v59 }
 0x127   : > { %v3215_v60 = vpop.f32.mrf.mxu0  ;;  %v3231_v61 = vpop.f32.mrf.mxu1 }
 0x128   : > { %2787 = vst [vmem:[%s3681_s7 + $0x298] sm:$0xff] %v3215_v60  ;;  %2805 = vst [vmem:[%s3681_s7 + $0x2d8] sm:$0xff] %v3231_v61 }
 0x129   : > { %v1752_v62 = vpop.f32.mrf.mxu0  ;;  %v1901_v63 = vpop.f32.mrf.mxu1 }
 0x12a   : > { %2786 = vst [vmem:[%s3681_s7 + $0x290] sm:$0xff] %v1752_v62  ;;  %2804 = vst [vmem:[%s3681_s7 + $0x2d0] sm:$0xff] %v1901_v63 }
 0x12b   : > { %v3218_v0 = vpop.f32.mrf.mxu0  ;;  %v3234_v1 = vpop.f32.mrf.mxu1 }
 0x12c   : > { %2789 = vst [vmem:[%s3681_s7 + $0x2a8] sm:$0xff] %v3218_v0  ;;  %2807 = vst [vmem:[%s3681_s7 + $0x2e8] sm:$0xff] %v3234_v1 }
 0x12d   : > { %v1762_v2 = vpop.f32.mrf.mxu0  ;;  %v1911_v3 = vpop.f32.mrf.mxu1 }
 0x12e   : > { %2788 = vst [vmem:[%s3681_s7 + $0x2a0] sm:$0xff] %v1762_v2  ;;  %2806 = vst [vmem:[%s3681_s7 + $0x2e0] sm:$0xff] %v1911_v3 }
 0x12f   : > { %v3221_v4 = vpop.f32.mrf.mxu0  ;;  %v3237_v5 = vpop.f32.mrf.mxu1 }
 0x130   : > { %2791 = vst [vmem:[%s3681_s7 + $0x2b8] sm:$0xff] %v3221_v4  ;;  %2809 = vst [vmem:[%s3681_s7 + $0x2f8] sm:$0xff] %v3237_v5 }
 0x131   : > { %v1772_v6 = vpop.f32.mrf.mxu0  ;;  %v1921_v7 = vpop.f32.mrf.mxu1 }
 0x132   : > { %2790 = vst [vmem:[%s3681_s7 + $0x2b0] sm:$0xff] %v1772_v6  ;;  %2808 = vst [vmem:[%s3681_s7 + $0x2f0] sm:$0xff] %v1921_v7 }
 0x133   : > { %v3244_v8 = vpop.f32.mrf.mxu0  ;;  %v3260_v9 = vpop.f32.mrf.mxu1 }
 0x134   : > { %2821 = vst [vmem:[%s3681_s7 + $0x308] sm:$0xff] %v3244_v8  ;;  %2839 = vst [vmem:[%s3681_s7 + $0x348] sm:$0xff] %v3260_v9 }
 0x135   : > { %v2040_v10 = vpop.f32.mrf.mxu0  ;;  %v2189_v11 = vpop.f32.mrf.mxu1 }
 0x136   : > { %2820 = vst [vmem:[%s3681_s7 + $0x300] sm:$0xff] %v2040_v10  ;;  %2838 = vst [vmem:[%s3681_s7 + $0x340] sm:$0xff] %v2189_v11 }
 0x137   : > { %v3247_v12 = vpop.f32.mrf.mxu0  ;;  %v3263_v13 = vpop.f32.mrf.mxu1 }
 0x138   : > { %2823 = vst [vmem:[%s3681_s7 + $0x318] sm:$0xff] %v3247_v12  ;;  %2841 = vst [vmem:[%s3681_s7 + $0x358] sm:$0xff] %v3263_v13 }
 0x139   : > { %v2050_v14 = vpop.f32.mrf.mxu0  ;;  %v2199_v15 = vpop.f32.mrf.mxu1 }
 0x13a   : > { %2822 = vst [vmem:[%s3681_s7 + $0x310] sm:$0xff] %v2050_v14  ;;  %2840 = vst [vmem:[%s3681_s7 + $0x350] sm:$0xff] %v2199_v15 }
 0x13b   : > { %v3250_v16 = vpop.f32.mrf.mxu0  ;;  %v3266_v17 = vpop.f32.mrf.mxu1 }
 0x13c   : > { %2825 = vst [vmem:[%s3681_s7 + $0x328] sm:$0xff] %v3250_v16  ;;  %2843 = vst [vmem:[%s3681_s7 + $0x368] sm:$0xff] %v3266_v17 }
 0x13d   : > { %v2060_v18 = vpop.f32.mrf.mxu0  ;;  %v2209_v19 = vpop.f32.mrf.mxu1 }
 0x13e   : > { %2824 = vst [vmem:[%s3681_s7 + $0x320] sm:$0xff] %v2060_v18  ;;  %2842 = vst [vmem:[%s3681_s7 + $0x360] sm:$0xff] %v2209_v19 }
 0x13f   : > { %v3253_v20 = vpop.f32.mrf.mxu0  ;;  %v3269_v21 = vpop.f32.mrf.mxu1 }
 0x140   : > { %2827 = vst [vmem:[%s3681_s7 + $0x338] sm:$0xff] %v3253_v20  ;;  %2845 = vst [vmem:[%s3681_s7 + $0x378] sm:$0xff] %v3269_v21 }
 0x141   : > { %v2070_v22 = vpop.f32.mrf.mxu0  ;;  %v2219_v23 = vpop.f32.mrf.mxu1 }
 0x142   : > { %2826 = vst [vmem:[%s3681_s7 + $0x330] sm:$0xff] %v2070_v22  ;;  %2844 = vst [vmem:[%s3681_s7 + $0x370] sm:$0xff] %v2219_v23 }
 0x143   : > { %v3276_v24 = vpop.f32.mrf.mxu0  ;;  %v3292_v25 = vpop.f32.mrf.mxu1 }
 0x144   : > { %2857 = vst [vmem:[%s3681_s7 + $0x388] sm:$0xff] %v3276_v24  ;;  %2875 = vst [vmem:[%s3681_s7 + $0x3c8] sm:$0xff] %v3292_v25 }
 0x145   : > { %v2338_v26 = vpop.f32.mrf.mxu0  ;;  %v2487_v27 = vpop.f32.mrf.mxu1 }
 0x146   : > { %2856 = vst [vmem:[%s3681_s7 + $0x380] sm:$0xff] %v2338_v26  ;;  %2874 = vst [vmem:[%s3681_s7 + $0x3c0] sm:$0xff] %v2487_v27 }
 0x147   : > { %v3279_v28 = vpop.f32.mrf.mxu0  ;;  %v3295_v29 = vpop.f32.mrf.mxu1 }
 0x148   : > { %2859 = vst [vmem:[%s3681_s7 + $0x398] sm:$0xff] %v3279_v28  ;;  %2877 = vst [vmem:[%s3681_s7 + $0x3d8] sm:$0xff] %v3295_v29 }
 0x149   : > { %v2348_v30 = vpop.f32.mrf.mxu0  ;;  %v2497_v31 = vpop.f32.mrf.mxu1 }
 0x14a   : > { %2858 = vst [vmem:[%s3681_s7 + $0x390] sm:$0xff] %v2348_v30  ;;  %2876 = vst [vmem:[%s3681_s7 + $0x3d0] sm:$0xff] %v2497_v31 }
 0x14b   : > { %v3282_v32 = vpop.f32.mrf.mxu0  ;;  %v3298_v33 = vpop.f32.mrf.mxu1 }
 0x14c   : > { %2861 = vst [vmem:[%s3681_s7 + $0x3a8] sm:$0xff] %v3282_v32  ;;  %2879 = vst [vmem:[%s3681_s7 + $0x3e8] sm:$0xff] %v3298_v33 }
 0x14d   : > { %v2358_v34 = vpop.f32.mrf.mxu0  ;;  %v2507_v35 = vpop.f32.mrf.mxu1 }
 0x14e   : > { %2860 = vst [vmem:[%s3681_s7 + $0x3a0] sm:$0xff] %v2358_v34  ;;  %2878 = vst [vmem:[%s3681_s7 + $0x3e0] sm:$0xff] %v2507_v35 }
 0x14f   : > { %v3285_v36 = vpop.f32.mrf.mxu0  ;;  %v3301_v37 = vpop.f32.mrf.mxu1 }
 0x150   : > { %2863 = vst [vmem:[%s3681_s7 + $0x3b8] sm:$0xff] %v3285_v36  ;;  %2881 = vst [vmem:[%s3681_s7 + $0x3f8] sm:$0xff] %v3301_v37 }
 0x151   : > { %v2368_v38 = vpop.f32.mrf.mxu0  ;;  %v2517_v39 = vpop.f32.mrf.mxu1 }
 0x152   : > { %2862 = vst [vmem:[%s3681_s7 + $0x3b0] sm:$0xff] %v2368_v38  ;;  %2880 = vst [vmem:[%s3681_s7 + $0x3f0] sm:$0xff] %v2517_v39 }
 0x153 PF: > { %s12_s9 = sadd.s32 1, %s3316_s9  }
 0x154   : > { %p9_p4 = scmp.ge.s32.totalorder %s12_s9, 10  }
 0x156   :  { %11 = sbr.rel (!%p9_p4) target bundleno = 1 (0x1), region = 88 }

</bundles_post_ra>
